<compile_context>
chip_gen: v7x
topology: tpu7x:2x2x1
jax: 0.10.0
libtpu: 0.0.40
codegen_flags: <defaults>
</compile_context>

<pallas_src>
import functools

import numpy as np
import jax
import jax.numpy as jnp
from jax.experimental import pallas as pl
from jax.experimental.pallas import tpu as pltpu


# ----------------------------------------------------------------------------
# Static tap / mask construction (host side, trace time)
# ----------------------------------------------------------------------------
def _make_taps_and_masks(H, W, K, dil, skip_center):
    """Per-tap (mask-idx, ky, kx, flat-offset) and 0/1 validity masks (T, H*W)."""
    S = H * W
    c = K // 2
    hh, ww = np.meshgrid(np.arange(H), np.arange(W), indexing="ij")
    hh = hh.reshape(-1)
    ww = ww.reshape(-1)
    taps, masks = [], []
    for ky in range(K):
        for kx in range(K):
            if skip_center and ky == c and kx == c:
                continue  # masked conv: center weight is structurally zero
            dy, dx = (ky - c) * dil, (kx - c) * dil
            valid = ((hh + dy >= 0) & (hh + dy < H) &
                     (ww + dx >= 0) & (ww + dx < W)).astype(np.float32)
            taps.append((len(masks), ky, kx, dy * W + dx))
            masks.append(valid)
    if not masks:                      # degenerate stride=1 case
        masks.append(np.zeros((S,), np.float32))
    return taps, np.stack(masks, axis=0)


# ----------------------------------------------------------------------------
# Host-side weight packing (im2col layout, channel dim padded to 8 sublanes)
# ----------------------------------------------------------------------------
def _pack_spatial_weight(w_hwio, taps, C, CP):
    """(K,K,Cin,Cout) HWIO -> (CP, T*CP) so that  conv(x) = W @ im2col(x)."""
    T = max(len(taps), 1)
    Wm = jnp.zeros((CP, T * CP), jnp.float32)
    for t, (_, ky, kx, _) in enumerate(taps):
        Wm = Wm.at[:C, t * CP:t * CP + C].set(jnp.transpose(w_hwio[ky, kx]))
    return Wm


def _pack_1x1(w_io, C, CP):
    return jnp.zeros((CP, CP), jnp.float32).at[:C, :C].set(jnp.transpose(w_io))


def _pack_bias(b, C, CP):
    return jnp.zeros((CP, 1), jnp.float32).at[:C, 0].set(b)


# ----------------------------------------------------------------------------
# Fused kernel: whole DC_branchl forward for NB images per grid step
# ----------------------------------------------------------------------------
def _dc_branchl_kernel(*refs, C, CP, L, EXT, num_module,
                       taps_mask, taps_dcl, need_mask, need_dcl):
    (x_ref, mmask_ref, dmask_ref, wm_ref, bm_ref,
     c1w_ref, c1b_ref, c2w_ref, c2b_ref, *rest) = refs
    dcl_refs = rest[:4 * num_module]
    c3w_ref, c3b_ref, o_ref = rest[4 * num_module:]

    f32 = jnp.float32
    zext = jnp.zeros((CP, EXT), f32)   # lane-tile aligned halo filler (hoisted)

    def dot_hi(a, b):
        return jnp.dot(a, b, preferred_element_type=f32,
                       precision=jax.lax.Precision.HIGHEST)

    def mix1x1(y, w_ref, b_ref):
        # per-pixel channel mixing: one (CP,CP)@(CP,L) matmul
        return dot_hi(w_ref[...], y) + b_ref[...]

    def spatial_conv(y, w_ref, b_ref, taps, mask_ref, need):
        # im2col over the static tap list -> ONE matmul per conv.
        # Shifted windows are lane-offset slices of a zero-extended copy;
        # out-of-image (and cross-image) taps are killed by the precomputed
        # 0/1 masks.  All-ones masks (center tap) skip the multiply.
        if not taps:
            return jnp.zeros((CP, L), f32) + b_ref[...]
        xe = None
        if any(t[3] != 0 for t in taps):
            xe = jnp.concatenate([zext, y, zext], axis=1)   # (CP, L + 2*EXT)
        cols = []
        for (mi, _, _, off), nm in zip(taps, need):
            piece = y if off == 0 else xe[:, EXT + off:EXT + off + L]
            if nm:
                piece = piece * mask_ref[pl.ds(mi, 1), :]
            cols.append(piece)
        xcat = jnp.concatenate(cols, axis=0)                # (T*CP, L)
        return dot_hi(w_ref[...], xcat) + b_ref[...]

    y = x_ref[0]                                            # (CP, L)
    # masked conv (center tap skipped at trace time, bias still added) + ReLU
    y = jnp.maximum(
        spatial_conv(y, wm_ref, bm_ref, taps_mask, mmask_ref, need_mask), 0.0)
    y = jnp.maximum(mix1x1(y, c1w_ref, c1b_ref), 0.0)
    y = jnp.maximum(mix1x1(y, c2w_ref, c2b_ref), 0.0)
    for m in range(num_module):
        w3_ref, b3_ref, w1_ref, b1_ref = dcl_refs[4 * m:4 * m + 4]
        t = jnp.maximum(
            spatial_conv(y, w3_ref, b3_ref, taps_dcl, dmask_ref, need_dcl), 0.0)
        y = y + mix1x1(t, w1_ref, b1_ref)                   # DCl residual
    y = jnp.maximum(mix1x1(y, c3w_ref, c3b_ref), 0.0)
    o_ref[0] = y[:C, :]


# ----------------------------------------------------------------------------
# Wrapper: one pallas_call for the whole branch
# ----------------------------------------------------------------------------
def dc_branchl_forward(x_nchw, params, *, stride, lane_cap=2048):
    N, C, H, W = x_nchw.shape
    S = H * W
    K = 2 * stride - 1
    CP = ((C + 7) // 8) * 8                   # channels padded to a sublane tile
    num_module = len(params["dcl"])

    # Fold NB images onto the lane axis per grid step (lane-dense matmuls,
    # fewer grid iterations); pad the batch up to a multiple of NB.
    NB = max(1, min(N, lane_cap // S)) if S <= lane_cap else 1
    NBLK = -(-N // NB)
    Npad = NBLK * NB
    L = NB * S

    need = max(1, stride) * (W + 1)           # max |flat tap offset|
    EXT = ((need + 127) // 128) * 128         # lane-tile aligned halo width

    taps_mask, mmask_np = _make_taps_and_masks(H, W, K, 1, skip_center=True)
    taps_dcl, dmask_np = _make_taps_and_masks(H, W, 3, stride, skip_center=False)
    need_mask = [not np.all(mmask_np[t[0]] == 1.0) for t in taps_mask]
    need_dcl = [not np.all(dmask_np[t[0]] == 1.0) for t in taps_dcl]

    # Per-image masks tiled across the NB images folded onto the lane axis.
    mmasks = jnp.asarray(np.tile(mmask_np, (1, NB)))
    dmasks = jnp.asarray(np.tile(dmask_np, (1, NB)))

    # One-time layout prep in XLA: NCHW -> (NBLK, CP, NB*S).
    # (No per-layer spatial pads / activation HBM round-trips anywhere.)
    x = x_nchw.reshape(N, C, S).astype(jnp.float32)
    x = jnp.pad(x, ((0, Npad - N), (0, CP - C), (0, 0)))
    x = x.reshape(NBLK, NB, CP, S).transpose(0, 2, 1, 3).reshape(NBLK, CP, L)

    ops = [_pack_spatial_weight(params["mask_w"], taps_mask, C, CP),
           _pack_bias(params["mask_b"], C, CP),
           _pack_1x1(params["c1_w"], C, CP), _pack_bias(params["c1_b"], C, CP),
           _pack_1x1(params["c2_w"], C, CP), _pack_bias(params["c2_b"], C, CP)]
    for (w3, b3, w1, b1) in params["dcl"]:
        ops += [_pack_spatial_weight(w3, taps_dcl, C, CP),
                _pack_bias(b3, C, CP),
                _pack_1x1(w1, C, CP), _pack_bias(b1, C, CP)]
    ops += [_pack_1x1(params["c3_w"], C, CP), _pack_bias(params["c3_b"], C, CP)]

    def full_spec(shape):
        nd = len(shape)
        return pl.BlockSpec(shape, lambda n, _nd=nd: (0,) * _nd)

    in_specs = [pl.BlockSpec((1, CP, L), lambda n: (n, 0, 0)),
                full_spec(mmasks.shape), full_spec(dmasks.shape)]
    in_specs += [full_spec(a.shape) for a in ops]

    kern = functools.partial(
        _dc_branchl_kernel, C=C, CP=CP, L=L, EXT=EXT, num_module=num_module,
        taps_mask=taps_mask, taps_dcl=taps_dcl,
        need_mask=need_mask, need_dcl=need_dcl)

    out = pl.pallas_call(
        kern,
        out_shape=jax.ShapeDtypeStruct((NBLK, C, L), jnp.float32),
        grid=(NBLK,),
        in_specs=in_specs,
        out_specs=pl.BlockSpec((1, C, L), lambda n: (n, 0, 0)),
        compiler_params=pltpu.CompilerParams(
            dimension_semantics=("parallel",)),   # use both TCs on v7x if NBLK>1
    )(x, mmasks, dmasks, *ops)

    out = (out.reshape(NBLK, C, NB, S).transpose(0, 2, 1, 3)
              .reshape(Npad, C, S)[:N].reshape(N, C, H, W))
    return out


# ----------------------------------------------------------------------------
# Pure-JAX (XLA conv) reference
# ----------------------------------------------------------------------------
def _ref_conv(x, w_hwio, b, dil):
    K = w_hwio.shape[0]
    pad = dil * (K - 1) // 2
    y = jax.lax.conv_general_dilated(
        x, w_hwio, window_strides=(1, 1),
        padding=[(pad, pad), (pad, pad)],
        rhs_dilation=(dil, dil),
        dimension_numbers=("NCHW", "HWIO", "NCHW"),
        precision=jax.lax.Precision.HIGHEST)
    return y + b.reshape(1, -1, 1, 1)


def dc_branchl_reference(x_nchw, params, stride):
    C = x_nchw.shape[1]
    as1x1 = lambda w: w.reshape(1, 1, C, C)
    y = jax.nn.relu(_ref_conv(x_nchw, params["mask_w"], params["mask_b"], 1))
    y = jax.nn.relu(_ref_conv(y, as1x1(params["c1_w"]), params["c1_b"], 1))
    y = jax.nn.relu(_ref_conv(y, as1x1(params["c2_w"]), params["c2_b"], 1))
    for (w3, b3, w1, b1) in params["dcl"]:
        t = jax.nn.relu(_ref_conv(y, w3, b3, stride))
        y = y + _ref_conv(t, as1x1(w1), b1, 1)
    y = jax.nn.relu(_ref_conv(y, as1x1(params["c3_w"]), params["c3_b"], 1))
    return y


# ----------------------------------------------------------------------------
# Deterministic parameter init (synthetic; matches shapes from __init__)
# ----------------------------------------------------------------------------
def init_params(key, in_ch, stride, num_module):
    K = 2 * stride - 1
    n_keys = 8 + 4 * num_module
    keys = jax.random.split(key, n_keys)
    s = 0.1
    ki = iter(range(n_keys))

    mask_w = s * jax.random.normal(keys[next(ki)], (K, K, in_ch, in_ch), jnp.float32)
    # CentralMaskedConv2d: zero out the center tap of the kernel.
    mask_w = mask_w.at[K // 2, K // 2, :, :].set(0.0)
    mask_b = s * jax.random.normal(keys[next(ki)], (in_ch,), jnp.float32)

    def conv1x1_p():
        w = s * jax.random.normal(keys[next(ki)], (in_ch, in_ch), jnp.float32)
        b = s * jax.random.normal(keys[next(ki)], (in_ch,), jnp.float32)
        return w, b

    c1_w, c1_b = conv1x1_p()
    c2_w, c2_b = conv1x1_p()

    dcl = []
    for _ in range(num_module):
        w3 = s * jax.random.normal(keys[next(ki)], (3, 3, in_ch, in_ch), jnp.float32)
        b3 = s * jax.random.normal(keys[next(ki)], (in_ch,), jnp.float32)
        w1, b1 = conv1x1_p()
        dcl.append((w3, b3, w1, b1))

    c3_w, c3_b = conv1x1_p()

    return dict(mask_w=mask_w, mask_b=mask_b,
                c1_w=c1_w, c1_b=c1_b, c2_w=c2_w, c2_b=c2_b,
                dcl=dcl, c3_w=c3_w, c3_b=c3_b)


# ----------------------------------------------------------------------------
if __name__ == "__main__":
    key = jax.random.PRNGKey(0)
    kx, kp = jax.random.split(key)

    N, C, H, W = 2, 4, 16, 16          # PyTorch-style NCHW input shape
    stride, num_module = 2, 2

    x_nchw = jax.random.normal(kx, (N, C, H, W), jnp.float32)
    params = init_params(kp, C, stride, num_module)

    fwd = jax.jit(functools.partial(dc_branchl_forward, stride=stride))
    out = fwd(x_nchw, params)
    jax.block_until_ready(out)

    # Correctness check against a pure-JAX (XLA conv) reference.
    ref = dc_branchl_reference(x_nchw, params, stride)
    assert out.shape == (N, C, H, W)
    max_err = float(jnp.max(jnp.abs(out - ref)))
    assert jnp.allclose(out, ref, atol=1e-4, rtol=1e-4), max_err

    print("KERNEL_OK")
</pallas_src>

<mosaic_0001>
module attributes {stable_mosaic.version = 11 : i64} {
  func.func @_dc_branchl_kernel(%arg0: i32, %arg1: memref<1x8x512xf32, #tpu.memory_space<vmem>>, %arg2: memref<8x512xf32, #tpu.memory_space<vmem>>, %arg3: memref<9x512xf32, #tpu.memory_space<vmem>>, %arg4: memref<8x64xf32, #tpu.memory_space<vmem>>, %arg5: memref<8x1xf32, #tpu.memory_space<vmem>>, %arg6: memref<8x8xf32, #tpu.memory_space<vmem>>, %arg7: memref<8x1xf32, #tpu.memory_space<vmem>>, %arg8: memref<8x8xf32, #tpu.memory_space<vmem>>, %arg9: memref<8x1xf32, #tpu.memory_space<vmem>>, %arg10: memref<8x72xf32, #tpu.memory_space<vmem>>, %arg11: memref<8x1xf32, #tpu.memory_space<vmem>>, %arg12: memref<8x8xf32, #tpu.memory_space<vmem>>, %arg13: memref<8x1xf32, #tpu.memory_space<vmem>>, %arg14: memref<8x72xf32, #tpu.memory_space<vmem>>, %arg15: memref<8x1xf32, #tpu.memory_space<vmem>>, %arg16: memref<8x8xf32, #tpu.memory_space<vmem>>, %arg17: memref<8x1xf32, #tpu.memory_space<vmem>>, %arg18: memref<8x8xf32, #tpu.memory_space<vmem>>, %arg19: memref<8x1xf32, #tpu.memory_space<vmem>>, %arg20: memref<1x4x512xf32, #tpu.memory_space<vmem>>) attributes {dimension_semantics = [#tpu.dimension_semantics<parallel>], iteration_bounds = array<i64: 1>, scalar_prefetch = 0 : i64, scratch_operands = 0 : i64, tpu.core_type = #tpu.core_type<tc>, window_params = [{transform_indices = @transform_0, window_bounds = array<i64: 1, 8, 512>}, {pipeline_mode = #tpu.pipeline_mode<synchronous>, transform_indices = @transform_1, window_bounds = array<i64: 8, 512>}, {pipeline_mode = #tpu.pipeline_mode<synchronous>, transform_indices = @transform_2, window_bounds = array<i64: 9, 512>}, {pipeline_mode = #tpu.pipeline_mode<synchronous>, transform_indices = @transform_3, window_bounds = array<i64: 8, 64>}, {pipeline_mode = #tpu.pipeline_mode<synchronous>, transform_indices = @transform_4, window_bounds = array<i64: 8, 1>}, {pipeline_mode = #tpu.pipeline_mode<synchronous>, transform_indices = @transform_5, window_bounds = array<i64: 8, 8>}, {pipeline_mode = #tpu.pipeline_mode<synchronous>, transform_indices = @transform_6, window_bounds = array<i64: 8, 1>}, {pipeline_mode = #tpu.pipeline_mode<synchronous>, transform_indices = @transform_7, window_bounds = array<i64: 8, 8>}, {pipeline_mode = #tpu.pipeline_mode<synchronous>, transform_indices = @transform_8, window_bounds = array<i64: 8, 1>}, {pipeline_mode = #tpu.pipeline_mode<synchronous>, transform_indices = @transform_9, window_bounds = array<i64: 8, 72>}, {pipeline_mode = #tpu.pipeline_mode<synchronous>, transform_indices = @transform_10, window_bounds = array<i64: 8, 1>}, {pipeline_mode = #tpu.pipeline_mode<synchronous>, transform_indices = @transform_11, window_bounds = array<i64: 8, 8>}, {pipeline_mode = #tpu.pipeline_mode<synchronous>, transform_indices = @transform_12, window_bounds = array<i64: 8, 1>}, {pipeline_mode = #tpu.pipeline_mode<synchronous>, transform_indices = @transform_13, window_bounds = array<i64: 8, 72>}, {pipeline_mode = #tpu.pipeline_mode<synchronous>, transform_indices = @transform_14, window_bounds = array<i64: 8, 1>}, {pipeline_mode = #tpu.pipeline_mode<synchronous>, transform_indices = @transform_15, window_bounds = array<i64: 8, 8>}, {pipeline_mode = #tpu.pipeline_mode<synchronous>, transform_indices = @transform_16, window_bounds = array<i64: 8, 1>}, {pipeline_mode = #tpu.pipeline_mode<synchronous>, transform_indices = @transform_17, window_bounds = array<i64: 8, 8>}, {pipeline_mode = #tpu.pipeline_mode<synchronous>, transform_indices = @transform_18, window_bounds = array<i64: 8, 1>}, {transform_indices = @transform_19, window_bounds = array<i64: 1, 4, 512>}]} {
    %cst = arith.constant 0.000000e+00 : f32
    %0 = vector.broadcast %cst : f32 to vector<8x128xf32>
    %c0 = arith.constant 0 : index
    %c0_0 = arith.constant 0 : index
    %c0_1 = arith.constant 0 : index
    %1 = vector.load %arg1[%c0, %c0_0, %c0_1] : memref<1x8x512xf32, #tpu.memory_space<vmem>>, vector<1x8x512xf32>
    %2 = vector.shape_cast %1 : vector<1x8x512xf32> to vector<8x512xf32>
    %3 = tpu.concatenate %0, %2, %0 in 1 : vector<8x128xf32>, vector<8x512xf32>, vector<8x128xf32> -> vector<8x768xf32>
    %4 = vector.extract_strided_slice %3 {offsets = [0, 111], sizes = [8, 512], strides = [1, 1]} : vector<8x768xf32> to vector<8x512xf32>
    %c0_2 = arith.constant 0 : index
    %c0_3 = arith.constant 0 : index
    %5 = vector.load %arg2[%c0_2, %c0_3] : memref<8x512xf32, #tpu.memory_space<vmem>>, vector<1x512xf32>
    %6 = vector.broadcast %5 : vector<1x512xf32> to vector<8x512xf32>
    %7 = arith.mulf %4, %6 : vector<8x512xf32>
    %8 = vector.extract_strided_slice %3 {offsets = [0, 112], sizes = [8, 512], strides = [1, 1]} : vector<8x768xf32> to vector<8x512xf32>
    %c1 = arith.constant 1 : index
    %c0_4 = arith.constant 0 : index
    %9 = vector.load %arg2[%c1, %c0_4] : memref<8x512xf32, #tpu.memory_space<vmem>>, vector<1x512xf32>
    %10 = vector.broadcast %9 : vector<1x512xf32> to vector<8x512xf32>
    %11 = arith.mulf %8, %10 : vector<8x512xf32>
    %12 = vector.extract_strided_slice %3 {offsets = [0, 113], sizes = [8, 512], strides = [1, 1]} : vector<8x768xf32> to vector<8x512xf32>
    %c2 = arith.constant 2 : index
    %c0_5 = arith.constant 0 : index
    %13 = vector.load %arg2[%c2, %c0_5] : memref<8x512xf32, #tpu.memory_space<vmem>>, vector<1x512xf32>
    %14 = vector.broadcast %13 : vector<1x512xf32> to vector<8x512xf32>
    %15 = arith.mulf %12, %14 : vector<8x512xf32>
    %16 = vector.extract_strided_slice %3 {offsets = [0, 127], sizes = [8, 512], strides = [1, 1]} : vector<8x768xf32> to vector<8x512xf32>
    %c3 = arith.constant 3 : index
    %c0_6 = arith.constant 0 : index
    %17 = vector.load %arg2[%c3, %c0_6] : memref<8x512xf32, #tpu.memory_space<vmem>>, vector<1x512xf32>
    %18 = vector.broadcast %17 : vector<1x512xf32> to vector<8x512xf32>
    %19 = arith.mulf %16, %18 : vector<8x512xf32>
    %20 = vector.extract_strided_slice %3 {offsets = [0, 129], sizes = [8, 512], strides = [1, 1]} : vector<8x768xf32> to vector<8x512xf32>
    %c4 = arith.constant 4 : index
    %c0_7 = arith.constant 0 : index
    %21 = vector.load %arg2[%c4, %c0_7] : memref<8x512xf32, #tpu.memory_space<vmem>>, vector<1x512xf32>
    %22 = vector.broadcast %21 : vector<1x512xf32> to vector<8x512xf32>
    %23 = arith.mulf %20, %22 : vector<8x512xf32>
    %24 = vector.extract_strided_slice %3 {offsets = [0, 143], sizes = [8, 512], strides = [1, 1]} : vector<8x768xf32> to vector<8x512xf32>
    %c5 = arith.constant 5 : index
    %c0_8 = arith.constant 0 : index
    %25 = vector.load %arg2[%c5, %c0_8] : memref<8x512xf32, #tpu.memory_space<vmem>>, vector<1x512xf32>
    %26 = vector.broadcast %25 : vector<1x512xf32> to vector<8x512xf32>
    %27 = arith.mulf %24, %26 : vector<8x512xf32>
    %28 = vector.extract_strided_slice %3 {offsets = [0, 144], sizes = [8, 512], strides = [1, 1]} : vector<8x768xf32> to vector<8x512xf32>
    %c6 = arith.constant 6 : index
    %c0_9 = arith.constant 0 : index
    %29 = vector.load %arg2[%c6, %c0_9] : memref<8x512xf32, #tpu.memory_space<vmem>>, vector<1x512xf32>
    %30 = vector.broadcast %29 : vector<1x512xf32> to vector<8x512xf32>
    %31 = arith.mulf %28, %30 : vector<8x512xf32>
    %32 = vector.extract_strided_slice %3 {offsets = [0, 145], sizes = [8, 512], strides = [1, 1]} : vector<8x768xf32> to vector<8x512xf32>
    %c7 = arith.constant 7 : index
    %c0_10 = arith.constant 0 : index
    %33 = vector.load %arg2[%c7, %c0_10] : memref<8x512xf32, #tpu.memory_space<vmem>>, vector<1x512xf32>
    %34 = vector.broadcast %33 : vector<1x512xf32> to vector<8x512xf32>
    %35 = arith.mulf %32, %34 : vector<8x512xf32>
    %36 = tpu.concatenate %7, %11, %15, %19, %23, %27, %31, %35 in 0 : vector<8x512xf32>, vector<8x512xf32>, vector<8x512xf32>, vector<8x512xf32>, vector<8x512xf32>, vector<8x512xf32>, vector<8x512xf32>, vector<8x512xf32> -> vector<64x512xf32>
    %c0_11 = arith.constant 0 : index
    %c0_12 = arith.constant 0 : index
    %37 = vector.load %arg4[%c0_11, %c0_12] : memref<8x64xf32, #tpu.memory_space<vmem>>, vector<8x64xf32>
    %cst_13 = arith.constant dense<0.000000e+00> : vector<8x512xf32>
    %38 = tpu.matmul %37, %36, %cst_13 {dimension_numbers = #tpu.dot_dimension_numbers<[1], [0], [0], [1], [0, 0, 1, 1], [], []>, precision = #tpu.contract_precision<fp32>} : vector<8x64xf32>, vector<64x512xf32>, vector<8x512xf32> -> vector<8x512xf32>
    %c0_14 = arith.constant 0 : index
    %c0_15 = arith.constant 0 : index
    %39 = vector.load %arg5[%c0_14, %c0_15] : memref<8x1xf32, #tpu.memory_space<vmem>>, vector<8x1xf32>
    %40 = vector.broadcast %39 : vector<8x1xf32> to vector<8x512xf32>
    %41 = arith.addf %38, %40 : vector<8x512xf32>
    %cst_16 = arith.constant 0.000000e+00 : f32
    %42 = vector.broadcast %cst_16 : f32 to vector<8x512xf32>
    %43 = arith.maximumf %41, %42 : vector<8x512xf32>
    %c0_17 = arith.constant 0 : index
    %c0_18 = arith.constant 0 : index
    %44 = vector.load %arg6[%c0_17, %c0_18] : memref<8x8xf32, #tpu.memory_space<vmem>>, vector<8x8xf32>
    %cst_19 = arith.constant dense<0.000000e+00> : vector<8x512xf32>
    %45 = tpu.matmul %44, %43, %cst_19 {dimension_numbers = #tpu.dot_dimension_numbers<[1], [0], [0], [1], [0, 0, 1, 1], [], []>, precision = #tpu.contract_precision<fp32>} : vector<8x8xf32>, vector<8x512xf32>, vector<8x512xf32> -> vector<8x512xf32>
    %c0_20 = arith.constant 0 : index
    %c0_21 = arith.constant 0 : index
    %46 = vector.load %arg7[%c0_20, %c0_21] : memref<8x1xf32, #tpu.memory_space<vmem>>, vector<8x1xf32>
    %47 = vector.broadcast %46 : vector<8x1xf32> to vector<8x512xf32>
    %48 = arith.addf %45, %47 : vector<8x512xf32>
    %cst_22 = arith.constant 0.000000e+00 : f32
    %49 = vector.broadcast %cst_22 : f32 to vector<8x512xf32>
    %50 = arith.maximumf %48, %49 : vector<8x512xf32>
    %c0_23 = arith.constant 0 : index
    %c0_24 = arith.constant 0 : index
    %51 = vector.load %arg8[%c0_23, %c0_24] : memref<8x8xf32, #tpu.memory_space<vmem>>, vector<8x8xf32>
    %cst_25 = arith.constant dense<0.000000e+00> : vector<8x512xf32>
    %52 = tpu.matmul %51, %50, %cst_25 {dimension_numbers = #tpu.dot_dimension_numbers<[1], [0], [0], [1], [0, 0, 1, 1], [], []>, precision = #tpu.contract_precision<fp32>} : vector<8x8xf32>, vector<8x512xf32>, vector<8x512xf32> -> vector<8x512xf32>
    %c0_26 = arith.constant 0 : index
    %c0_27 = arith.constant 0 : index
    %53 = vector.load %arg9[%c0_26, %c0_27] : memref<8x1xf32, #tpu.memory_space<vmem>>, vector<8x1xf32>
    %54 = vector.broadcast %53 : vector<8x1xf32> to vector<8x512xf32>
    %55 = arith.addf %52, %54 : vector<8x512xf32>
    %cst_28 = arith.constant 0.000000e+00 : f32
    %56 = vector.broadcast %cst_28 : f32 to vector<8x512xf32>
    %57 = arith.maximumf %55, %56 : vector<8x512xf32>
    %58 = tpu.concatenate %0, %57, %0 in 1 : vector<8x128xf32>, vector<8x512xf32>, vector<8x128xf32> -> vector<8x768xf32>
    %59 = vector.extract_strided_slice %58 {offsets = [0, 94], sizes = [8, 512], strides = [1, 1]} : vector<8x768xf32> to vector<8x512xf32>
    %c0_29 = arith.constant 0 : index
    %c0_30 = arith.constant 0 : index
    %60 = vector.load %arg3[%c0_29, %c0_30] : memref<9x512xf32, #tpu.memory_space<vmem>>, vector<1x512xf32>
    %61 = vector.broadcast %60 : vector<1x512xf32> to vector<8x512xf32>
    %62 = arith.mulf %59, %61 : vector<8x512xf32>
    %63 = vector.extract_strided_slice %58 {offsets = [0, 96], sizes = [8, 512], strides = [1, 1]} : vector<8x768xf32> to vector<8x512xf32>
    %c1_31 = arith.constant 1 : index
    %c0_32 = arith.constant 0 : index
    %64 = vector.load %arg3[%c1_31, %c0_32] : memref<9x512xf32, #tpu.memory_space<vmem>>, vector<1x512xf32>
    %65 = vector.broadcast %64 : vector<1x512xf32> to vector<8x512xf32>
    %66 = arith.mulf %63, %65 : vector<8x512xf32>
    %67 = vector.extract_strided_slice %58 {offsets = [0, 98], sizes = [8, 512], strides = [1, 1]} : vector<8x768xf32> to vector<8x512xf32>
    %c2_33 = arith.constant 2 : index
    %c0_34 = arith.constant 0 : index
    %68 = vector.load %arg3[%c2_33, %c0_34] : memref<9x512xf32, #tpu.memory_space<vmem>>, vector<1x512xf32>
    %69 = vector.broadcast %68 : vector<1x512xf32> to vector<8x512xf32>
    %70 = arith.mulf %67, %69 : vector<8x512xf32>
    %71 = vector.extract_strided_slice %58 {offsets = [0, 126], sizes = [8, 512], strides = [1, 1]} : vector<8x768xf32> to vector<8x512xf32>
    %c3_35 = arith.constant 3 : index
    %c0_36 = arith.constant 0 : index
    %72 = vector.load %arg3[%c3_35, %c0_36] : memref<9x512xf32, #tpu.memory_space<vmem>>, vector<1x512xf32>
    %73 = vector.broadcast %72 : vector<1x512xf32> to vector<8x512xf32>
    %74 = arith.mulf %71, %73 : vector<8x512xf32>
    %75 = vector.extract_strided_slice %58 {offsets = [0, 130], sizes = [8, 512], strides = [1, 1]} : vector<8x768xf32> to vector<8x512xf32>
    %c5_37 = arith.constant 5 : index
    %c0_38 = arith.constant 0 : index
    %76 = vector.load %arg3[%c5_37, %c0_38] : memref<9x512xf32, #tpu.memory_space<vmem>>, vector<1x512xf32>
    %77 = vector.broadcast %76 : vector<1x512xf32> to vector<8x512xf32>
    %78 = arith.mulf %75, %77 : vector<8x512xf32>
    %79 = vector.extract_strided_slice %58 {offsets = [0, 158], sizes = [8, 512], strides = [1, 1]} : vector<8x768xf32> to vector<8x512xf32>
    %c6_39 = arith.constant 6 : index
    %c0_40 = arith.constant 0 : index
    %80 = vector.load %arg3[%c6_39, %c0_40] : memref<9x512xf32, #tpu.memory_space<vmem>>, vector<1x512xf32>
    %81 = vector.broadcast %80 : vector<1x512xf32> to vector<8x512xf32>
    %82 = arith.mulf %79, %81 : vector<8x512xf32>
    %83 = vector.extract_strided_slice %58 {offsets = [0, 160], sizes = [8, 512], strides = [1, 1]} : vector<8x768xf32> to vector<8x512xf32>
    %c7_41 = arith.constant 7 : index
    %c0_42 = arith.constant 0 : index
    %84 = vector.load %arg3[%c7_41, %c0_42] : memref<9x512xf32, #tpu.memory_space<vmem>>, vector<1x512xf32>
    %85 = vector.broadcast %84 : vector<1x512xf32> to vector<8x512xf32>
    %86 = arith.mulf %83, %85 : vector<8x512xf32>
    %87 = vector.extract_strided_slice %58 {offsets = [0, 162], sizes = [8, 512], strides = [1, 1]} : vector<8x768xf32> to vector<8x512xf32>
    %c8 = arith.constant 8 : index
    %c0_43 = arith.constant 0 : index
    %88 = vector.load %arg3[%c8, %c0_43] : memref<9x512xf32, #tpu.memory_space<vmem>>, vector<1x512xf32>
    %89 = vector.broadcast %88 : vector<1x512xf32> to vector<8x512xf32>
    %90 = arith.mulf %87, %89 : vector<8x512xf32>
    %91 = tpu.concatenate %62, %66, %70, %74, %57, %78, %82, %86, %90 in 0 : vector<8x512xf32>, vector<8x512xf32>, vector<8x512xf32>, vector<8x512xf32>, vector<8x512xf32>, vector<8x512xf32>, vector<8x512xf32>, vector<8x512xf32>, vector<8x512xf32> -> vector<72x512xf32>
    %c0_44 = arith.constant 0 : index
    %c0_45 = arith.constant 0 : index
    %92 = vector.load %arg10[%c0_44, %c0_45] : memref<8x72xf32, #tpu.memory_space<vmem>>, vector<8x72xf32>
    %cst_46 = arith.constant dense<0.000000e+00> : vector<8x512xf32>
    %93 = tpu.matmul %92, %91, %cst_46 {dimension_numbers = #tpu.dot_dimension_numbers<[1], [0], [0], [1], [0, 0, 1, 1], [], []>, precision = #tpu.contract_precision<fp32>} : vector<8x72xf32>, vector<72x512xf32>, vector<8x512xf32> -> vector<8x512xf32>
    %c0_47 = arith.constant 0 : index
    %c0_48 = arith.constant 0 : index
    %94 = vector.load %arg11[%c0_47, %c0_48] : memref<8x1xf32, #tpu.memory_space<vmem>>, vector<8x1xf32>
    %95 = vector.broadcast %94 : vector<8x1xf32> to vector<8x512xf32>
    %96 = arith.addf %93, %95 : vector<8x512xf32>
    %cst_49 = arith.constant 0.000000e+00 : f32
    %97 = vector.broadcast %cst_49 : f32 to vector<8x512xf32>
    %98 = arith.maximumf %96, %97 : vector<8x512xf32>
    %c0_50 = arith.constant 0 : index
    %c0_51 = arith.constant 0 : index
    %99 = vector.load %arg12[%c0_50, %c0_51] : memref<8x8xf32, #tpu.memory_space<vmem>>, vector<8x8xf32>
    %cst_52 = arith.constant dense<0.000000e+00> : vector<8x512xf32>
    %100 = tpu.matmul %99, %98, %cst_52 {dimension_numbers = #tpu.dot_dimension_numbers<[1], [0], [0], [1], [0, 0, 1, 1], [], []>, precision = #tpu.contract_precision<fp32>} : vector<8x8xf32>, vector<8x512xf32>, vector<8x512xf32> -> vector<8x512xf32>
    %c0_53 = arith.constant 0 : index
    %c0_54 = arith.constant 0 : index
    %101 = vector.load %arg13[%c0_53, %c0_54] : memref<8x1xf32, #tpu.memory_space<vmem>>, vector<8x1xf32>
    %102 = vector.broadcast %101 : vector<8x1xf32> to vector<8x512xf32>
    %103 = arith.addf %100, %102 : vector<8x512xf32>
    %104 = arith.addf %57, %103 : vector<8x512xf32>
    %105 = tpu.concatenate %0, %104, %0 in 1 : vector<8x128xf32>, vector<8x512xf32>, vector<8x128xf32> -> vector<8x768xf32>
    %106 = vector.extract_strided_slice %105 {offsets = [0, 94], sizes = [8, 512], strides = [1, 1]} : vector<8x768xf32> to vector<8x512xf32>
    %c0_55 = arith.constant 0 : index
    %c0_56 = arith.constant 0 : index
    %107 = vector.load %arg3[%c0_55, %c0_56] : memref<9x512xf32, #tpu.memory_space<vmem>>, vector<1x512xf32>
    %108 = vector.broadcast %107 : vector<1x512xf32> to vector<8x512xf32>
    %109 = arith.mulf %106, %108 : vector<8x512xf32>
    %110 = vector.extract_strided_slice %105 {offsets = [0, 96], sizes = [8, 512], strides = [1, 1]} : vector<8x768xf32> to vector<8x512xf32>
    %c1_57 = arith.constant 1 : index
    %c0_58 = arith.constant 0 : index
    %111 = vector.load %arg3[%c1_57, %c0_58] : memref<9x512xf32, #tpu.memory_space<vmem>>, vector<1x512xf32>
    %112 = vector.broadcast %111 : vector<1x512xf32> to vector<8x512xf32>
    %113 = arith.mulf %110, %112 : vector<8x512xf32>
    %114 = vector.extract_strided_slice %105 {offsets = [0, 98], sizes = [8, 512], strides = [1, 1]} : vector<8x768xf32> to vector<8x512xf32>
    %c2_59 = arith.constant 2 : index
    %c0_60 = arith.constant 0 : index
    %115 = vector.load %arg3[%c2_59, %c0_60] : memref<9x512xf32, #tpu.memory_space<vmem>>, vector<1x512xf32>
    %116 = vector.broadcast %115 : vector<1x512xf32> to vector<8x512xf32>
    %117 = arith.mulf %114, %116 : vector<8x512xf32>
    %118 = vector.extract_strided_slice %105 {offsets = [0, 126], sizes = [8, 512], strides = [1, 1]} : vector<8x768xf32> to vector<8x512xf32>
    %c3_61 = arith.constant 3 : index
    %c0_62 = arith.constant 0 : index
    %119 = vector.load %arg3[%c3_61, %c0_62] : memref<9x512xf32, #tpu.memory_space<vmem>>, vector<1x512xf32>
    %120 = vector.broadcast %119 : vector<1x512xf32> to vector<8x512xf32>
    %121 = arith.mulf %118, %120 : vector<8x512xf32>
    %122 = vector.extract_strided_slice %105 {offsets = [0, 130], sizes = [8, 512], strides = [1, 1]} : vector<8x768xf32> to vector<8x512xf32>
    %c5_63 = arith.constant 5 : index
    %c0_64 = arith.constant 0 : index
    %123 = vector.load %arg3[%c5_63, %c0_64] : memref<9x512xf32, #tpu.memory_space<vmem>>, vector<1x512xf32>
    %124 = vector.broadcast %123 : vector<1x512xf32> to vector<8x512xf32>
    %125 = arith.mulf %122, %124 : vector<8x512xf32>
    %126 = vector.extract_strided_slice %105 {offsets = [0, 158], sizes = [8, 512], strides = [1, 1]} : vector<8x768xf32> to vector<8x512xf32>
    %c6_65 = arith.constant 6 : index
    %c0_66 = arith.constant 0 : index
    %127 = vector.load %arg3[%c6_65, %c0_66] : memref<9x512xf32, #tpu.memory_space<vmem>>, vector<1x512xf32>
    %128 = vector.broadcast %127 : vector<1x512xf32> to vector<8x512xf32>
    %129 = arith.mulf %126, %128 : vector<8x512xf32>
    %130 = vector.extract_strided_slice %105 {offsets = [0, 160], sizes = [8, 512], strides = [1, 1]} : vector<8x768xf32> to vector<8x512xf32>
    %c7_67 = arith.constant 7 : index
    %c0_68 = arith.constant 0 : index
    %131 = vector.load %arg3[%c7_67, %c0_68] : memref<9x512xf32, #tpu.memory_space<vmem>>, vector<1x512xf32>
    %132 = vector.broadcast %131 : vector<1x512xf32> to vector<8x512xf32>
    %133 = arith.mulf %130, %132 : vector<8x512xf32>
    %134 = vector.extract_strided_slice %105 {offsets = [0, 162], sizes = [8, 512], strides = [1, 1]} : vector<8x768xf32> to vector<8x512xf32>
    %c8_69 = arith.constant 8 : index
    %c0_70 = arith.constant 0 : index
    %135 = vector.load %arg3[%c8_69, %c0_70] : memref<9x512xf32, #tpu.memory_space<vmem>>, vector<1x512xf32>
    %136 = vector.broadcast %135 : vector<1x512xf32> to vector<8x512xf32>
    %137 = arith.mulf %134, %136 : vector<8x512xf32>
    %138 = tpu.concatenate %109, %113, %117, %121, %104, %125, %129, %133, %137 in 0 : vector<8x512xf32>, vector<8x512xf32>, vector<8x512xf32>, vector<8x512xf32>, vector<8x512xf32>, vector<8x512xf32>, vector<8x512xf32>, vector<8x512xf32>, vector<8x512xf32> -> vector<72x512xf32>
    %c0_71 = arith.constant 0 : index
    %c0_72 = arith.constant 0 : index
    %139 = vector.load %arg14[%c0_71, %c0_72] : memref<8x72xf32, #tpu.memory_space<vmem>>, vector<8x72xf32>
    %cst_73 = arith.constant dense<0.000000e+00> : vector<8x512xf32>
    %140 = tpu.matmul %139, %138, %cst_73 {dimension_numbers = #tpu.dot_dimension_numbers<[1], [0], [0], [1], [0, 0, 1, 1], [], []>, precision = #tpu.contract_precision<fp32>} : vector<8x72xf32>, vector<72x512xf32>, vector<8x512xf32> -> vector<8x512xf32>
    %c0_74 = arith.constant 0 : index
    %c0_75 = arith.constant 0 : index
    %141 = vector.load %arg15[%c0_74, %c0_75] : memref<8x1xf32, #tpu.memory_space<vmem>>, vector<8x1xf32>
    %142 = vector.broadcast %141 : vector<8x1xf32> to vector<8x512xf32>
    %143 = arith.addf %140, %142 : vector<8x512xf32>
    %cst_76 = arith.constant 0.000000e+00 : f32
    %144 = vector.broadcast %cst_76 : f32 to vector<8x512xf32>
    %145 = arith.maximumf %143, %144 : vector<8x512xf32>
    %c0_77 = arith.constant 0 : index
    %c0_78 = arith.constant 0 : index
    %146 = vector.load %arg16[%c0_77, %c0_78] : memref<8x8xf32, #tpu.memory_space<vmem>>, vector<8x8xf32>
    %cst_79 = arith.constant dense<0.000000e+00> : vector<8x512xf32>
    %147 = tpu.matmul %146, %145, %cst_79 {dimension_numbers = #tpu.dot_dimension_numbers<[1], [0], [0], [1], [0, 0, 1, 1], [], []>, precision = #tpu.contract_precision<fp32>} : vector<8x8xf32>, vector<8x512xf32>, vector<8x512xf32> -> vector<8x512xf32>
    %c0_80 = arith.constant 0 : index
    %c0_81 = arith.constant 0 : index
    %148 = vector.load %arg17[%c0_80, %c0_81] : memref<8x1xf32, #tpu.memory_space<vmem>>, vector<8x1xf32>
    %149 = vector.broadcast %148 : vector<8x1xf32> to vector<8x512xf32>
    %150 = arith.addf %147, %149 : vector<8x512xf32>
    %151 = arith.addf %104, %150 : vector<8x512xf32>
    %c0_82 = arith.constant 0 : index
    %c0_83 = arith.constant 0 : index
    %152 = vector.load %arg18[%c0_82, %c0_83] : memref<8x8xf32, #tpu.memory_space<vmem>>, vector<8x8xf32>
    %cst_84 = arith.constant dense<0.000000e+00> : vector<8x512xf32>
    %153 = tpu.matmul %152, %151, %cst_84 {dimension_numbers = #tpu.dot_dimension_numbers<[1], [0], [0], [1], [0, 0, 1, 1], [], []>, precision = #tpu.contract_precision<fp32>} : vector<8x8xf32>, vector<8x512xf32>, vector<8x512xf32> -> vector<8x512xf32>
    %c0_85 = arith.constant 0 : index
    %c0_86 = arith.constant 0 : index
    %154 = vector.load %arg19[%c0_85, %c0_86] : memref<8x1xf32, #tpu.memory_space<vmem>>, vector<8x1xf32>
    %155 = vector.broadcast %154 : vector<8x1xf32> to vector<8x512xf32>
    %156 = arith.addf %153, %155 : vector<8x512xf32>
    %cst_87 = arith.constant 0.000000e+00 : f32
    %157 = vector.broadcast %cst_87 : f32 to vector<8x512xf32>
    %158 = arith.maximumf %156, %157 : vector<8x512xf32>
    %159 = vector.extract_strided_slice %158 {offsets = [0, 0], sizes = [4, 512], strides = [1, 1]} : vector<8x512xf32> to vector<4x512xf32>
    %c0_88 = arith.constant 0 : index
    %c0_89 = arith.constant 0 : index
    %c0_90 = arith.constant 0 : index
    %160 = vector.load %arg20[%c0_88, %c0_89, %c0_90] : memref<1x4x512xf32, #tpu.memory_space<vmem>>, vector<1x4x512xf32>
    %161 = vector.shape_cast %160 : vector<1x4x512xf32> to vector<4x512xf32>
    %162 = vector.shape_cast %159 : vector<4x512xf32> to vector<1x4x512xf32>
    tpu.vector_store %arg20[%c0_88, %c0_89, %c0_90], %162 {strides = array<i32>} : memref<1x4x512xf32, #tpu.memory_space<vmem>>, vector<1x4x512xf32>,
    return
  }
  func.func @transform_0(%arg0: i32) -> (i32, i32, i32) {
    %c0_i32 = arith.constant 0 : i32
    %c0_i32_0 = arith.constant 0 : i32
    %c0_i32_1 = arith.constant 0 : i32
    return %arg0, %c0_i32, %c0_i32_0 : i32, i32, i32
  }
  func.func @transform_1(%arg0: i32) -> (i32, i32) {
    %c0_i32 = arith.constant 0 : i32
    %c0_i32_0 = arith.constant 0 : i32
    %c0_i32_1 = arith.constant 0 : i32
    return %c0_i32, %c0_i32_0 : i32, i32
  }
  func.func @transform_2(%arg0: i32) -> (i32, i32) {
    %c0_i32 = arith.constant 0 : i32
    %c0_i32_0 = arith.constant 0 : i32
    %c0_i32_1 = arith.constant 0 : i32
    return %c0_i32, %c0_i32_0 : i32, i32
  }
  func.func @transform_3(%arg0: i32) -> (i32, i32) {
    %c0_i32 = arith.constant 0 : i32
    %c0_i32_0 = arith.constant 0 : i32
    %c0_i32_1 = arith.constant 0 : i32
    return %c0_i32, %c0_i32_0 : i32, i32
  }
  func.func @transform_4(%arg0: i32) -> (i32, i32) {
    %c0_i32 = arith.constant 0 : i32
    %c0_i32_0 = arith.constant 0 : i32
    %c0_i32_1 = arith.constant 0 : i32
    return %c0_i32, %c0_i32_0 : i32, i32
  }
  func.func @transform_5(%arg0: i32) -> (i32, i32) {
    %c0_i32 = arith.constant 0 : i32
    %c0_i32_0 = arith.constant 0 : i32
    %c0_i32_1 = arith.constant 0 : i32
    return %c0_i32, %c0_i32_0 : i32, i32
  }
  func.func @transform_6(%arg0: i32) -> (i32, i32) {
    %c0_i32 = arith.constant 0 : i32
    %c0_i32_0 = arith.constant 0 : i32
    %c0_i32_1 = arith.constant 0 : i32
    return %c0_i32, %c0_i32_0 : i32, i32
  }
  func.func @transform_7(%arg0: i32) -> (i32, i32) {
    %c0_i32 = arith.constant 0 : i32
    %c0_i32_0 = arith.constant 0 : i32
    %c0_i32_1 = arith.constant 0 : i32
    return %c0_i32, %c0_i32_0 : i32, i32
  }
  func.func @transform_8(%arg0: i32) -> (i32, i32) {
    %c0_i32 = arith.constant 0 : i32
    %c0_i32_0 = arith.constant 0 : i32
    %c0_i32_1 = arith.constant 0 : i32
    return %c0_i32, %c0_i32_0 : i32, i32
  }
  func.func @transform_9(%arg0: i32) -> (i32, i32) {
    %c0_i32 = arith.constant 0 : i32
    %c0_i32_0 = arith.constant 0 : i32
    %c0_i32_1 = arith.constant 0 : i32
    return %c0_i32, %c0_i32_0 : i32, i32
  }
  func.func @transform_10(%arg0: i32) -> (i32, i32) {
    %c0_i32 = arith.constant 0 : i32
    %c0_i32_0 = arith.constant 0 : i32
    %c0_i32_1 = arith.constant 0 : i32
    return %c0_i32, %c0_i32_0 : i32, i32
  }
  func.func @transform_11(%arg0: i32) -> (i32, i32) {
    %c0_i32 = arith.constant 0 : i32
    %c0_i32_0 = arith.constant 0 : i32
    %c0_i32_1 = arith.constant 0 : i32
    return %c0_i32, %c0_i32_0 : i32, i32
  }
  func.func @transform_12(%arg0: i32) -> (i32, i32) {
    %c0_i32 = arith.constant 0 : i32
    %c0_i32_0 = arith.constant 0 : i32
    %c0_i32_1 = arith.constant 0 : i32
    return %c0_i32, %c0_i32_0 : i32, i32
  }
  func.func @transform_13(%arg0: i32) -> (i32, i32) {
    %c0_i32 = arith.constant 0 : i32
    %c0_i32_0 = arith.constant 0 : i32
    %c0_i32_1 = arith.constant 0 : i32
    return %c0_i32, %c0_i32_0 : i32, i32
  }
  func.func @transform_14(%arg0: i32) -> (i32, i32) {
    %c0_i32 = arith.constant 0 : i32
    %c0_i32_0 = arith.constant 0 : i32
    %c0_i32_1 = arith.constant 0 : i32
    return %c0_i32, %c0_i32_0 : i32, i32
  }
  func.func @transform_15(%arg0: i32) -> (i32, i32) {
    %c0_i32 = arith.constant 0 : i32
    %c0_i32_0 = arith.constant 0 : i32
    %c0_i32_1 = arith.constant 0 : i32
    return %c0_i32, %c0_i32_0 : i32, i32
  }
  func.func @transform_16(%arg0: i32) -> (i32, i32) {
    %c0_i32 = arith.constant 0 : i32
    %c0_i32_0 = arith.constant 0 : i32
    %c0_i32_1 = arith.constant 0 : i32
    return %c0_i32, %c0_i32_0 : i32, i32
  }
  func.func @transform_17(%arg0: i32) -> (i32, i32) {
    %c0_i32 = arith.constant 0 : i32
    %c0_i32_0 = arith.constant 0 : i32
    %c0_i32_1 = arith.constant 0 : i32
    return %c0_i32, %c0_i32_0 : i32, i32
  }
  func.func @transform_18(%arg0: i32) -> (i32, i32) {
    %c0_i32 = arith.constant 0 : i32
    %c0_i32_0 = arith.constant 0 : i32
    %c0_i32_1 = arith.constant 0 : i32
    return %c0_i32, %c0_i32_0 : i32, i32
  }
  func.func @transform_19(%arg0: i32) -> (i32, i32, i32) {
    %c0_i32 = arith.constant 0 : i32
    %c0_i32_0 = arith.constant 0 : i32
    %c0_i32_1 = arith.constant 0 : i32
    return %arg0, %c0_i32, %c0_i32_0 : i32, i32, i32
  }
}

</mosaic_0001>

<bundles_post_ra>
// kernel: dc_branchl_forward.1
= control target key start
LH: loop header
LB: loop body
LE: loop exit
PB: predicated region body
PF: predicated region fallthrough
CT: control target
= control target key end

     0   :  { %v68_v0 = vlaneseq  ;;  %s11220_s21 = smov 112   ;;  %s11222_s25 = smov 127   ;;  %vm133_vm0 = vcmask 916480   ;;  %vm174_vm1 = vcmask 924672   ;;  %vm215_vm2 = vcmask 1039360   ;;  %s14648_s1 = inlined_call_operand.vmem [shape: f32[8,512], index: 1, kind: input, shape index: {}]   ;;  %s14649_s0 = inlined_call_operand.vmem [shape: f32[1,8,512], index: 0, kind: input, shape index: {}]   ;;  %s14650_s3 = inlined_call_operand.vmem [shape: f32[8,64], index: 3, kind: input, shape index: {}]   ;;  %s14651_s4 = inlined_call_operand.vmem [shape: f32[8,1], index: 4, kind: input, shape index: {}]   ;;  %s14652_s8 = inlined_call_operand.vmem [shape: f32[8,1], index: 8, kind: input, shape index: {}]   ;;  %s14653_s6 = inlined_call_operand.vmem [shape: f32[8,1], index: 6, kind: input, shape index: {}]   ;;  %s14654_s5 = inlined_call_operand.vmem [shape: f32[8,8], index: 5, kind: input, shape index: {}]   ;;  %s14655_s2 = inlined_call_operand.vmem [shape: f32[9,512], index: 2, kind: input, shape index: {}]   ;;  %s14656_s7 = inlined_call_operand.vmem [shape: f32[8,8], index: 7, kind: input, shape index: {}]   ;;  %s14657_s12 = inlined_call_operand.vmem [shape: f32[8,1], index: 12, kind: input, shape index: {}]   ;;  %s14658_s10 = inlined_call_operand.vmem [shape: f32[8,1], index: 10, kind: input, shape index: {}]   ;;  %s14659_s9 = inlined_call_operand.vmem [shape: f32[8,72], index: 9, kind: input, shape index: {}]   ;;  %s14660_s11 = inlined_call_operand.vmem [shape: f32[8,8], index: 11, kind: input, shape index: {}]   ;;  %s14661_s16 = inlined_call_operand.vmem [shape: f32[8,1], index: 16, kind: input, shape index: {}]   ;;  %s14662_s14 = inlined_call_operand.vmem [shape: f32[8,1], index: 14, kind: input, shape index: {}]   ;;  %s14663_s18 = inlined_call_operand.vmem [shape: f32[8,1], index: 18, kind: input, shape index: {}]   ;;  %s14664_s13 = inlined_call_operand.vmem [shape: f32[8,72], index: 13, kind: input, shape index: {}]   ;;  %s14665_s15 = inlined_call_operand.vmem [shape: f32[8,8], index: 15, kind: input, shape index: {}]   ;;  %s14666_s17 = inlined_call_operand.vmem [shape: f32[8,8], index: 17, kind: input, shape index: {}]   ;;  %s14667_s19 = inlined_call_operand.vmem [shape: f32[1,4,512], index: 19, kind: output, shape index: {}]  }
   0x1   :  { %14941 = sst [smem:[#allocation76_spill]] %s14648_s1  ;;  %s11223_s27 = smov 1   ;;  %vm256_vm3 = vcmask 7168   ;;  %vm297_vm4 = vcmask 121856   ;;  %vm338_vm5 = vcmask 130048   ;;  %vm379_vm6 = vcmask 138240  }
   0x2   :  { %14942 = sst [smem:[#allocation77_spill]] %s14649_s0  ;;  %v69_v1 = vshrl.u32 %v68_v0, 7  ;;  %s14945_s20 = sld [smem:[#allocation76_spill]]  ;;  %vm92_vm7 = vcmask 908288   ;;  %vm427_vm8 = vcmask 1031168   ;;  %vm466_vm9 = vcmask 900096  }
   0x3   :  { %14943 = sst [smem:[#allocation78_spill]] %s14650_s3  ;;  %s11221_s3 = smov 113   ;;  %vm486_vm10 = vcmask 785408   ;;  %vm506_vm11 = vcmask 777216   ;;  %vm526_vm12 = vcmask 769024   ;;  %vm687_vm13 = vcmask 523264  }
   0x4   :  { %14944 = sst [smem:[#allocation79_spill]] %s14651_s4  ;;  %v11348_v3 = vsub.s32 2, %v69_v1  ;;  %v11350_v4 = vsub.s32 0, %v69_v1  ;;  %v11352_v5 = vsub.s32 3, %v69_v1  ;;  %v11354_v6 = vsub.s32 1, %v69_v1  ;;  %s11224_s1 = smov 15  }
   0x5   :  { %s11225_s22 = smov 16   ;;  %s11226_s24 = smov 17   ;;  %vm1996_vm14 = vcmask 64512   ;;  %vm3984_vm15 = vcmask 801792  }
   0x6   :  { %14946 = vst [vmem:[#allocation2_spill] sm:$0xff] %v11348_v3  ;;  %14947 = vst [vmem:[#allocation3_spill] sm:$0xff] %v11350_v4  ;;  %s14950_s29 = sld [smem:[#allocation77_spill]]  ;;  %s11231_s23 = smov 95  }
   0x7   :  { %14948 = vst [vmem:[#allocation4_spill] sm:$0xff] %v11352_v5  ;;  %14949 = vst [vmem:[#allocation5_spill] sm:$0xff] %v11354_v6  ;;  %s14962_s0 = sld [smem:[#allocation79_spill]]  ;;  %s11237_s4 = smov 30  }
   0x8   :  { %v10411_v2 = vld [vmem:[%s14945_s20 + $0x1] ss:$8 sm:$0xf]  ;;  %v10412_v11 = vld [vmem:[%s14945_s20 + $0x2] ss:$8 sm:$0xf] }
   0x9   :  { %v120_v7 = vrot.slane %v10411_v2, %v11348_v3  ;;  %v112_v8 = vrot.slane %v10411_v2, %v11350_v4  ;;  %v124_v9 = vrot.slane %v10411_v2, %v11352_v5  ;;  %v116_v10 = vrot.slane %v10411_v2, %v11354_v6  ;;  %v10413_v16 = vld [vmem:[%s14945_s20 + $0x3] ss:$8 sm:$0xf]  ;;  %v10414_v21 = vld [vmem:[%s14945_s20 + $0x4] ss:$8 sm:$0xf] }
   0xa   :  { %v157_v12 = vrot.slane %v10412_v11, %v11354_v6  ;;  %v153_v13 = vrot.slane %v10412_v11, %v11350_v4  ;;  %v165_v14 = vrot.slane %v10412_v11, %v11352_v5  ;;  %v161_v15 = vrot.slane %v10412_v11, %v11348_v3  ;;  %v10415_v26 = vld [vmem:[%s14945_s20 + $0x5] ss:$8 sm:$0xf]  ;;  %v10416_v31 = vld [vmem:[%s14945_s20 + $0x6] ss:$8 sm:$0xf] }
   0xb   :  { %129 = vrot.lane.b32.xlu1 %v120_v7, %s11220_s21  ;;  %125 = vrot.lane.b32.xlu0 %v112_v8, %s11220_s21  ;;  %v198_v17 = vrot.slane %v10413_v16, %v11354_v6  ;;  %v194_v18 = vrot.slane %v10413_v16, %v11350_v4  ;;  %v206_v19 = vrot.slane %v10413_v16, %v11352_v5  ;;  %v10417_v36 = vld [vmem:[%s14945_s20 + $0x7] ss:$8 sm:$0xf]  ;;  %v66_v41 = vld [vmem:[%s14945_s20] ss:$8 sm:$0xf] }
   0xc   :  { %v202_v20 = vrot.slane %v10413_v16, %v11348_v3  ;;  %v239_v22 = vrot.slane %v10414_v21, %v11354_v6  ;;  %v235_v23 = vrot.slane %v10414_v21, %v11350_v4  ;;  %v247_v24 = vrot.slane %v10414_v21, %v11352_v5  ;;  %v11426_v49 = vld [vmem:[%s14950_s29 + $0x18] sm:$0xff]  ;;  %v11455_v2 = vld [vmem:[%s14950_s29] sm:$0xff] }
   0xd   :  { %v243_v25 = vrot.slane %v10414_v21, %v11348_v3  ;;  %v280_v27 = vrot.slane %v10415_v26, %v11354_v6  ;;  %v276_v28 = vrot.slane %v10415_v26, %v11350_v4  ;;  %v288_v29 = vrot.slane %v10415_v26, %v11352_v5 }
   0xe   :  { %v284_v30 = vrot.slane %v10415_v26, %v11348_v3  ;;  %v321_v32 = vrot.slane %v10416_v31, %v11354_v6  ;;  %v317_v33 = vrot.slane %v10416_v31, %v11350_v4  ;;  %v329_v34 = vrot.slane %v10416_v31, %v11352_v5 }
   0xf   :  { %131 = vrot.lane.b32.xlu1 %v124_v9, %s11220_s21  ;;  %127 = vrot.lane.b32.xlu0 %v116_v10, %s11220_s21  ;;  %v325_v35 = vrot.slane %v10416_v31, %v11348_v3  ;;  %v362_v37 = vrot.slane %v10417_v36, %v11354_v6  ;;  %v358_v38 = vrot.slane %v10417_v36, %v11350_v4 }
  0x10   :  { %v366_v39 = vrot.slane %v10417_v36, %v11348_v3  ;;  %v370_v40 = vrot.slane %v10417_v36, %v11352_v5  ;;  %v71_v42 = vrot.slane %v66_v41, %v11350_v4  ;;  %v75_v43 = vrot.slane %v66_v41, %v11354_v6 }
  0x11   :  { %v79_v44 = vrot.slane %v66_v41, %v11348_v3  ;;  %v83_v45 = vrot.slane %v66_v41, %v11352_v5 }
  0x13   :  { %168 = vrot.lane.b32.xlu1 %v157_v12, %s11221_s3  ;;  %166 = vrot.lane.b32.xlu0 %v153_v13, %s11221_s3 }
  0x17   :  { %172 = vrot.lane.b32.xlu1 %v165_v14, %s11221_s3  ;;  %170 = vrot.lane.b32.xlu0 %v161_v15, %s11221_s3  ;;  %s11230_s3 = smov 96  }
  0x1b   :  { %209 = vrot.lane.b32.xlu1 %v198_v17, %s11222_s25  ;;  %207 = vrot.lane.b32.xlu0 %v194_v18, %s11222_s25 }
  0x1f   :  { %213 = vrot.lane.b32.xlu1 %v206_v19, %s11222_s25  ;;  %211 = vrot.lane.b32.xlu0 %v202_v20, %s11222_s25 }
  0x23   :  { %250 = vrot.lane.b32.xlu1 %v239_v22, %s11223_s27  ;;  %248 = vrot.lane.b32.xlu0 %v235_v23, %s11223_s27 }
  0x27   :  { %254 = vrot.lane.b32.xlu1 %v247_v24, %s11223_s27  ;;  %252 = vrot.lane.b32.xlu0 %v243_v25, %s11223_s27  ;;  %s11227_s27 = smov 111   ;;  %v11492_v25 = vld [vmem:[%s14950_s29 + $0x8] sm:$0xff] }
  0x2b   :  { %291 = vrot.lane.b32.xlu1 %v280_v27, %s11224_s1  ;;  %289 = vrot.lane.b32.xlu0 %v276_v28, %s11224_s1 }
  0x2f   :  { %295 = vrot.lane.b32.xlu1 %v288_v29, %s11224_s1  ;;  %293 = vrot.lane.b32.xlu0 %v284_v30, %s11224_s1  ;;  %s11228_s1 = smov 126  }
  0x33   :  { %332 = vrot.lane.b32.xlu1 %v321_v32, %s11225_s22  ;;  %330 = vrot.lane.b32.xlu0 %v317_v33, %s11225_s22 }
  0x37   :  { %336 = vrot.lane.b32.xlu1 %v329_v34, %s11225_s22  ;;  %334 = vrot.lane.b32.xlu0 %v325_v35, %s11225_s22  ;;  %s11229_s22 = smov 110   ;;  %v11514_v35 = vld [vmem:[%s14950_s29 + $0x10] sm:$0xff] }
  0x3b   :  { %373 = vrot.lane.b32.xlu1 %v362_v37, %s11226_s24  ;;  %371 = vrot.lane.b32.xlu0 %v358_v38, %s11226_s24 }
  0x3f   :  { %375 = vrot.lane.b32.xlu0 %v366_v39, %s11226_s24  ;;  %377 = vrot.lane.b32.xlu1 %v370_v40, %s11226_s24 }
  0x43   :  { %84 = vrot.lane.b32.xlu0 %v71_v42, %s11227_s27  ;;  %86 = vrot.lane.b32.xlu1 %v75_v43, %s11227_s27 }
  0x47   :  { %88 = vrot.lane.b32.xlu0 %v79_v44, %s11227_s27  ;;  %90 = vrot.lane.b32.xlu1 %v83_v45, %s11227_s27  ;;  %s11232_s27 = smov 94  }
  0x7d   :  { %v11421_v46 = vpop.permute.xlu1 %129  ;;  %v126_v47 = vpop.permute.xlu0 %125 }
  0x7e   :  { %v142_v48 = vmul.f32 0.0, %v126_v47 }
  0x80   :  { %398 = vrot.lane.b32.xlu0 %v142_v48, %s11222_s25 }
  0x81   :  { %v11429_v50 = vpop.permute.xlu1 %131  ;;  %v128_v51 = vpop.permute.xlu0 %127 }
  0x82   :  { %v146_v52 = vmul.f32 %v11429_v50, %v11426_v49  ;;  %v135_v24 = vsel %vm133_vm0, %v128_v51, %v11421_v46  ;;  %v134_v29 = vsel %vm133_vm0, %v126_v47, %v128_v51  ;;  %v136_v33 = vsel %vm133_vm0, %v11421_v46, %v11429_v50 }
  0x83   :  { %v144_v28 = vmul.f32 %v135_v24, %v11492_v25  ;;  %v143_v32 = vmul.f32 %v134_v29, %v11455_v2  ;;  %v145_v37 = vmul.f32 %v136_v33, %v11514_v35 }
  0x84   :  { %406 = vrot.lane.b32.xlu1 %v146_v52, %s11222_s25 }
  0x85   :  { %v11434_v53 = vpop.permute.xlu1 %168  ;;  %v167_v54 = vpop.permute.xlu0 %166 }
  0x86   :  { %v183_v55 = vmul.f32 0.0, %v167_v54  ;;  %v175_v30 = vsel %vm174_vm1, %v167_v54, %v11434_v53 }
  0x87   :  { %v184_v31 = vmul.f32 %v175_v30, %v11455_v2 }
  0x88   :  { %417 = vrot.lane.b32.xlu1 %v183_v55, %s11228_s1 }
  0x89   :  { %v173_v56 = vpop.permute.xlu1 %172  ;;  %v171_v57 = vpop.permute.xlu0 %170 }
  0x8a   :  { %v187_v58 = vmul.f32 %v173_v56, %v11426_v49  ;;  %v177_v34 = vsel %vm174_vm1, %v171_v57, %v173_v56  ;;  %v176_v38 = vsel %vm174_vm1, %v11434_v53, %v171_v57  ;;  %vm4065_vm1 = vcmask 15360  }
  0x8b   :  { %v186_v36 = vmul.f32 %v177_v34, %v11514_v35  ;;  %v185_v41 = vmul.f32 %v176_v38, %v11492_v25 }
  0x8c   :  { %425 = vrot.lane.b32.xlu0 %v187_v58, %s11228_s1 }
  0x8d   :  { %v11439_v59 = vpop.permute.xlu1 %209  ;;  %v208_v60 = vpop.permute.xlu0 %207 }
  0x8e   :  { %v224_v7 = vmul.f32 0.0, %v208_v60  ;;  %v216_v39 = vsel %vm215_vm2, %v208_v60, %v11439_v59 }
  0x8f   :  { %v225_v40 = vmul.f32 %v216_v39, %v11455_v2 }
  0x91   :  { %v11441_v61 = vpop.permute.xlu1 %213  ;;  %v11443_v62 = vpop.permute.xlu0 %211 }
  0x92   :  { %v228_v63 = vmul.f32 %v11441_v61, %v11426_v49  ;;  %v217_v42 = vsel %vm215_vm2, %v11439_v59, %v11443_v62  ;;  %v218_v43 = vsel %vm215_vm2, %v11443_v62, %v11441_v61 }
  0x93   :  { %v227_v44 = vmul.f32 %v218_v43, %v11514_v35  ;;  %v226_v45 = vmul.f32 %v217_v42, %v11492_v25 }
  0x94   :  { %445 = vrot.lane.b32.xlu0 %v228_v63, %s11220_s21 }
  0x95   :  { %v11448_v0 = vpop.permute.xlu1 %250  ;;  %v11450_v1 = vpop.permute.xlu0 %248 }
  0x96   :  { %v265_v8 = vmul.f32 %v11450_v1, %v11455_v2  ;;  %v257_v46 = vsel %vm256_vm3, %v11450_v1, %v11448_v0 }
  0x97   :  { %v266_v50 = vmul.f32 %v257_v46, %v11492_v25 }
  0x98   :  { %437 = vrot.lane.b32.xlu0 %v224_v7, %s11220_s21  ;;  %456 = vrot.lane.b32.xlu1 %v265_v8, %s11229_s22 }
  0x99   :  { %v11461_v9 = vpop.permute.xlu1 %254  ;;  %v11463_v10 = vpop.permute.xlu0 %252 }
  0x9a   :  { %v269_v11 = vmul.f32 0.0, %v11461_v9  ;;  %v258_v47 = vsel %vm256_vm3, %v11448_v0, %v11463_v10  ;;  %v259_v51 = vsel %vm256_vm3, %v11463_v10, %v11461_v9  ;;  %vm4147_vm3 = vcmask 261120  }
  0x9b   :  { %v267_v48 = vmul.f32 %v258_v47, %v11514_v35  ;;  %v268_v54 = vmul.f32 %v259_v51, %v11426_v49 }
  0x9c   :  { %464 = vrot.lane.b32.xlu1 %v269_v11, %s11229_s22 }
  0x9d   :  { %v11467_v12 = vpop.permute.xlu1 %291  ;;  %v290_v13 = vpop.permute.xlu0 %289 }
  0x9e   :  { %v306_v14 = vmul.f32 %v290_v13, %v11455_v2  ;;  %v298_v52 = vsel %vm297_vm4, %v290_v13, %v11467_v12 }
  0x9f   :  { %v307_v53 = vmul.f32 %v298_v52, %v11492_v25 }
  0xa0   :  { %476 = vrot.lane.b32.xlu0 %v306_v14, %s11230_s3 }
  0xa1   :  { %v11471_v15 = vpop.permute.xlu1 %295  ;;  %v294_v16 = vpop.permute.xlu0 %293 }
  0xa2   :  { %v310_v17 = vmul.f32 0.0, %v11471_v15  ;;  %v299_v55 = vsel %vm297_vm4, %v11467_v12, %v294_v16  ;;  %v300_v56 = vsel %vm297_vm4, %v294_v16, %v11471_v15  ;;  %vm4236_vm4 = vcmask 1014784  }
  0xa3   :  { %v309_v58 = vmul.f32 %v300_v56, %v11426_v49  ;;  %v308_v59 = vmul.f32 %v299_v55, %v11514_v35 }
  0xa4   :  { %484 = vrot.lane.b32.xlu0 %v310_v17, %s11230_s3 }
  0xa5   :  { %v11475_v18 = vpop.permute.xlu1 %332  ;;  %v11477_v19 = vpop.permute.xlu0 %330 }
  0xa6   :  { %v347_v20 = vmul.f32 %v11477_v19, %v11455_v2  ;;  %v339_v60 = vsel %vm338_vm5, %v11477_v19, %v11475_v18 }
  0xa7   :  { %v348_v0 = vmul.f32 %v339_v60, %v11492_v25 }
  0xa8   :  { %496 = vrot.lane.b32.xlu1 %v347_v20, %s11231_s23 }
  0xa9   :  { %v11482_v21 = vpop.permute.xlu1 %336  ;;  %v11484_v22 = vpop.permute.xlu0 %334 }
  0xaa   :  { %v351_v23 = vmul.f32 0.0, %v11482_v21  ;;  %v340_v61 = vsel %vm338_vm5, %v11475_v18, %v11484_v22  ;;  %v341_v7 = vsel %vm338_vm5, %v11484_v22, %v11482_v21  ;;  %vm4290_vm5 = vcmask 752640  }
  0xab   :  { %v349_v63 = vmul.f32 %v340_v61, %v11514_v35  ;;  %v350_v13 = vmul.f32 %v341_v7, %v11426_v49 }
  0xac   :  { %504 = vrot.lane.b32.xlu1 %v351_v23, %s11231_s23 }
  0xad   :  { %v11495_v26 = vpop.permute.xlu0 %371  ;;  %v374_v57 = vpop.permute.xlu1 %373 }
  0xae   :  { %v388_v27 = vmul.f32 %v11495_v26, %v11455_v2  ;;  %v380_v8 = vsel %vm379_vm6, %v11495_v26, %v374_v57 }
  0xaf   :  { %v389_v12 = vmul.f32 %v380_v8, %v11492_v25 }
  0xb0   :  { %516 = vrot.lane.b32.xlu0 %v388_v27, %s11232_s27  ;;  %402 = vrot.lane.b32.xlu1 %v144_v28, %s11222_s25 }
  0xb1   :  { %v376_v62 = vpop.permute.xlu0 %375  ;;  %v378_v1 = vpop.permute.xlu1 %377 }
  0xb2   :  { %v381_v10 = vsel %vm379_vm6, %v374_v57, %v376_v62  ;;  %v382_v11 = vsel %vm379_vm6, %v376_v62, %v378_v1  ;;  %v392_v19 = vmul.f32 0.0, %v378_v1 }
  0xb3   :  { %v390_v15 = vmul.f32 %v381_v10, %v11514_v35  ;;  %v391_v16 = vmul.f32 %v382_v11, %v11426_v49 }
  0xb4   :  { %419 = vrot.lane.b32.xlu1 %v184_v31, %s11228_s1  ;;  %400 = vrot.lane.b32.xlu0 %v143_v32, %s11222_s25 }
  0xb5   :  { %v85_v9 = vpop.permute.xlu0 %84  ;;  %v87_v14 = vpop.permute.xlu1 %86 }
  0xb6   :  { %v93_v17 = vsel %vm92_vm7, %v85_v9, %v87_v14  ;;  %v101_v27 = vmul.f32 0.0, %v85_v9 }
  0xb7   :  { %v102_v21 = vmul.f32 %v93_v17, %v11455_v2 }
  0xb8   :  { %423 = vrot.lane.b32.xlu1 %v186_v36, %s11228_s1  ;;  %404 = vrot.lane.b32.xlu0 %v145_v37, %s11222_s25  ;;  %s11235_s25 = smov 98  }
  0xb9   :  { %v89_v18 = vpop.permute.xlu0 %88  ;;  %v91_v20 = vpop.permute.xlu1 %90 }
  0xba   :  { %v94_v22 = vsel %vm92_vm7, %v87_v14, %v89_v18  ;;  %v95_v23 = vsel %vm92_vm7, %v89_v18, %v91_v20  ;;  %v105_v28 = vmul.f32 %v91_v20, %v11426_v49  ;;  %vm4349_vm7 = vcmask 490496  }
  0xbb   :  { %v103_v24 = vmul.f32 %v94_v22, %v11492_v25  ;;  %v104_v26 = vmul.f32 %v95_v23, %v11514_v35 }
  0xbc   :  { %439 = vrot.lane.b32.xlu1 %v225_v40, %s11220_s21  ;;  %421 = vrot.lane.b32.xlu0 %v185_v41, %s11228_s1 }
  0xc0   :  { %443 = vrot.lane.b32.xlu1 %v227_v44, %s11220_s21  ;;  %441 = vrot.lane.b32.xlu0 %v226_v45, %s11220_s21  ;;  %s11239_s21 = smov 34  }
  0xc4   :  { %460 = vrot.lane.b32.xlu1 %v267_v48, %s11229_s22  ;;  %458 = vrot.lane.b32.xlu0 %v266_v50, %s11229_s22 }
  0xc8   :  { %478 = vrot.lane.b32.xlu1 %v307_v53, %s11230_s3  ;;  %462 = vrot.lane.b32.xlu0 %v268_v54, %s11229_s22  ;;  %s11236_s22 = smov 2  }
  0xcc   :  { %482 = vrot.lane.b32.xlu1 %v309_v58, %s11230_s3  ;;  %480 = vrot.lane.b32.xlu0 %v308_v59, %s11230_s3 }
  0xd0   :  { %500 = vrot.lane.b32.xlu1 %v349_v63, %s11231_s23  ;;  %498 = vrot.lane.b32.xlu0 %v348_v0, %s11231_s23 }
  0xd4   :  { %518 = vrot.lane.b32.xlu1 %v389_v12, %s11232_s27  ;;  %502 = vrot.lane.b32.xlu0 %v350_v13, %s11231_s23  ;;  %s11244_s23 = smov 60  }
  0xd8   :  { %520 = vrot.lane.b32.xlu0 %v390_v15, %s11232_s27  ;;  %522 = vrot.lane.b32.xlu1 %v391_v16, %s11232_s27 }
  0xdc   :  { %524 = vrot.lane.b32.xlu0 %v392_v19, %s11232_s27  ;;  %545 = vrot.lane.b32.xlu1 %v102_v21, %s11226_s24 }
  0xe0   :  { %547 = vrot.lane.b32.xlu0 %v103_v24, %s11226_s24  ;;  %549 = vrot.lane.b32.xlu1 %v104_v26, %s11226_s24 }
  0xe4   :  { %551 = vrot.lane.b32.xlu0 %v105_v28, %s11226_s24  ;;  %543 = vrot.lane.b32.xlu1 %v101_v27, %s11226_s24 }
  0xf2   :  { %v399_v29 = vpop.permute.xlu0 %398 }
  0xf6   :  { %v407_v2 = vpop.permute.xlu1 %406 }
  0xf7   :  { %561 = vrot.lane.b32.xlu0 %v407_v2, %s11226_s24 }
  0xfa   :  { %v418_v30 = vpop.permute.xlu1 %417 }
  0xfe   :  { %v426_v25 = vpop.permute.xlu0 %425 }
  0xff   :  { %571 = vrot.lane.b32.xlu0 %v426_v25, %s11226_s24 }
 0x106   :  { %v446_v31 = vpop.permute.xlu0 %445 }
 0x107   :  { %581 = vrot.lane.b32.xlu0 %v446_v31, %s11226_s24 }
 0x10a   :  { %v457_v49 = vpop.permute.xlu1 %456  ;;  %v438_v32 = vpop.permute.xlu0 %437 }
 0x10b   :  { %583 = vrot.lane.b32.xlu1 %v457_v49, %s11226_s24 }
 0x10e   :  { %v465_v34 = vpop.permute.xlu1 %464 }
 0x112   :  { %v477_v33 = vpop.permute.xlu0 %476 }
 0x113   :  { %593 = vrot.lane.b32.xlu0 %v477_v33, %s11226_s24 }
 0x116   :  { %v485_v36 = vpop.permute.xlu0 %484 }
 0x11a   :  { %v11598_v35 = vpop.permute.xlu1 %496 }
 0x11e   :  { %v11600_v37 = vpop.permute.xlu1 %504 }
 0x122   :  { %v11602_v38 = vpop.permute.xlu0 %516  ;;  %v403_v39 = vpop.permute.xlu1 %402 }
 0x126   :  { %v420_v40 = vpop.permute.xlu1 %419  ;;  %v401_v41 = vpop.permute.xlu0 %400 }
 0x127   :  { %v409_v42 = vsel %vm215_vm2, %v401_v41, %v403_v39  ;;  %v408_v50 = vsel %vm215_vm2, %v399_v29, %v401_v41  ;;  %v428_v0 = vsel %vm427_vm8, %v418_v30, %v420_v40 }
 0x128   :  { %555 = vrot.lane.b32.xlu1 %v409_v42, %s11226_s24 }
 0x12a   :  { %v424_v43 = vpop.permute.xlu1 %423  ;;  %v405_v44 = vpop.permute.xlu0 %404 }
 0x12b   :  { %v410_v45 = vsel %vm215_vm2, %v403_v39, %v405_v44  ;;  %v411_v46 = vsel %vm215_vm2, %v405_v44, %v407_v2  ;;  %v431_v54 = vsel %vm427_vm8, %v424_v43, %v426_v25  ;;  %v14676_v25 = vmov 0.0  }
 0x12c   :  { %557 = vrot.lane.b32.xlu0 %v410_v45, %s11226_s24  ;;  %559 = vrot.lane.b32.xlu1 %v411_v46, %s11226_s24  ;;  %vm4188_vm2 = vcmask 277504  }
 0x12d   :  { %1418 = vmatprep.mubr.f32.mxu1 %v14676_v25  ;;  %771 = vmatprep.mubr.f32.mxu0 %v14676_v25 }
 0x12e   :  { %v440_v47 = vpop.permute.xlu1 %439  ;;  %v422_v48 = vpop.permute.xlu0 %421 }
 0x12f   :  { %v429_v51 = vsel %vm427_vm8, %v420_v40, %v422_v48  ;;  %v430_v53 = vsel %vm427_vm8, %v422_v48, %v424_v43  ;;  %v447_v61 = vsel %vm133_vm0, %v438_v32, %v440_v47 }
 0x130   :  { %553 = vrot.lane.b32.xlu0 %v408_v50, %s11226_s24  ;;  %565 = vrot.lane.b32.xlu1 %v429_v51, %s11226_s24 }
 0x132   :  { %v442_v52 = vpop.permute.xlu0 %441  ;;  %v444_v55 = vpop.permute.xlu1 %443 }
 0x133   :  { %v449_v57 = vsel %vm133_vm0, %v442_v52, %v444_v55  ;;  %v448_v58 = vsel %vm133_vm0, %v440_v47, %v442_v52  ;;  %v450_v62 = vsel %vm133_vm0, %v444_v55, %v446_v31  ;;  %vm4106_vm0 = vcmask 244736  }
 0x134   :  { %567 = vrot.lane.b32.xlu0 %v430_v53, %s11226_s24  ;;  %569 = vrot.lane.b32.xlu1 %v431_v54, %s11226_s24 }
 0x136   :  { %v459_v56 = vpop.permute.xlu0 %458  ;;  %v461_v59 = vpop.permute.xlu1 %460 }
 0x137   :  { %v468_v63 = vsel %vm466_vm9, %v459_v56, %v461_v59  ;;  %v467_v9 = vsel %vm466_vm9, %v457_v49, %v459_v56 }
 0x138   :  { %577 = vrot.lane.b32.xlu0 %v449_v57, %s11226_s24  ;;  %575 = vrot.lane.b32.xlu1 %v448_v58, %s11226_s24 }
 0x13a   :  { %v463_v60 = vpop.permute.xlu0 %462  ;;  %v479_v1 = vpop.permute.xlu1 %478 }
 0x13b   :  { %v470_v8 = vsel %vm466_vm9, %v463_v60, %v465_v34  ;;  %v469_v13 = vsel %vm466_vm9, %v461_v59, %v463_v60  ;;  %v487_v15 = vsel %vm486_vm10, %v477_v33, %v479_v1  ;;  %vm4528_vm9 = vcmask 588800  }
 0x13c   :  { %573 = vrot.lane.b32.xlu0 %v447_v61, %s11226_s24  ;;  %579 = vrot.lane.b32.xlu1 %v450_v62, %s11226_s24 }
 0x13e   :  { %v481_v7 = vpop.permute.xlu0 %480  ;;  %v483_v10 = vpop.permute.xlu1 %482 }
 0x13f   :  { %v488_v12 = vsel %vm486_vm10, %v479_v1, %v481_v7  ;;  %v490_v14 = vsel %vm486_vm10, %v483_v10, %v485_v36  ;;  %v489_v19 = vsel %vm486_vm10, %v481_v7, %v483_v10 }
 0x140   :  { %587 = vrot.lane.b32.xlu0 %v468_v63, %s11226_s24  ;;  %563 = vrot.lane.b32.xlu1 %v428_v0, %s11226_s24 }
 0x142   :  { %v499_v11 = vpop.permute.xlu0 %498  ;;  %v501_v16 = vpop.permute.xlu1 %500 }
 0x143   :  { %v508_v18 = vsel %vm506_vm11, %v499_v11, %v501_v16  ;;  %v507_v23 = vsel %vm506_vm11, %v11598_v35, %v499_v11 }
 0x144   :  { %591 = vrot.lane.b32.xlu0 %v470_v8, %s11226_s24  ;;  %585 = vrot.lane.b32.xlu1 %v467_v9, %s11226_s24 }
 0x146   :  { %v503_v17 = vpop.permute.xlu0 %502  ;;  %v519_v20 = vpop.permute.xlu1 %518 }
 0x147   :  { %v510_v22 = vsel %vm506_vm11, %v503_v17, %v11600_v37  ;;  %v509_v28 = vsel %vm506_vm11, %v501_v16, %v503_v17  ;;  %v527_v29 = vsel %vm526_vm12, %v11602_v38, %v519_v20 }
 0x148   :  { %597 = vrot.lane.b32.xlu0 %v488_v12, %s11226_s24  ;;  %589 = vrot.lane.b32.xlu1 %v469_v13, %s11226_s24 }
 0x14a   :  { %v521_v21 = vpop.permute.xlu0 %520  ;;  %v523_v24 = vpop.permute.xlu1 %522 }
 0x14b   :  { %v528_v27 = vsel %vm526_vm12, %v519_v20, %v521_v21  ;;  %v529_v30 = vsel %vm526_vm12, %v521_v21, %v523_v24 }
 0x14c   :  { %601 = vrot.lane.b32.xlu0 %v490_v14, %s11226_s24  ;;  %595 = vrot.lane.b32.xlu1 %v487_v15, %s11226_s24 }
 0x14e   :  { %v525_v26 = vpop.permute.xlu0 %524  ;;  %v546_v49 = vpop.permute.xlu1 %545 }
 0x14f   :  { %v530_v2 = vsel %vm526_vm12, %v523_v24, %v525_v26 }
 0x150   :  { %607 = vrot.lane.b32.xlu0 %v508_v18, %s11226_s24  ;;  %599 = vrot.lane.b32.xlu1 %v489_v19, %s11226_s24 }
 0x152   :  { %v548_v31 = vpop.permute.xlu0 %547  ;;  %v550_v33 = vpop.permute.xlu1 %549 }
 0x153   :  { %v625_v43 = vsel %vm379_vm6, %v548_v31, %v550_v33 }
 0x154   :  { %611 = vrot.lane.b32.xlu0 %v510_v22, %s11226_s24  ;;  %605 = vrot.lane.b32.xlu1 %v507_v23, %s11226_s24  ;;  %v1340_v55 = vand.u32 4294901760, %v625_v43 }
 0x156   :  { %v552_v32 = vpop.permute.xlu0 %551  ;;  %v544_v36 = vpop.permute.xlu1 %543 }
 0x157   :  { %v626_v44 = vsel %vm379_vm6, %v550_v33, %v552_v32  ;;  %v623_v56 = vsel %vm379_vm6, %v544_v36, %v546_v49 }
 0x158   :  { %617 = vrot.lane.b32.xlu0 %v528_v27, %s11226_s24  ;;  %609 = vrot.lane.b32.xlu1 %v509_v28, %s11226_s24  ;;  %v1338_v54 = vand.u32 4294901760, %v626_v44  ;;  %v693_v63 = vand.u32 4294901760, %v623_v56 }
 0x15c   :  { %621 = vrot.lane.b32.xlu0 %v530_v2, %s11226_s24  ;;  %615 = vrot.lane.b32.xlu1 %v527_v29, %s11226_s24 }
 0x160   :  { %613 = vrot.lane.b32.xlu0 %v11602_v38, %s11226_s24  ;;  %619 = vrot.lane.b32.xlu1 %v529_v30, %s11226_s24  ;;  %v624_v38 = vsel %vm379_vm6, %v546_v49, %v548_v31  ;;  %v11728_v31 = vsub.f32 %v625_v43, %v1340_v55 }
 0x161   :  { %v691_v50 = vand.u32 4294901760, %v624_v38 }
 0x163   :  { %v11726_v30 = vsub.f32 %v624_v38, %v691_v50 }
 0x164   :  { %603 = vrot.lane.b32.xlu1 %v11598_v35, %s11226_s24  ;;  %s14955_s24 = sld [smem:[#allocation78_spill]] }
 0x169   :  { %v562_v34 = vpop.permute.xlu0 %561 }
 0x16a   :  { %v531_v10 = vld [vmem:[%s14955_s24] sm:$0xff] }
 0x16b   :  { %v689_v16 = vsel %vm687_vm13, %v531_v10, 0 }
 0x16c   :  { %v11716_v24 = vand.u32 4294901760, %v689_v16 }
 0x171   :  { %v572_v37 = vpop.permute.xlu0 %571 }
 0x179   :  { %v582_v39 = vpop.permute.xlu0 %581 }
 0x17d   :  { %v11661_v40 = vpop.permute.xlu1 %583 }
 0x185   :  { %v11663_v41 = vpop.permute.xlu0 %593 }
 0x19a   :  { %v556_v42 = vpop.permute.xlu1 %555 }
 0x19e   :  { %v558_v35 = vpop.permute.xlu0 %557  ;;  %v560_v45 = vpop.permute.xlu1 %559 }
 0x19f   :  { %v11669_v46 = vsel %vm379_vm6, %v556_v42, %v558_v35  ;;  %v629_v47 = vsel %vm379_vm6, %v558_v35, %v560_v45  ;;  %v630_v48 = vsel %vm379_vm6, %v560_v45, %v562_v34  ;;  %v11736_v34 = vsub.f32 %v626_v44, %v1338_v54 }
 0x1a0   :  { %v695_v51 = vand.u32 4294901760, %v11669_v46  ;;  %v1342_v52 = vand.u32 4294901760, %v630_v48  ;;  %v1344_v53 = vand.u32 4294901760, %v629_v47 }
 0x1a2   :  { %v554_v57 = vpop.permute.xlu0 %553  ;;  %v566_v58 = vpop.permute.xlu1 %565  ;;  %v11675_v59 = vpack.c.bf16 %v695_v51, %v691_v50  ;;  %v11678_v61 = vpack.c.bf16 %v1342_v52, %v1338_v54  ;;  %v11680_v62 = vpack.c.bf16 %v1344_v53, %v1340_v55  ;;  %v11750_v38 = vsub.f32 %v629_v47, %v1344_v53 }
 0x1a3   :  { %v627_v60 = vsel %vm379_vm6, %v554_v57, %v556_v42  ;;  %v11748_v42 = vsub.f32 %v623_v56, %v693_v63  ;;  %v11756_v44 = vsub.f32 %v11669_v46, %v695_v51  ;;  %v11758_v45 = vsub.f32 %v630_v48, %v1342_v52 }
 0x1a4   :  { %14951 = vst [vmem:[#allocation6_spill] sm:$0xff] %v11675_v59  ;;  %14952 = vst [vmem:[#allocation7_spill] sm:$0xff] %v11678_v61  ;;  %v697_v0 = vand.u32 4294901760, %v627_v60  ;;  %10426 = vmatprep.subr.bf16.mxu0 %v11675_v59  ;;  %10522 = vmatprep.subr.bf16.mxu1 %v11678_v61  ;;  %v14673_v53 = vand.u32 4294901760, %v11726_v30  ;;  %v14672_v56 = vand.u32 4294901760, %v11728_v31  ;;  %v14671_v46 = vand.u32 4294901760, %v11750_v38 }
 0x1a5   :  { %14953 = vst [vmem:[#allocation8_spill] sm:$0xff] %v11680_v62  ;;  %10524 = vmatpush1.bf16.msra.mxu1 %v11680_v62  ;;  %v14670_v57 = vand.u32 4294901760, %v11748_v42  ;;  %v14674_v48 = vand.u32 4294901760, %v11736_v34  ;;  %v14675_v52 = vand.u32 4294901760, %v11758_v45 }
 0x1a6   :  { %v568_v1 = vpop.permute.xlu0 %567  ;;  %v570_v7 = vpop.permute.xlu1 %569  ;;  %v11685_v8 = vpack.c.bf16 %v697_v0, %v693_v63  ;;  %v11761_v50 = vsub.f32 %v627_v60, %v697_v0 }
 0x1a7   :  { %v11689_v9 = vsel %vm379_vm6, %v566_v58, %v568_v1  ;;  %v11701_v17 = vsel %vm379_vm6, %v570_v7, %v572_v37  ;;  %v11704_v18 = vsel %vm379_vm6, %v568_v1, %v570_v7  ;;  %v11782_v1 = vsub.f32 %v11726_v30, %v14673_v53 }
 0x1a8   :  { %14954 = vst [vmem:[#allocation9_spill] sm:$0xff] %v11685_v8  ;;  %10428 = vmatpush1.bf16.msra.mxu0 %v11685_v8  ;;  %v699_v14 = vand.u32 4294901760, %v11689_v9  ;;  %v1346_v26 = vand.u32 4294901760, %v11701_v17  ;;  %v1348_v2 = vand.u32 4294901760, %v11704_v18  ;;  %v14679_v60 = vand.u32 4294901760, %v11761_v50 }
 0x1a9   :  { %v11787_v7 = vsub.f32 %v11728_v31, %v14672_v56  ;;  %v11792_v10 = vsub.f32 %v11748_v42, %v14670_v57 }
 0x1aa   :  { %v578_v11 = vpop.permute.xlu0 %577  ;;  %v576_v12 = vpop.permute.xlu1 %575 }
 0x1ab   :  { %v11695_v13 = vsel %vm379_vm6, %v576_v12, %v578_v11 }
 0x1ac   :  { %v703_v15 = vand.u32 4294901760, %v11695_v13 }
 0x1ae   :  { %v574_v19 = vpop.permute.xlu0 %573  ;;  %v580_v20 = vpop.permute.xlu1 %579  ;;  %v11708_v21 = vpack.c.bf16 %v703_v15, %v699_v14  ;;  %v11829_v56 = vsub.f32 %v11695_v13, %v703_v15  ;;  %v11852_v15 = vsub.f32 %v11704_v18, %v1348_v2 }
 0x1af   :  { %v11711_v22 = vsel %vm379_vm6, %v578_v11, %v580_v20  ;;  %v11714_v23 = vsel %vm379_vm6, %v580_v20, %v582_v39  ;;  %v11724_v29 = vsel %vm379_vm6, %v574_v19, %v576_v12  ;;  %v11746_v39 = vsub.f32 %v689_v16, %v11716_v24  ;;  %v532_v19 = vld [vmem:[%s14962_s0] sm:$0xff]  ;;  %s11242_s0 = smov 64  }
 0x1b0   :  { %14956 = vst [vmem:[#allocation10_spill] sm:$0xff] %v11708_v21  ;;  %v1350_v27 = vand.u32 4294901760, %v11714_v23  ;;  %v1352_v28 = vand.u32 4294901760, %v11711_v22  ;;  %10430 = vmatprep.subr.bf16.mxu0 %v11708_v21  ;;  %v705_v43 = vand.u32 4294901760, %v11724_v29  ;;  %v11797_v11 = vsub.f32 %v11750_v38, %v14671_v46 }
 0x1b1   :  { %14959 = vst [vmem:[#allocation13_spill] sm:$0xff] %v11746_v39  ;;  %v11774_v51 = vand.u32 4294901760, %v11746_v39  ;;  %v11802_v12 = vsub.f32 %v11736_v34, %v14674_v48  ;;  %v11826_v46 = vsub.f32 %v11761_v50, %v14679_v60  ;;  %v11234_v16 = vmov 0  }
 0x1b2   :  { %v11730_v49 = vpop.permute.xlu0 %587  ;;  %v564_v32 = vpop.permute.xlu1 %563  ;;  %v11734_v33 = vpack.c.bf16 %v1350_v27, %v1346_v26  ;;  %v11743_v37 = vpack.c.bf16 %v1352_v28, %v1348_v2  ;;  %11218 = vset.pattern.permute.xlu1 %v11234_v16  ;;  %11219 = vset.pattern.permute.xlu0 %v11234_v16  ;;  %v11842_v60 = vsub.f32 %v11701_v17, %v1346_v26  ;;  %v1452_v5 = vand.u32 4294901760, %v11797_v11 }
 0x1b3   :  { %v11739_v36 = vsel %vm379_vm6, %v564_v32, %v566_v58  ;;  %14961 = vst [vmem:[#allocation15_spill] sm:$0xff] %v11774_v51  ;;  %v14678_v58 = vand.u32 4294901760, %v11756_v44  ;;  %v11816_v32 = vsub.f32 %v11758_v45, %v14675_v52  ;;  %535 = vperm.xlu1 %11218, %v532_v19   ;;  %v11868_v17 = vsub.f32 %v11711_v22, %v1352_v28 }
 0x1b4   :  { %14957 = vst [vmem:[#allocation11_spill] sm:$0xff] %v11734_v33  ;;  %14958 = vst [vmem:[#allocation12_spill] sm:$0xff] %v11743_v37  ;;  %v701_v35 = vand.u32 4294901760, %v11739_v36  ;;  %10526 = vmatprep.subr.bf16.mxu1 %v11734_v33  ;;  %v11875_v2 = vsub.f32 %v11724_v29, %v705_v43  ;;  %v14970_v11 = vand.u32 4294901760, %v11852_v15 }
 0x1b5   :  { %10528 = vmatpush1.bf16.msra.mxu1 %v11743_v37  ;;  %v11821_v57 = vsub.f32 %v11756_v44, %v14678_v58  ;;  %v11839_v58 = vsub.f32 %v11689_v9, %v699_v14  ;;  %v2935_v14 = vld [vmem:[%s14652_s8] sm:$0xff]  ;;  %v14968_v4 = vand.u32 4294901760, %v11868_v17 }
 0x1b6   :  { %v592_v54 = vpop.permute.xlu0 %591  ;;  %v586_v55 = vpop.permute.xlu1 %585  ;;  %v11765_v47 = vpack.c.bf16 %v705_v43, %v701_v35  ;;  %v1463_v6 = vsub.f32 %v11852_v15, %v14970_v11  ;;  %v14974_v11 = vand.u32 4294901760, %v11782_v1 }
 0x1b7   :  { %v11811_v20 = vsel %vm379_vm6, %v586_v55, %v11730_v49  ;;  %v11833_v53 = vsel %vm379_vm6, %v11661_v40, %v586_v55  ;;  %2938 = vperm.xlu1 %11218, %v2935_v14   ;;  %v1446_v14 = vand.u32 4294901760, %v11816_v32  ;;  %v799_v3 = vand.u32 4294901760, %v11821_v57 }
 0x1b8   :  { %14960 = vst [vmem:[#allocation14_spill] sm:$0xff] %v11765_v47  ;;  %10432 = vmatpush1.bf16.msra.mxu0 %v11765_v47  ;;  %v14683_v55 = vand.u32 4294901760, %v11811_v20  ;;  %v14682_v18 = vand.u32 4294901760, %v11833_v53  ;;  %v14972_v32 = vand.u32 4294901760, %v11842_v60 }
 0x1b9   :  { %v11966_v37 = vpack.c.bf16 %v799_v3, %v14974_v11 }
 0x1ba   :  { %v598_v63 = vpop.permute.xlu0 %597  ;;  %v590_v0 = vpop.permute.xlu1 %589 }
 0x1bb   :  { %v11872_v26 = vsel %vm379_vm6, %v590_v0, %v592_v54 }
 0x1bc   :  { %v1354_v54 = vand.u32 4294901760, %v11872_v26 }
 0x1be   :  { %v602_v48 = vpop.permute.xlu0 %601  ;;  %v596_v52 = vpop.permute.xlu1 %595  ;;  %v11996_v1 = vsub.f32 %v11872_v26, %v1354_v54 }
 0x1bf   :  { %v11846_v13 = vsel %vm379_vm6, %v11663_v41, %v596_v52  ;;  %v11849_v40 = vsel %vm379_vm6, %v596_v52, %v598_v63  ;;  %v11863_v41 = vsub.f32 %v11714_v23, %v1350_v27  ;;  %v11879_v52 = vsel %vm379_vm6, %v11730_v49, %v590_v0 }
 0x1c0   :  { %v14680_v16 = vand.u32 4294901760, %v11849_v40  ;;  %v14681_v9 = vand.u32 4294901760, %v11846_v13  ;;  %v14688_v27 = vand.u32 4294901760, %v11829_v56 }
 0x1c2   :  { %v11881_v19 = vpop.permute.xlu0 %607  ;;  %v600_v23 = vpop.permute.xlu1 %599  ;;  %v11887_v22 = vpack.c.bf16 %v14680_v16, %v14683_v55  ;;  %v11898_v49 = vpack.c.bf16 %v14681_v9, %v14682_v18  ;;  %v14691_v9 = vand.u32 4294901760, %v11879_v52  ;;  %v1440_v18 = vand.u32 4294901760, %v11787_v7 }
 0x1c3   :  { %v11891_v28 = vsel %vm379_vm6, %v598_v63, %v600_v23  ;;  %v646_v29 = vsel %vm379_vm6, %v600_v23, %v602_v48  ;;  %v11909_v23 = vsub.f32 %v11739_v36, %v701_v35  ;;  %v822_v36 = vsub.f32 %v11829_v56, %v14688_v27 }
 0x1c4   :  { %14963 = vst [vmem:[#allocation16_spill] sm:$0xff] %v11887_v22  ;;  %14964 = vst [vmem:[#allocation17_spill] sm:$0xff] %v11898_v49  ;;  %v1358_v0 = vand.u32 4294901760, %v646_v29  ;;  %v1360_v16 = vand.u32 4294901760, %v11891_v28  ;;  %10434 = vmatprep.subr.bf16.mxu0 %v11887_v22  ;;  %v793_v35 = vand.u32 4294901760, %v11792_v10  ;;  %v805_v55 = vand.u32 4294901760, %v11826_v46 }
 0x1c5   :  { %10436 = vmatpush1.bf16.msra.mxu0 %v11898_v49  ;;  %v14967_v27 = vand.u32 4294901760, %v11839_v58  ;;  %v1434_v46 = vand.u32 4294901760, %v11802_v12  ;;  %v14969_v7 = vand.u32 4294901760, %v11863_v41  ;;  %v823_v12 = vand.u32 4294901760, %v822_v36 }
 0x1c6   :  { %v612_v25 = vpop.permute.xlu0 %611  ;;  %v11916_v43 = vpop.permute.xlu1 %605  ;;  %v11918_v63 = vpack.c.bf16 %v1358_v0, %v1354_v54  ;;  %v11926_v48 = vpack.c.bf16 %v1360_v16, %v14691_v9  ;;  %v1475_v9 = vsub.f32 %v11868_v17, %v14968_v4  ;;  %v11970_v21 = vpack.c.bf16 %v805_v55, %v793_v35 }
 0x1c7   :  { %v810_v10 = vsub.f32 %v11839_v58, %v14967_v27  ;;  %v1469_v57 = vsub.f32 %v11863_v41, %v14969_v7  ;;  %v14971_v27 = vand.u32 4294901760, %v11875_v2  ;;  %v11957_v47 = vpack.c.bf16 %v1446_v14, %v1434_v46 }
 0x1c8   :  { %14965 = vst [vmem:[#allocation18_spill] sm:$0xff] %v11918_v63  ;;  %14966 = vst [vmem:[#allocation19_spill] sm:$0xff] %v11926_v48  ;;  %10530 = vmatprep.subr.bf16.mxu1 %v11918_v63  ;;  %v14973_v7 = vsub.f32 %v11746_v39, %v11774_v51  ;;  %v14975_v33 = vand.u32 4294901760, %v11909_v23  ;;  %v648_v14 = vsel %vm379_vm6, %v11916_v43, %v11881_v19  ;;  %v1476_v46 = vand.u32 4294901760, %v1475_v9 }
 0x1c9   :  { %10532 = vmatpush1.bf16.msra.mxu1 %v11926_v48  ;;  %v11952_v49 = vsub.f32 %v11875_v2, %v14971_v27  ;;  %v1457_v48 = vsub.f32 %v11842_v60, %v14972_v32  ;;  %v11968_v27 = vpack.c.bf16 %v1452_v5, %v1440_v18  ;;  %v811_v8 = vand.u32 4294901760, %v810_v10 }
 0x1ca   :  { %v618_v4 = vpop.permute.xlu0 %617  ;;  %v610_v22 = vpop.permute.xlu1 %609  ;;  %v11962_v63 = vand.u32 4294901760, %v14973_v7  ;;  %v11975_v36 = vsub.f32 %v11909_v23, %v14975_v33  ;;  %v1470_v32 = vand.u32 4294901760, %v1469_v57  ;;  %v1464_v55 = vand.u32 4294901760, %v1463_v6 }
 0x1cb   :  { %v1458_v5 = vand.u32 4294901760, %v1457_v48  ;;  %v11981_v18 = vpack.c.bf16 %v823_v12, %v811_v8  ;;  %v14976_v35 = vand.u32 4294901760, %v11811_v20  ;;  %v14977_v33 = vand.u32 4294901760, %v11833_v53 }
 0x1cc   :  { %v650_v9 = vsel %vm379_vm6, %v610_v22, %v612_v25  ;;  %v11998_v8 = vsub.f32 %v646_v29, %v1358_v0  ;;  %v715_v6 = vand.u32 4294901760, %v648_v14  ;;  %v12009_v25 = vsub.f32 %v11891_v28, %v1360_v16 }
 0x1cd   :  { %v11986_v10 = vsub.f32 %v11811_v20, %v14976_v35  ;;  %v11991_v11 = vsub.f32 %v11833_v53, %v14977_v33  ;;  %v14978_v20 = vand.u32 4294901760, %v11849_v40  ;;  %v10541_v53 = vpack.c.bf16 %v1470_v32, %v1458_v5 }
 0x1ce   :  { %v622_v3 = vpop.permute.xlu0 %621  ;;  %v616_v7 = vpop.permute.xlu1 %615  ;;  %v12006_v33 = vpack.c.bf16 %v1476_v46, %v1464_v55  ;;  %v649_v26 = vsel %vm379_vm6, %v11881_v19, %v610_v22  ;;  %v1362_v29 = vand.u32 4294901760, %v650_v9  ;;  %v14980_v12 = vand.u32 4294901760, %v11879_v52 }
 0x1cf   :  { %v652_v57 = vsel %vm379_vm6, %v616_v7, %v618_v4  ;;  %v12004_v35 = vsub.f32 %v11849_v40, %v14978_v20  ;;  %v14981_v5 = vand.u32 4294901760, %v11846_v13 }
 0x1d0   :  { %v719_v48 = vand.u32 4294901760, %v652_v57  ;;  %v12018_v62 = vsub.f32 %v11879_v52, %v14980_v12  ;;  %v1364_v52 = vand.u32 4294901760, %v649_v26  ;;  %v14718_v12 = vand.u32 4294901760, %v12009_v25 }
 0x1d1   :  { %v12029_v55 = vsub.f32 %v11846_v13, %v14981_v5  ;;  %v12034_v20 = vsub.f32 %v650_v9, %v1362_v29  ;;  %v14984_v9 = vand.u32 4294901760, %v11998_v8 }
 0x1d2   :  { %v614_v54 = vpop.permute.xlu0 %613  ;;  %v620_v0 = vpop.permute.xlu1 %619  ;;  %v12013_v51 = vpack.c.bf16 %v719_v48, %v715_v6  ;;  %v12040_v22 = vsub.f32 %v652_v57, %v719_v48  ;;  %v12054_v48 = vsub.f32 %v648_v14, %v715_v6  ;;  %v1499_v14 = vsub.f32 %v12009_v25, %v14718_v12 }
 0x1d3   :  { %v653_v40 = vsel %vm379_vm6, %v618_v4, %v620_v0  ;;  %v654_v32 = vsel %vm379_vm6, %v620_v0, %v622_v3  ;;  %v651_v4 = vsel %vm379_vm6, %v614_v54, %v616_v7  ;;  %v14719_v3 = vand.u32 4294901760, %v12004_v35 }
 0x1d4   :  { %14979 = vst [vmem:[#allocation20_spill] sm:$0xff] %v12013_v51  ;;  %v1366_v28 = vand.u32 4294901760, %v654_v32  ;;  %v1368_v46 = vand.u32 4294901760, %v653_v40  ;;  %10438 = vmatprep.subr.bf16.mxu0 %v12013_v51  ;;  %v721_v7 = vand.u32 4294901760, %v651_v4  ;;  %v14722_v57 = vand.u32 4294901760, %v12034_v20 }
 0x1d5   :  { %v14987_v12 = vand.u32 4294901760, %v12018_v62 }
 0x1d6   :  { %v12036_v0 = vsub.f32 %v654_v32, %v1366_v28  ;;  %v604_v16 = vpop.permute.xlu1 %603  ;;  %v12038_v19 = vpack.c.bf16 %v1366_v28, %v1362_v29  ;;  %v12042_v51 = vsub.f32 %v653_v40, %v1368_v46  ;;  %v12046_v5 = vpack.c.bf16 %v1368_v46, %v1364_v52 }
 0x1d7   :  { %v647_v13 = vsel %vm379_vm6, %v604_v16, %v11916_v43  ;;  %v1493_v32 = vsub.f32 %v11998_v8, %v14984_v9  ;;  %v12056_v40 = vsub.f32 %v649_v26, %v1364_v52  ;;  %v14985_v43 = vand.u32 4294901760, %v11996_v1 }
 0x1d8   :  { %14982 = vst [vmem:[#allocation21_spill] sm:$0xff] %v12038_v19  ;;  %14983 = vst [vmem:[#allocation22_spill] sm:$0xff] %v12046_v5  ;;  %v717_v54 = vand.u32 4294901760, %v647_v13  ;;  %10534 = vmatprep.subr.bf16.mxu1 %v12038_v19  ;;  %v14720_v29 = vand.u32 4294901760, %v12036_v0  ;;  %v14721_v28 = vand.u32 4294901760, %v12029_v55  ;;  %v846_v26 = vsub.f32 %v12004_v35, %v14719_v3 }
 0x1d9   :  { %10536 = vmatpush1.bf16.msra.mxu1 %v12046_v5  ;;  %v1481_v16 = vsub.f32 %v11996_v1, %v14985_v43  ;;  %v12078_v43 = vsub.f32 %v651_v4, %v721_v7  ;;  %v1487_v6 = vsub.f32 %v12018_v62, %v14987_v12  ;;  %v14988_v4 = vand.u32 4294901760, %v11986_v10 }
 0x1da   :  { %v12063_v46 = vsub.f32 %v647_v13, %v717_v54  ;;  %10538 = vmatprep.subr.bf16.mxu1 %v11957_v47  ;;  %v12066_v9 = vpack.c.bf16 %v721_v7, %v717_v54  ;;  %v1494_v47 = vand.u32 4294901760, %v1493_v32  ;;  %v1517_v54 = vsub.f32 %v12036_v0, %v14720_v29 }
 0x1db   :  { %v834_v7 = vsub.f32 %v11986_v10, %v14988_v4  ;;  %v852_v29 = vsub.f32 %v12029_v55, %v14721_v28  ;;  %v1482_v12 = vand.u32 4294901760, %v1481_v16  ;;  %v14989_v3 = vmov 0.0  }
 0x1dc   :  { %14986 = vst [vmem:[#allocation23_spill] sm:$0xff] %v12066_v9  ;;  %10440 = vmatpush1.bf16.msra.mxu0 %v12066_v9  ;;  %1424 = vmatmul.mubr.f32.vlgmr.msra.gmra.mrb[0].mxu1 %v11962_v63  ;;  %v847_v32 = vand.u32 4294901760, %v846_v26  ;;  %v1500_v52 = vand.u32 4294901760, %v1499_v14  ;;  %v14991_v28 = vand.u32 4294901760, %v12040_v22  ;;  %v1518_v5 = vand.u32 4294901760, %v1517_v54 }
 0x1dd   :  { %10442 = vmatprep.subr.bf16.mxu0 %v11966_v37  ;;  %10540 = vmatpush1.bf16.msra.mxu1 %v11968_v27  ;;  %v1505_v37 = vsub.f32 %v12034_v20, %v14722_v57  ;;  %v14990_v27 = vand.u32 4294901760, %v12042_v51  ;;  %v10545_v9 = vpack.c.bf16 %v1494_v47, %v1482_v12  ;;  %v1488_v26 = vand.u32 4294901760, %v1487_v6 }
 0x1de   :  { %10542 = vmatprep.subr.bf16.mxu1 %v10541_v53  ;;  %1574 = vmatprep.mubr.f32.mxu1 %v14989_v3  ;;  %v870_v13 = vsub.f32 %v12040_v22, %v14991_v28  ;;  %v14992_v53 = vand.u32 4294901760, %v11991_v11  ;;  %v835_v28 = vand.u32 4294901760, %v834_v7  ;;  %v14996_v54 = vand.u32 4294901760, %v11975_v36 }
 0x1df   :  { %v1523_v4 = vsub.f32 %v12042_v51, %v14990_v27  ;;  %777 = vmatmul.mubr.f32.vlgmr.msra.gmra.mrb[0].mxu0 %v11962_v63  ;;  %v14993_v63 = vand.u32 4294901760, %v12056_v40  ;;  %v14994_v27 = vand.u32 4294901760, %v12054_v48  ;;  %v14997_v12 = vand.u32 4294901760, %v11952_v49 }
 0x1e0   :  { %v840_v16 = vsub.f32 %v11991_v11, %v14992_v53  ;;  %10444 = vmatpush1.bf16.msra.mxu0 %v11970_v21  ;;  %927 = vmatprep.mubr.f32.mxu0 %v14989_v3  ;;  %v14995_v21 = vand.u32 4294901760, %v12063_v46  ;;  %v1506_v57 = vand.u32 4294901760, %v1505_v37  ;;  %v10449_v19 = vpack.c.bf16 %v847_v32, %v835_v28 }
 0x1e1   :  { %v1511_v14 = vsub.f32 %v12056_v40, %v14993_v63  ;;  %10446 = vmatprep.subr.bf16.mxu0 %v11981_v18  ;;  %10544 = vmatpush1.bf16.msra.mxu1 %v12006_v33  ;;  %v858_v53 = vsub.f32 %v12054_v48, %v14994_v27  ;;  %v10447_v63 = vpack.c.bf16 %v14997_v12, %v14996_v54  ;;  %v853_v18 = vand.u32 4294901760, %v852_v29 }
 0x1e2   :  { %v864_v47 = vsub.f32 %v12063_v46, %v14995_v21  ;;  %10546 = vmatprep.subr.bf16.mxu1 %v10545_v9  ;;  %v10547_v33 = vpack.c.bf16 %v1500_v52, %v1488_v26  ;;  %v871_v7 = vand.u32 4294901760, %v870_v13  ;;  %v1524_v6 = vand.u32 4294901760, %v1523_v4 }
 0x1e3   :  { %v14998_v59 = vand.u32 4294901760, %v12078_v43  ;;  %v10549_v39 = vpack.c.bf16 %v1518_v5, %v1506_v57  ;;  %v841_v61 = vand.u32 4294901760, %v840_v16  ;;  %v859_v9 = vand.u32 4294901760, %v858_v53 }
 0x1e4   :  { %10448 = vmatpush1.bf16.msra.mxu0 %v10447_v63  ;;  %v1512_v36 = vand.u32 4294901760, %v1511_v14  ;;  %v865_v21 = vand.u32 4294901760, %v864_v47  ;;  %v10553_v52 = vpack.c.bf16 %v11758_v45, %v11736_v34  ;;  %v10555_v5 = vpack.c.bf16 %v11750_v38, %v11728_v31  ;;  %v14999_v63 = vld [vmem:[#allocation7_spill] sm:$0xff] }
 0x1e5   :  { %v876_v27 = vsub.f32 %v12078_v43, %v14998_v59  ;;  %10450 = vmatprep.subr.bf16.mxu0 %v10449_v19  ;;  %10548 = vmatpush1.bf16.msra.mxu1 %v10547_v33  ;;  %v10451_v49 = vpack.c.bf16 %v853_v18, %v841_v61  ;;  %v10453_v37 = vpack.c.bf16 %v871_v7, %v859_v9  ;;  %v15000_v18 = vld [vmem:[#allocation13_spill] sm:$0xff]  ;;  %v15001_v33 = vld [vmem:[#allocation6_spill] sm:$0xff]  ;;  %v15002_v7 = vld [vmem:[#allocation8_spill] sm:$0xff]  ;;  %vm4329_vm6 = vcmask 506880  }
 0x1e6   :  { %10550 = vmatprep.subr.bf16.mxu1 %v10549_v39  ;;  %v10551_v29 = vpack.c.bf16 %v1524_v6, %v1512_v36  ;;  %v10457_v19 = vpack.c.bf16 %v11756_v44, %v11726_v30  ;;  %v10557_v61 = vpack.c.bf16 %v11863_v41, %v11842_v60  ;;  %v10459_v39 = vpack.c.bf16 %v11761_v50, %v11748_v42  ;;  %v15003_v6 = vld [vmem:[#allocation11_spill] sm:$0xff]  ;;  %v15005_v9 = vld [vmem:[#allocation10_spill] sm:$0xff]  ;;  %v15006_v36 = vld [vmem:[#allocation12_spill] sm:$0xff] }
 0x1e7   :  { %v877_v32 = vand.u32 4294901760, %v876_v27  ;;  %v10461_v57 = vpack.c.bf16 %v11829_v56, %v11839_v58  ;;  %v10559_v13 = vpack.c.bf16 %v11868_v17, %v11852_v15  ;;  %v10561_v4 = vpack.c.bf16 %v11998_v8, %v11996_v1  ;;  %v15004_v27 = vld [vmem:[#allocation9_spill] sm:$0xff] }
 0x1e8   :  { %10452 = vmatpush1.bf16.msra.mxu0 %v10451_v49  ;;  %v10463_v16 = vpack.c.bf16 %v11875_v2, %v11909_v23  ;;  %v10465_v14 = vpack.c.bf16 %v12004_v35, %v11986_v10  ;;  %v10563_v28 = vpack.c.bf16 %v12009_v25, %v12018_v62  ;;  %v10565_v26 = vpack.c.bf16 %v12036_v0, %v12034_v20  ;;  %v15008_v49 = vld [vmem:[#allocation14_spill] sm:$0xff] }
 0x1e9   :  { %10454 = vmatprep.subr.bf16.mxu0 %v10453_v37  ;;  %10552 = vmatpush1.bf16.msra.mxu1 %v10551_v29  ;;  %v10455_v59 = vpack.c.bf16 %v877_v32, %v865_v21  ;;  %v10467_v53 = vpack.c.bf16 %v12029_v55, %v11991_v11  ;;  %v10469_v47 = vpack.c.bf16 %v12040_v22, %v12054_v48  ;;  %v15007_v21 = vld [vmem:[#allocation18_spill] sm:$0xff]  ;;  %v15009_v37 = vld [vmem:[#allocation16_spill] sm:$0xff]  ;;  %v15010_v29 = vld [vmem:[#allocation19_spill] sm:$0xff] }
 0x1ea   :  { %10554 = vmatprep.subr.bf16.mxu1 %v10553_v52  ;;  %v10567_v54 = vpack.c.bf16 %v12042_v51, %v12056_v40  ;;  %v10471_v12 = vpack.c.bf16 %v12078_v43, %v12063_v46  ;;  %v15011_v32 = vld [vmem:[#allocation21_spill] sm:$0xff] }
 0x1eb   :  { %v15012_v52 = vld [vmem:[#allocation17_spill] sm:$0xff] }
 0x1ec   :  { %10456 = vmatpush1.bf16.msra.mxu0 %v10455_v59  ;;  %1576 = vmatmul.mubr.f32.vlgmr.msra.gmra.mrb[0].mxu1 %v11716_v24  ;;  %v15013_v59 = vand.u32 4294901760, %v11736_v34  ;;  %v15022_v34 = vld [vmem:[#allocation15_spill] sm:$0xff] }
 0x1ed   :  { %10458 = vmatprep.subr.bf16.mxu0 %v10457_v19  ;;  %10556 = vmatpush1.bf16.msra.mxu1 %v10555_v5  ;;  %v15014_v19 = vand.u32 4294901760, %v11758_v45  ;;  %v15023_v45 = vand.u32 4294901760, %v11842_v60 }
 0x1ee   :  { %10558 = vmatprep.subr.bf16.mxu1 %v10557_v61  ;;  %1678 = vmatprep.mubr.f32.mxu1 %v14989_v3  ;;  %v15015_v61 = vld [vmem:[#allocation20_spill] sm:$0xff] }
 0x1ef   :  { %929 = vmatmul.mubr.f32.vlgmr.msra.gmra.mrb[0].mxu0 %v11716_v24  ;;  %v10585_v5 = vpack.c.bf16 %v15014_v19, %v15013_v59 }
 0x1f0   :  { %10460 = vmatpush1.bf16.msra.mxu0 %v10459_v39  ;;  %1031 = vmatprep.mubr.f32.mxu0 %v14989_v3  ;;  %v15016_v39 = vld [vmem:[#allocation22_spill] sm:$0xff] }
 0x1f1   :  { %10462 = vmatprep.subr.bf16.mxu0 %v10461_v57  ;;  %10560 = vmatpush1.bf16.msra.mxu1 %v10559_v13  ;;  %v15017_v57 = vand.u32 4294901760, %v11726_v30  ;;  %v15018_v13 = vand.u32 4294901760, %v11756_v44  ;;  %v15025_v30 = vand.u32 4294901760, %v11748_v42  ;;  %v15026_v44 = vand.u32 4294901760, %v11761_v50 }
 0x1f2   :  { %10562 = vmatprep.subr.bf16.mxu1 %v10561_v4  ;;  %v15031_v42 = vand.u32 4294901760, %v11996_v1  ;;  %v15032_v50 = vand.u32 4294901760, %v11998_v8  ;;  %v15037_v1 = vand.u32 4294901760, %v12018_v62  ;;  %v15038_v8 = vand.u32 4294901760, %v12009_v25 }
 0x1f3   :  { %v10489_v4 = vpack.c.bf16 %v15018_v13, %v15017_v57  ;;  %v15039_v13 = vand.u32 4294901760, %v12034_v20  ;;  %v15044_v62 = vand.u32 4294901760, %v12040_v22  ;;  %v15046_v20 = vand.u32 4294901760, %v12042_v51  ;;  %v1990_v51 = vld [vmem:[%s14653_s6] sm:$0xff] }
 0x1f4   :  { %10464 = vmatpush1.bf16.msra.mxu0 %v10463_v16  ;;  %v15019_v16 = vand.u32 4294901760, %v11728_v31  ;;  %v10491_v31 = vpack.c.bf16 %v15026_v44, %v15025_v30  ;;  %v10593_v59 = vpack.c.bf16 %v15032_v50, %v15031_v42  ;;  %v10595_v57 = vpack.c.bf16 %v15038_v8, %v15037_v1  ;;  %1993 = vperm.xlu0 %11219, %v1990_v51   ;;  %v1989_v22 = vld [vmem:[%s14654_s5] sm:$0xff]  ;;  %v15051_v8 = vld [vmem:[#allocation4_spill] sm:$0xff]  ;;  %s11238_s5 = smov 32  }
 0x1f5   :  { %10466 = vmatprep.subr.bf16.mxu0 %v10465_v14  ;;  %10564 = vmatpush1.bf16.msra.mxu1 %v10563_v28  ;;  %v15020_v14 = vand.u32 4294901760, %v11750_v38  ;;  %v15027_v38 = vand.u32 4294901760, %v11839_v58  ;;  %v15033_v58 = vand.u32 4294901760, %v11909_v23  ;;  %v15042_v23 = vand.u32 4294901760, %v12029_v55 }
 0x1f6   :  { %10566 = vmatprep.subr.bf16.mxu1 %v10565_v26  ;;  %v15021_v26 = vld [vmem:[#allocation23_spill] sm:$0xff]  ;;  %v15048_v55 = vand.u32 4294901760, %v12078_v43 }
 0x1f7   :  { %v10587_v28 = vpack.c.bf16 %v15020_v14, %v15019_v16  ;;  %v15045_v14 = vand.u32 4294901760, %v12056_v40 }
 0x1f8   :  { %10468 = vmatpush1.bf16.msra.mxu0 %v10467_v53  ;;  %v15024_v53 = vand.u32 4294901760, %v11863_v41  ;;  %v15029_v41 = vand.u32 4294901760, %v11852_v15  ;;  %v15035_v15 = vand.u32 4294901760, %v11986_v10 }
 0x1f9   :  { %10470 = vmatprep.subr.bf16.mxu0 %v10469_v47  ;;  %10568 = vmatpush1.bf16.msra.mxu1 %v10567_v54  ;;  %v15028_v54 = vand.u32 4294901760, %v11829_v56  ;;  %v15034_v56 = vand.u32 4294901760, %v11875_v2  ;;  %v15041_v2 = vand.u32 4294901760, %v11991_v11  ;;  %v15047_v11 = vand.u32 4294901760, %v12063_v46 }
 0x1fa   :  { %10570 = vmatprep.subr.bf16.mxu1 %v14999_v63  ;;  %v10589_v47 = vpack.c.bf16 %v15024_v53, %v15023_v45 }
 0x1fb   :  { %v10493_v60 = vpack.c.bf16 %v15028_v54, %v15027_v38  ;;  %v10495_v19 = vpack.c.bf16 %v15034_v56, %v15033_v58  ;;  %v10499_v10 = vpack.c.bf16 %v15042_v23, %v15041_v2 }
 0x1fc   :  { %10472 = vmatpush1.bf16.msra.mxu0 %v10471_v12  ;;  %1681 = vmatmul.mubr.f32.vlgmr.msra.gmra.mrb[0].mxu1 %v15000_v18  ;;  %v15030_v12 = vand.u32 4294901760, %v11868_v17  ;;  %v15036_v17 = vand.u32 4294901760, %v12004_v35  ;;  %v15043_v35 = vand.u32 4294901760, %v12054_v48  ;;  %v1998_v48 = vsel %vm1996_vm14, %v1989_v22, 0 }
 0x1fd   :  { %10474 = vmatprep.subr.bf16.mxu0 %v15001_v33  ;;  %10572 = vmatpush1.bf16.msra.mxu1 %v15002_v7  ;;  %v12289_v40 = vand.u32 4294901760, %v1998_v48 }
 0x1fe   :  { %10574 = vmatprep.subr.bf16.mxu1 %v15003_v6  ;;  %1767 = vmatprep.mubr.f32.mxu1 %v14989_v3  ;;  %v10501_v25 = vpack.c.bf16 %v15044_v62, %v15043_v35  ;;  %v10420_v62 = vld [vmem:[%s14655_s2 + $0x3] ss:$8 sm:$0xf] }
 0x1ff   :  { %1034 = vmatmul.mubr.f32.vlgmr.msra.gmra.mrb[0].mxu0 %v15000_v18  ;;  %v10591_v18 = vpack.c.bf16 %v15030_v12, %v15029_v41  ;;  %v2068_v46 = vsub.f32 %v1998_v48, %v12289_v40  ;;  %v10422_v48 = vld [vmem:[%s14655_s2 + $0x6] ss:$8 sm:$0xf] }
 0x200   :  { %10476 = vmatpush1.bf16.msra.mxu0 %v15004_v27  ;;  %1120 = vmatprep.mubr.f32.mxu0 %v14989_v3 }
 0x201   :  { %10478 = vmatprep.subr.bf16.mxu0 %v15005_v9  ;;  %10576 = vmatpush1.bf16.msra.mxu1 %v15006_v36 }
 0x202   :  { %10578 = vmatprep.subr.bf16.mxu1 %v15007_v21 }
 0x204   :  { %10480 = vmatpush1.bf16.msra.mxu0 %v15008_v49 }
 0x205   :  { %10482 = vmatprep.subr.bf16.mxu0 %v15009_v37  ;;  %10580 = vmatpush1.bf16.msra.mxu1 %v15010_v29 }
 0x206   :  { %10582 = vmatprep.subr.bf16.mxu1 %v15011_v32 }
 0x208   :  { %10484 = vmatpush1.bf16.msra.mxu0 %v15012_v52 }
 0x209   :  { %10486 = vmatprep.subr.bf16.mxu0 %v15015_v61  ;;  %10584 = vmatpush1.bf16.msra.mxu1 %v15016_v39 }
 0x20a   :  { %10586 = vmatprep.subr.bf16.mxu1 %v10585_v5  ;;  %v10497_v5 = vpack.c.bf16 %v15036_v17, %v15035_v15  ;;  %v15049_v15 = vld [vmem:[#allocation5_spill] sm:$0xff] }
 0x20c   :  { %10488 = vmatpush1.bf16.msra.mxu0 %v15021_v26  ;;  %1771 = vmatmul.mubr.f32.vlgmr.msra.gmra.mrb[0].mxu1 %v15022_v34 }
 0x20d   :  { %10490 = vmatprep.subr.bf16.mxu0 %v10489_v4  ;;  %10588 = vmatpush1.bf16.msra.mxu1 %v10587_v28  ;;  %v15040_v4 = vand.u32 4294901760, %v12036_v0  ;;  %v10599_v28 = vpack.c.bf16 %v15046_v20, %v15045_v14  ;;  %v10503_v0 = vpack.c.bf16 %v15048_v55, %v15047_v11  ;;  %v4016_v20 = vrot.slane %v10420_v62, %v15051_v8  ;;  %v10421_v11 = vld [vmem:[%s14655_s2 + $0x5] ss:$8 sm:$0xf] }
 0x20e   :  { %10590 = vmatprep.subr.bf16.mxu1 %v10589_v47  ;;  %1889 = vmatprep.mubr.f32.mxu1 %v14989_v3  ;;  %v4048_v55 = vrot.slane %v10421_v11, %v15049_v15  ;;  %v4056_v51 = vrot.slane %v10421_v11, %v15051_v8 }
 0x20f   :  { %1124 = vmatmul.mubr.f32.vlgmr.msra.gmra.mrb[0].mxu0 %v15022_v34  ;;  %v10597_v16 = vpack.c.bf16 %v15040_v4, %v15039_v13  ;;  %v15052_v13 = vld [vmem:[#allocation2_spill] sm:$0xff] }
 0x210   :  { %10492 = vmatpush1.bf16.msra.mxu0 %v10491_v31  ;;  %1242 = vmatprep.mubr.f32.mxu0 %v14989_v3  ;;  %v4052_v22 = vrot.slane %v10421_v11, %v15052_v13 }
 0x211   :  { %10494 = vmatprep.subr.bf16.mxu0 %v10493_v60  ;;  %10592 = vmatpush1.bf16.msra.mxu1 %v10591_v18 }
 0x212   :  { %10594 = vmatprep.subr.bf16.mxu1 %v10593_v59 }
 0x214   :  { %10496 = vmatpush1.bf16.msra.mxu0 %v10495_v19  ;;  %v10418_v19 = vld [vmem:[%s14655_s2 + $0x1] ss:$8 sm:$0xf] }
 0x215   :  { %10498 = vmatprep.subr.bf16.mxu0 %v10497_v5  ;;  %10596 = vmatpush1.bf16.msra.mxu1 %v10595_v57  ;;  %v3927_v17 = vrot.slane %v10418_v19, %v15049_v15  ;;  %v15050_v5 = vld [vmem:[#allocation3_spill] sm:$0xff]  ;;  %v3935_v57 = vrot.slane %v10418_v19, %v15051_v8  ;;  %v3931_v4 = vrot.slane %v10418_v19, %v15052_v13 }
 0x216   :  { %10598 = vmatprep.subr.bf16.mxu1 %v10597_v16  ;;  %v3923_v1 = vrot.slane %v10418_v19, %v15050_v5  ;;  %v10419_v16 = vld [vmem:[%s14655_s2 + $0x2] ss:$8 sm:$0xf]  ;;  %v4004_v14 = vrot.slane %v10420_v62, %v15050_v5 }
 0x217   :  { %3938 = vrot.lane.b32.xlu0 %v3927_v17, %s11230_s3  ;;  %v3967_v2 = vrot.slane %v10419_v16, %v15049_v15  ;;  %v3963_v23 = vrot.slane %v10419_v16, %v15050_v5  ;;  %v3971_v35 = vrot.slane %v10419_v16, %v15052_v13 }
 0x218   :  { %10500 = vmatpush1.bf16.msra.mxu0 %v10499_v10  ;;  %3936 = vrot.lane.b32.xlu1 %v3923_v1, %s11230_s3  ;;  %v3975_v10 = vrot.slane %v10419_v16, %v15051_v8 }
 0x219   :  { %10502 = vmatprep.subr.bf16.mxu0 %v10501_v25  ;;  %10600 = vmatpush1.bf16.msra.mxu1 %v10599_v28  ;;  %v4008_v25 = vrot.slane %v10420_v62, %v15049_v15  ;;  %v4012_v28 = vrot.slane %v10420_v62, %v15052_v13 }
 0x21a   :  { %10602 = vmatprep.subr.bf16.mxu1 %v14999_v63 }
 0x21b   :  { %3942 = vrot.lane.b32.xlu0 %v3935_v57, %s11230_s3 }
 0x21c   :  { %10504 = vmatpush1.bf16.msra.mxu0 %v10503_v0  ;;  %1891 = vmatmul.mubr.f32.vlgmr.msra.gmra.mrb[0].mxu1 %v11716_v24  ;;  %v4044_v0 = vrot.slane %v10421_v11, %v15050_v5 }
 0x21d   :  { %10506 = vmatprep.subr.bf16.mxu0 %v15001_v33  ;;  %10604 = vmatpush1.bf16.msra.mxu1 %v15002_v7 }
 0x21e   :  { %10606 = vmatprep.subr.bf16.mxu1 %v15003_v6  ;;  %1977 = vmatprep.mubr.f32.mxu1 %v14989_v3 }
 0x21f   :  { %1244 = vmatmul.mubr.f32.vlgmr.msra.gmra.mrb[0].mxu0 %v11716_v24  ;;  %3940 = vrot.lane.b32.xlu1 %v3931_v4, %s11230_s3 }
 0x220   :  { %10508 = vmatpush1.bf16.msra.mxu0 %v15004_v27  ;;  %1330 = vmatprep.mubr.f32.mxu0 %v14989_v3 }
 0x221   :  { %10510 = vmatprep.subr.bf16.mxu0 %v15005_v9  ;;  %10608 = vmatpush1.bf16.msra.mxu1 %v15006_v36 }
 0x222   :  { %10610 = vmatprep.subr.bf16.mxu1 %v15007_v21  ;;  %3978 = vrot.lane.b32.xlu0 %v3967_v2, %s11235_s25 }
 0x223   :  { %3976 = vrot.lane.b32.xlu1 %v3963_v23, %s11235_s25 }
 0x224   :  { %10512 = vmatpush1.bf16.msra.mxu0 %v15008_v49 }
 0x225   :  { %10514 = vmatprep.subr.bf16.mxu0 %v15009_v37  ;;  %10612 = vmatpush1.bf16.msra.mxu1 %v15010_v29 }
 0x226   :  { %10614 = vmatprep.subr.bf16.mxu1 %v15011_v32  ;;  %3982 = vrot.lane.b32.xlu0 %v3975_v10, %s11235_s25 }
 0x227   :  { %3980 = vrot.lane.b32.xlu1 %v3971_v35, %s11235_s25 }
 0x228   :  { %10516 = vmatpush1.bf16.msra.mxu0 %v15012_v52 }
 0x229   :  { %10518 = vmatprep.subr.bf16.mxu0 %v15015_v61  ;;  %10616 = vmatpush1.bf16.msra.mxu1 %v15016_v39 }
 0x22a   :  { %4019 = vrot.lane.b32.xlu0 %v4008_v25, %s11228_s1 }
 0x22b   :  { %4017 = vrot.lane.b32.xlu1 %v4004_v14, %s11228_s1 }
 0x22c   :  { %10520 = vmatpush1.bf16.msra.mxu0 %v15021_v26  ;;  %1979 = vmatmul.mubr.f32.vlgmr.msra.gmra.mrb[0].mxu1 %v11716_v24 }
 0x22d   :  { %2531 = vmatprep.mubr.f32.mxu1 %v14989_v3 }
 0x22e   :  { %4023 = vrot.lane.b32.xlu0 %v4016_v20, %s11228_s1 }
 0x22f   :  { %1332 = vmatmul.mubr.f32.vlgmr.msra.gmra.mrb[0].mxu0 %v11716_v24  ;;  %v12292_v24 = vand.u32 4294901760, %v2068_v46  ;;  %4021 = vrot.lane.b32.xlu1 %v4012_v28, %s11228_s1 }
 0x230   :  { %2066 = vmatprep.mubr.f32.mxu0 %v14989_v3 }
 0x231   :  { %v2070_v27 = vsub.f32 %v2068_v46, %v12292_v24 }
 0x232   :  { %v536_v43 = vpop.permute.xlu1 %535  ;;  %4059 = vrot.lane.b32.xlu0 %v4048_v55, %s11236_s22 }
 0x233   :  { %v2071_v39 = vand.u32 4294901760, %v2070_v27  ;;  %4057 = vrot.lane.b32.xlu1 %v4044_v0, %s11236_s22 }
 0x236   :  { %4063 = vrot.lane.b32.xlu0 %v4056_v51, %s11236_s22  ;;  %v12414_v0 = vpop.permute.xlu1 %2938 }
 0x237   :  { %4061 = vrot.lane.b32.xlu1 %v4052_v22, %s11236_s22  ;;  %s11243_s22 = smov 62  }
 0x28a   :  { %v12421_v22 = vpop.permute.xlu1 %3936 }
 0x2ff   :  { %v1980_v63 = vpop.f32.mrb[0].mxu1 }
 0x300   :  { %v11003_v33 = vadd.f32 %v1980_v63, %v536_v43  ;;  %v1982_v7 = vpop.f32.mrb[1].mxu1  ;;  %v10423_v63 = vld [vmem:[%s14655_s2 + $0x7] ss:$8 sm:$0xf] }
 0x301   :  { %v11004_v6 = vadd.f32 %v1982_v7, %v536_v43  ;;  %v4126_v7 = vrot.slane %v10423_v63, %v15050_v5  ;;  %v4134_v27 = vrot.slane %v10423_v63, %v15052_v13 }
 0x302   :  { %v1987_v9 = vmax.f32 %v11003_v33, 0.0  ;;  %v1333_v36 = vpop.f32.mrb[0].mxu0  ;;  %v4130_v33 = vrot.slane %v10423_v63, %v15049_v15 }
 0x303   :  { %v1988_v21 = vmax.f32 %v11004_v6, 0.0  ;;  %v11001_v49 = vadd.f32 %v1333_v36, %v536_v43  ;;  %v1335_v37 = vpop.f32.mrb[1].mxu0  ;;  %v4138_v6 = vrot.slane %v10423_v63, %v15051_v8 }
 0x304   :  { %v11002_v29 = vadd.f32 %v1335_v37, %v536_v43  ;;  %v2467_v32 = vand.u32 4294901760, %v1987_v9  ;;  %v4097_v43 = vrot.slane %v10422_v48, %v15051_v8 }
 0x305   :  { %v2465_v52 = vand.u32 4294901760, %v1988_v21  ;;  %v1985_v61 = vmax.f32 %v11001_v49, 0.0 }
 0x306   :  { %v1986_v26 = vmax.f32 %v11002_v29, 0.0  ;;  %v2550_v34 = vsub.f32 %v1987_v9, %v2467_v32  ;;  %v10424_v9 = vld [vmem:[%s14655_s2 + $0x20] ss:$8 sm:$0xf] }
 0x307   :  { %v2544_v45 = vsub.f32 %v1988_v21, %v2465_v52  ;;  %v2002_v53 = vand.u32 4294901760, %v1985_v61  ;;  %2466 = vmatprep.subr.mxu1 %v2465_v52  ;;  %v4171_v36 = vrot.slane %v10424_v9, %v15049_v15  ;;  %v4167_v21 = vrot.slane %v10424_v9, %v15050_v5  ;;  %v3878_v29 = vld [vmem:[%s14655_s2] ss:$8 sm:$0xf]  ;;  %s11240_s2 = smov 124  }
 0x308   :  { %v2000_v47 = vand.u32 4294901760, %v1986_v26  ;;  %2468 = vmatpush1.msra.mxu1 %v2467_v32  ;;  %v2551_v30 = vand.u32 4294901760, %v2550_v34  ;;  %v4179_v49 = vrot.slane %v10424_v9, %v15051_v8  ;;  %v4175_v37 = vrot.slane %v10424_v9, %v15052_v13 }
 0x309   :  { %v2085_v44 = vsub.f32 %v1985_v61, %v2002_v53  ;;  %2537 = vmatmul.mubr.f32.vlgmr.msra.gmra.mrb[2].mxu1 %v2071_v39  ;;  %v2545_v31 = vand.u32 4294901760, %v2544_v45  ;;  %v2934_v61 = vld [vmem:[%s14656_s7] sm:$0xff]  ;;  %s11241_s7 = smov 92  }
 0x30a   :  { %v2079_v38 = vsub.f32 %v1986_v26, %v2000_v47  ;;  %2001 = vmatprep.subr.mxu0 %v2000_v47  ;;  %v2552_v54 = vsub.f32 %v2550_v34, %v2551_v30  ;;  %2617 = vmatprep.mubr.f32.mxu1 %v14989_v3  ;;  %v3891_v26 = vrot.slane %v3878_v29, %v15052_v13 }
 0x30b   :  { %v2086_v60 = vand.u32 4294901760, %v2085_v44  ;;  %2003 = vmatpush1.msra.mxu0 %v2002_v53  ;;  %v2546_v41 = vsub.f32 %v2544_v45, %v2545_v31 }
 0x30c   :  { %2072 = vmatmul.mubr.f32.vlgmr.msra.gmra.mrb[2].mxu0 %v2071_v39  ;;  %v2080_v12 = vand.u32 4294901760, %v2079_v38  ;;  %v2553_v50 = vand.u32 4294901760, %v2552_v54  ;;  %v3895_v39 = vrot.slane %v3878_v29, %v15051_v8 }
 0x30d   :  { %v2087_v18 = vsub.f32 %v2085_v44, %v2086_v60  ;;  %v2547_v42 = vand.u32 4294901760, %v2546_v41  ;;  %2152 = vmatprep.mubr.f32.mxu0 %v14989_v3 }
 0x30e   :  { %v2081_v59 = vsub.f32 %v2079_v38, %v2080_v12 }
 0x30f   :  { %2548 = vmatprep.subr.mxu1 %v2547_v42  ;;  %v2088_v56 = vand.u32 4294901760, %v2087_v18 }
 0x310   :  { %2554 = vmatpush1.msra.mxu1 %v2553_v50  ;;  %v2082_v58 = vand.u32 4294901760, %v2081_v59 }
 0x311   :  { %2619 = vmatmul.mubr.f32.vlgmr.msra.gmra.mrb[2].mxu1 %v12289_v40  ;;  %2627 = vmatprep.subr.mxu1 %v2544_v45 }
 0x312   :  { %2083 = vmatprep.subr.mxu0 %v2082_v58  ;;  %2630 = vmatpush1.msra.mxu1 %v2550_v34  ;;  %v2942_v34 = vsel %vm1996_vm14, %v2934_v61, 0 }
 0x313   :  { %2089 = vmatpush1.msra.mxu0 %v2088_v56  ;;  %2703 = vmatprep.subr.mxu1 %v2465_v52  ;;  %v12391_v45 = vand.u32 4294901760, %v2942_v34 }
 0x314   :  { %2154 = vmatmul.mubr.f32.vlgmr.msra.gmra.mrb[2].mxu0 %v12289_v40  ;;  %2162 = vmatprep.subr.mxu0 %v2079_v38 }
 0x315   :  { %2165 = vmatpush1.msra.mxu0 %v2085_v44  ;;  %2693 = vmatprep.mubr.f32.mxu1 %v14989_v3 }
 0x316   :  { %2238 = vmatprep.subr.mxu0 %v2000_v47  ;;  %2228 = vmatprep.mubr.f32.mxu0 %v14989_v3 }
 0x319   :  { %2696 = vmatmul.mubr.f32.vlgmr.msra.gmra.mrb[2].mxu1 %v2068_v46 }
 0x31a   :  { %2705 = vmatpush1.msra.mxu1 %v2467_v32  ;;  %2768 = vmatprep.mubr.f32.mxu1 %v14989_v3 }
 0x31b   :  { %2781 = vmatprep.subr.mxu1 %v2545_v31 }
 0x31c   :  { %2231 = vmatmul.mubr.f32.vlgmr.msra.gmra.mrb[2].mxu0 %v2068_v46  ;;  %v4085_v46 = vrot.slane %v10422_v48, %v15050_v5 }
 0x31d   :  { %2240 = vmatpush1.msra.mxu0 %v2002_v53  ;;  %2303 = vmatprep.mubr.f32.mxu0 %v14989_v3 }
 0x31e   :  { %2316 = vmatprep.subr.mxu0 %v2080_v12  ;;  %4098 = vrot.lane.b32.xlu1 %v4085_v46, %s11237_s4  ;;  %v12428_v46 = vpop.permute.xlu1 %3940 }
 0x321   :  { %2772 = vmatmul.mubr.f32.vlgmr.msra.gmra.mrb[2].mxu1 %v12292_v24 }
 0x322   :  { %2785 = vmatpush1.msra.mxu1 %v2551_v30  ;;  %2848 = vmatprep.mubr.f32.mxu1 %v14989_v3 }
 0x323   :  { %2857 = vmatprep.subr.mxu1 %v2465_v52  ;;  %v3883_v52 = vrot.slane %v3878_v29, %v15050_v5 }
 0x324   :  { %2307 = vmatmul.mubr.f32.vlgmr.msra.gmra.mrb[2].mxu0 %v12292_v24  ;;  %v4093_v24 = vrot.slane %v10422_v48, %v15052_v13 }
 0x325   :  { %2320 = vmatpush1.msra.mxu0 %v2086_v60  ;;  %2383 = vmatprep.mubr.f32.mxu0 %v14989_v3 }
 0x326   :  { %2392 = vmatprep.subr.mxu0 %v2000_v47  ;;  %4102 = vrot.lane.b32.xlu1 %v4093_v24, %s11237_s4  ;;  %v1994_v47 = vpop.permute.xlu0 %1993  ;;  %v12434_v24 = vpop.permute.xlu1 %3976 }
 0x327   :  { %v3993_v63 = vmul.f32 0.0, %v12434_v24 }
 0x329   :  { %2850 = vmatmul.mubr.f32.vlgmr.msra.gmra.mrb[2].mxu1 %v12289_v40 }
 0x32a   :  { %2859 = vmatpush1.msra.mxu1 %v2467_v32  ;;  %2922 = vmatprep.mubr.f32.mxu1 %v14989_v3  ;;  %v3887_v32 = vrot.slane %v3878_v29, %v15049_v15  ;;  %v12419_v51 = vpop.permute.xlu0 %3938 }
 0x32b   :  { %4139 = vrot.lane.b32.xlu1 %v4126_v7, %s11238_s5  ;;  %v12443_v7 = vpop.permute.xlu1 %3980 }
 0x32c   :  { %2385 = vmatmul.mubr.f32.vlgmr.msra.gmra.mrb[2].mxu0 %v12289_v40 }
 0x32d   :  { %2394 = vmatpush1.msra.mxu0 %v2002_v53  ;;  %2457 = vmatprep.mubr.f32.mxu0 %v14989_v3  ;;  %v3012_v53 = vsub.f32 %v2942_v34, %v12391_v45 }
 0x32f   :  { %4143 = vrot.lane.b32.xlu1 %v4134_v27, %s11238_s5  ;;  %v12394_v30 = vand.u32 4294901760, %v3012_v53  ;;  %v12447_v27 = vpop.permute.xlu1 %4017 }
 0x330   :  { %v4033_v9 = vmul.f32 0.0, %v12447_v27 }
 0x331   :  { %2924 = vmatmul.mubr.f32.vlgmr.msra.gmra.mrb[2].mxu1 %v12289_v40  ;;  %v3014_v60 = vsub.f32 %v3012_v53, %v12394_v30 }
 0x332   :  { %3475 = vmatprep.mubr.f32.mxu1 %v14989_v3 }
 0x333   :  { %4180 = vrot.lane.b32.xlu1 %v4167_v21, %s11239_s21  ;;  %v12464_v61 = vpop.permute.xlu1 %4021 }
 0x334   :  { %2459 = vmatmul.mubr.f32.vlgmr.msra.gmra.mrb[2].mxu0 %v12289_v40  ;;  %v4089_v40 = vrot.slane %v10422_v48, %v15049_v15  ;;  %v3015_v15 = vand.u32 4294901760, %v3014_v60  ;;  %v3952_v48 = vmul.f32 0.0, %v12421_v22 }
 0x335   :  { %3010 = vmatprep.mubr.f32.mxu0 %v14989_v3 }
 0x336   :  { %4100 = vrot.lane.b32.xlu0 %v4089_v40, %s11237_s4  ;;  %v12426_v40 = vpop.permute.xlu0 %3942 }
 0x337   :  { %4184 = vrot.lane.b32.xlu1 %v4175_v37, %s11239_s21  ;;  %15053 = vst [vmem:[#allocation7_spill] sm:$0xff] %v12426_v40 }
 0x33a   :  { %4104 = vrot.lane.b32.xlu0 %v4097_v43, %s11237_s4  ;;  %v12432_v43 = vpop.permute.xlu0 %3978 }
 0x33b   :  { %3896 = vrot.lane.b32.xlu1 %v3883_v52, %s11232_s27 }
 0x33e   :  { %4141 = vrot.lane.b32.xlu0 %v4130_v33, %s11238_s5  ;;  %v12441_v33 = vpop.permute.xlu0 %3982 }
 0x33f   :  { %3900 = vrot.lane.b32.xlu1 %v3891_v26, %s11232_s27  ;;  %15054 = vst [vmem:[#allocation13_spill] sm:$0xff] %v12441_v33 }
 0x342   :  { %4145 = vrot.lane.b32.xlu0 %v4138_v6, %s11238_s5  ;;  %v12445_v6 = vpop.permute.xlu0 %4019 }
 0x343   :  { %4207 = vrot.lane.b32.xlu1 %v3952_v48, %s11228_s1 }
 0x346   :  { %4182 = vrot.lane.b32.xlu0 %v4171_v36, %s11239_s21  ;;  %v12451_v36 = vpop.permute.xlu0 %4023 }
 0x347   :  { %4246 = vrot.lane.b32.xlu1 %v4033_v9, %s11230_s3  ;;  %15055 = vst [vmem:[#allocation6_spill] sm:$0xff] %v12451_v36 }
 0x34a   :  { %4186 = vrot.lane.b32.xlu0 %v4179_v49, %s11239_s21  ;;  %v12453_v21 = vpop.permute.xlu0 %4059 }
 0x34e   :  { %3898 = vrot.lane.b32.xlu0 %v3887_v32, %s11232_s27  ;;  %v12455_v49 = vpop.permute.xlu0 %4063 }
 0x34f   :  { %v4078_v37 = vmul.f32 0.0, %v12455_v49 }
 0x352   :  { %3902 = vrot.lane.b32.xlu0 %v3895_v39, %s11232_s27  ;;  %v12467_v39 = vpop.permute.xlu1 %4057 }
 0x353   :  { %15056 = vst [vmem:[#allocation8_spill] sm:$0xff] %v12467_v39 }
 0x356   :  { %4226 = vrot.lane.b32.xlu0 %v3993_v63, %s11240_s2  ;;  %v12469_v26 = vpop.permute.xlu1 %4061 }
 0x357   :  { %v12586_v63 = vsel %vm4065_vm1, %v12453_v21, %v12469_v26 }
 0x358   :  { %15071 = vst [vmem:[#allocation5_spill] sm:$0xff] %v12586_v63 }
 0x35a   :  { %4288 = vrot.lane.b32.xlu0 %v4078_v37, %s11241_s7 }
 0x390   :  { %v12471_v34 = vpop.permute.xlu1 %4098 }
 0x391   :  { %15057 = vst [vmem:[#allocation11_spill] sm:$0xff] %v12471_v34 }
 0x3a8   :  { %v12459_v29 = vpop.permute.xlu0 %4100 }
 0x3ac   :  { %v12461_v32 = vpop.permute.xlu0 %4104 }
 0x3ad   :  { %v4119_v52 = vmul.f32 0.0, %v12461_v32 }
 0x3af   :  { %4308 = vrot.lane.b32.xlu1 %v4119_v52, %s11242_s0  ;;  %v12603_v52 = vsel %vm3984_vm15, %v12432_v43, %v12443_v7 }
 0x3b0   :  { %15073 = vst [vmem:[#allocation4_spill] sm:$0xff] %v12603_v52 }
 0x404   :  { %v2925_v44 = vpop.f32.mrb[2].mxu1 }
 0x405   :  { %v11007_v31 = vadd.f32 %v2925_v44, %v1994_v47  ;;  %v2927_v38 = vpop.f32.mrb[3].mxu1 }
 0x406   :  { %v11008_v54 = vadd.f32 %v2927_v38, %v1994_v47 }
 0x407   :  { %v2932_v41 = vmax.f32 %v11007_v31, 0.0  ;;  %v2460_v12 = vpop.f32.mrb[2].mxu0 }
 0x408   :  { %v2933_v18 = vmax.f32 %v11008_v54, 0.0  ;;  %v11005_v42 = vadd.f32 %v2460_v12, %v1994_v47  ;;  %v2462_v50 = vpop.f32.mrb[3].mxu0 }
 0x409   :  { %v12397_v59 = vand.u32 4294901760, %v2932_v41  ;;  %v11006_v58 = vadd.f32 %v2462_v50, %v1994_v47  ;;  %v12477_v47 = vpop.permute.xlu0 %4141 }
 0x40a   :  { %v3409_v56 = vand.u32 4294901760, %v2933_v18  ;;  %v2930_v19 = vmax.f32 %v11005_v42, 0.0 }
 0x40b   :  { %v3494_v17 = vsub.f32 %v2932_v41, %v12397_v59  ;;  %v2931_v5 = vmax.f32 %v11006_v58, 0.0 }
 0x40c   :  { %v3488_v1 = vsub.f32 %v2933_v18, %v3409_v56  ;;  %v2946_v8 = vand.u32 4294901760, %v2930_v19  ;;  %3410 = vmatprep.subr.mxu1 %v3409_v56 }
 0x40d   :  { %v3495_v57 = vand.u32 4294901760, %v3494_v17  ;;  %v2944_v13 = vand.u32 4294901760, %v2931_v5  ;;  %3412 = vmatpush1.msra.mxu1 %v12397_v59  ;;  %v12481_v44 = vpop.permute.xlu0 %4145 }
 0x40e   :  { %v3029_v4 = vsub.f32 %v2930_v19, %v2946_v8  ;;  %3481 = vmatmul.mubr.f32.vlgmr.msra.gmra.mrb[4].mxu1 %v3015_v15  ;;  %v3489_v16 = vand.u32 4294901760, %v3488_v1  ;;  %v4160_v60 = vmul.f32 0.0, %v12481_v44 }
 0x40f   :  { %v3496_v2 = vsub.f32 %v3494_v17, %v3495_v57  ;;  %v3023_v23 = vsub.f32 %v2931_v5, %v2944_v13  ;;  %2945 = vmatprep.subr.mxu0 %v2944_v13  ;;  %3561 = vmatprep.mubr.f32.mxu1 %v14989_v3 }
 0x410   :  { %v3030_v10 = vand.u32 4294901760, %v3029_v4  ;;  %2947 = vmatpush1.msra.mxu0 %v2946_v8  ;;  %v3490_v35 = vsub.f32 %v3488_v1, %v3489_v16  ;;  %4327 = vrot.lane.b32.xlu0 %v4160_v60, %s11243_s22 }
 0x411   :  { %3016 = vmatmul.mubr.f32.vlgmr.msra.gmra.mrb[4].mxu0 %v3015_v15  ;;  %v3024_v62 = vand.u32 4294901760, %v3023_v23  ;;  %v3497_v20 = vand.u32 4294901760, %v3496_v2  ;;  %v12485_v38 = vpop.permute.xlu0 %4182 }
 0x412   :  { %v3031_v25 = vsub.f32 %v3029_v4, %v3030_v10  ;;  %v3491_v14 = vand.u32 4294901760, %v3490_v35  ;;  %3096 = vmatprep.mubr.f32.mxu0 %v14989_v3  ;;  %v12543_v35 = vsel %vm486_vm10, %v12428_v46, %v12426_v40 }
 0x413   :  { %v3025_v28 = vsub.f32 %v3023_v23, %v3024_v62  ;;  %15067 = vst [vmem:[#allocation20_spill] sm:$0xff] %v12543_v35 }
 0x414   :  { %3492 = vmatprep.subr.mxu1 %v3491_v14  ;;  %v3032_v55 = vand.u32 4294901760, %v3031_v25  ;;  %v12553_v14 = vsel %vm427_vm8, %v12447_v27, %v12445_v6 }
 0x415   :  { %3498 = vmatpush1.msra.mxu1 %v3497_v20  ;;  %v3026_v11 = vand.u32 4294901760, %v3025_v28  ;;  %v12490_v41 = vpop.permute.xlu0 %4186  ;;  %15068 = vst [vmem:[#allocation22_spill] sm:$0xff] %v12553_v14 }
 0x416   :  { %3563 = vmatmul.mubr.f32.vlgmr.msra.gmra.mrb[4].mxu1 %v12391_v45  ;;  %3571 = vmatprep.subr.mxu1 %v3488_v1  ;;  %v4201_v18 = vmul.f32 0.0, %v12490_v41 }
 0x417   :  { %3027 = vmatprep.subr.mxu0 %v3026_v11  ;;  %3574 = vmatpush1.msra.mxu1 %v3494_v17  ;;  %v12564_v11 = vsel %vm427_vm8, %v12464_v61, %v12451_v36 }
 0x418   :  { %3033 = vmatpush1.msra.mxu0 %v3032_v55  ;;  %3647 = vmatprep.subr.mxu1 %v3409_v56  ;;  %15069 = vst [vmem:[#allocation23_spill] sm:$0xff] %v12564_v11 }
 0x419   :  { %3098 = vmatmul.mubr.f32.vlgmr.msra.gmra.mrb[4].mxu0 %v12391_v45  ;;  %3106 = vmatprep.subr.mxu0 %v3023_v23  ;;  %v3899_v60 = vpop.permute.xlu0 %3898 }
 0x41a   :  { %3109 = vmatpush1.msra.mxu0 %v3029_v4  ;;  %3637 = vmatprep.mubr.f32.mxu1 %v14989_v3  ;;  %v12520_v4 = vsel %vm3984_vm15, %v12434_v24, %v12432_v43 }
 0x41b   :  { %3182 = vmatprep.subr.mxu0 %v2944_v13  ;;  %3172 = vmatprep.mubr.f32.mxu0 %v14989_v3  ;;  %15064 = vst [vmem:[#allocation19_spill] sm:$0xff] %v12520_v4 }
 0x41c   :  { %4347 = vrot.lane.b32.xlu1 %v4201_v18, %s11244_s23 }
 0x41e   :  { %3640 = vmatmul.mubr.f32.vlgmr.msra.gmra.mrb[4].mxu1 %v3012_v53 }
 0x41f   :  { %3649 = vmatpush1.msra.mxu1 %v12397_v59  ;;  %3712 = vmatprep.mubr.f32.mxu1 %v14989_v3 }
 0x420   :  { %3725 = vmatprep.subr.mxu1 %v3489_v16  ;;  %v12527_v16 = vsel %vm486_vm10, %v12421_v22, %v12419_v51 }
 0x421   :  { %3175 = vmatmul.mubr.f32.vlgmr.msra.gmra.mrb[4].mxu0 %v3012_v53  ;;  %15065 = vst [vmem:[#allocation21_spill] sm:$0xff] %v12527_v16 }
 0x422   :  { %3184 = vmatpush1.msra.mxu0 %v2946_v8  ;;  %3247 = vmatprep.mubr.f32.mxu0 %v14989_v3 }
 0x423   :  { %3260 = vmatprep.subr.mxu0 %v3024_v62 }
 0x426   :  { %3716 = vmatmul.mubr.f32.vlgmr.msra.gmra.mrb[4].mxu1 %v12394_v30 }
 0x427   :  { %3729 = vmatpush1.msra.mxu1 %v3495_v57  ;;  %3792 = vmatprep.mubr.f32.mxu1 %v14989_v3 }
 0x428   :  { %3801 = vmatprep.subr.mxu1 %v3409_v56 }
 0x429   :  { %3251 = vmatmul.mubr.f32.vlgmr.msra.gmra.mrb[4].mxu0 %v12394_v30 }
 0x42a   :  { %3264 = vmatpush1.msra.mxu0 %v3030_v10  ;;  %3327 = vmatprep.mubr.f32.mxu0 %v14989_v3  ;;  %v12537_v10 = vsel %vm3984_vm15, %v12443_v7, %v12441_v33 }
 0x42b   :  { %3336 = vmatprep.subr.mxu0 %v2944_v13  ;;  %15066 = vst [vmem:[#allocation17_spill] sm:$0xff] %v12537_v10 }
 0x42e   :  { %3794 = vmatmul.mubr.f32.vlgmr.msra.gmra.mrb[4].mxu1 %v12391_v45 }
 0x42f   :  { %3803 = vmatpush1.msra.mxu1 %v12397_v59  ;;  %3866 = vmatprep.mubr.f32.mxu1 %v14989_v3 }
 0x431   :  { %3329 = vmatmul.mubr.f32.vlgmr.msra.gmra.mrb[4].mxu0 %v12391_v45 }
 0x432   :  { %3338 = vmatpush1.msra.mxu0 %v2946_v8  ;;  %3401 = vmatprep.mubr.f32.mxu0 %v14989_v3 }
 0x436   :  { %3868 = vmatmul.mubr.f32.vlgmr.msra.gmra.mrb[4].mxu1 %v12391_v45 }
 0x437   :  { %5287 = vmatprep.mubr.f32.mxu1 %v14989_v3 }
 0x439   :  { %3403 = vmatmul.mubr.f32.vlgmr.msra.gmra.mrb[4].mxu0 %v12391_v45  ;;  %v12473_v45 = vpop.permute.xlu1 %4102 }
 0x43a   :  { %4614 = vmatprep.mubr.f32.mxu0 %v14989_v3  ;;  %v12570_v55 = vsel %vm4106_vm0, %v12459_v29, %v12473_v45 }
 0x43b   :  { %15070 = vst [vmem:[#allocation15_spill] sm:$0xff] %v12570_v55 }
 0x43d   :  { %v12475_v53 = vpop.permute.xlu1 %4139 }
 0x43e   :  { %15058 = vst [vmem:[#allocation9_spill] sm:$0xff] %v12475_v53 }
 0x441   :  { %v12479_v30 = vpop.permute.xlu1 %4143 }
 0x445   :  { %v12483_v31 = vpop.permute.xlu1 %4180 }
 0x446   :  { %15059 = vst [vmem:[#allocation10_spill] sm:$0xff] %v12483_v31 }
 0x449   :  { %v12487_v54 = vpop.permute.xlu1 %4184 }
 0x44a   :  { %v12592_v27 = vsel %vm4188_vm2, %v12485_v38, %v12487_v54 }
 0x44b   :  { %15072 = vst [vmem:[#allocation3_spill] sm:$0xff] %v12592_v27 }
 0x44d   :  { %v12492_v12 = vpop.permute.xlu1 %3896 }
 0x44e   :  { %v3912_v42 = vmul.f32 0.0, %v12492_v12 }
 0x450   :  { %4366 = vrot.lane.b32.xlu0 %v3912_v42, %s11239_s21 }
 0x509   :  { %v3869_v50 = vpop.f32.mrb[4].mxu1 }
 0x50a   :  { %v3871_v59 = vpop.f32.mrb[5].mxu1  ;;  %v11011_v17 = vadd.f32 %v3869_v50, %v12414_v0  ;;  %v12613_v50 = vsel %vm4147_vm3, %v12477_v47, %v12479_v30 }
 0x50b   :  { %v11012_v1 = vadd.f32 %v3871_v59, %v12414_v0  ;;  %15074 = vst [vmem:[#allocation2_spill] sm:$0xff] %v12613_v50  ;;  %v12620_v59 = vpop.permute.xlu0 %3902 }
 0x50c   :  { %v3404_v58 = vpop.f32.mrb[4].mxu0  ;;  %v12511_v57 = vmax.f32 %v11011_v17, 0.0  ;;  %15075 = vst [vmem:[#allocation24_spill] sm:$0xff] %v12620_v59 }
 0x50d   :  { %v11009_v56 = vadd.f32 %v3404_v58, %v12414_v0  ;;  %v3406_v19 = vpop.f32.mrb[5].mxu0  ;;  %v12513_v13 = vmax.f32 %v11012_v1, 0.0  ;;  %v3901_v58 = vpop.permute.xlu1 %3900 }
 0x50e   :  { %v11010_v15 = vadd.f32 %v3406_v19, %v12414_v0  ;;  %15062 = vst [vmem:[#allocation14_spill] sm:$0xff] %v12511_v57  ;;  %v3996_v62 = vmul.f32 %v12537_v10, %v12511_v57  ;;  %v3955_v25 = vmul.f32 %v12543_v35, %v12511_v57  ;;  %v4036_v0 = vmul.f32 %v12564_v11, %v12511_v57 }
 0x50f   :  { %v12502_v5 = vmax.f32 %v11009_v56, 0.0  ;;  %15063 = vst [vmem:[#allocation16_spill] sm:$0xff] %v12513_v13  ;;  %v4117_v22 = vmul.f32 %v12570_v55, %v12511_v57  ;;  %v4076_v9 = vmul.f32 %v12586_v63, %v12511_v57  ;;  %v4199_v37 = vmul.f32 %v12592_v27, %v12511_v57 }
 0x510   :  { %v12505_v8 = vmax.f32 %v11010_v15, 0.0  ;;  %v4158_v43 = vmul.f32 %v12613_v50, %v12511_v57  ;;  %v3997_v7 = vmul.f32 %v12441_v33, %v12513_v13  ;;  %v12625_v56 = vsel %vm526_vm12, %v12492_v12, %v3899_v60 }
 0x511   :  { %15060 = vst [vmem:[#allocation12_spill] sm:$0xff] %v12502_v5  ;;  %4264 = vrot.lane.b32.xlu0 %v12502_v5, %s11232_s27  ;;  %v3994_v2 = vmul.f32 %v12520_v4, %v12502_v5  ;;  %v3953_v23 = vmul.f32 %v12527_v16, %v12502_v5  ;;  %v4034_v20 = vmul.f32 %v12553_v14, %v12502_v5  ;;  %15076 = vst [vmem:[#allocation25_spill] sm:$0xff] %v12625_v56 }
 0x512   :  { %15061 = vst [vmem:[#allocation18_spill] sm:$0xff] %v12505_v8  ;;  %4266 = vrot.lane.b32.xlu1 %v12505_v8, %s11232_s27  ;;  %v4115_v28 = vmul.f32 %v12471_v34, %v12502_v5  ;;  %v4074_v48 = vmul.f32 %v12467_v39, %v12502_v5  ;;  %v4197_v24 = vmul.f32 %v12483_v31, %v12502_v5 }
 0x513   :  { %v4156_v18 = vmul.f32 %v12475_v53, %v12502_v5  ;;  %v3995_v42 = vmul.f32 %v12603_v52, %v12505_v8  ;;  %v12631_v19 = vsel %vm427_vm8, %v12445_v6, %v12464_v61  ;;  %v3913_v15 = vmul.f32 %v12625_v56, %v12502_v5 }
 0x514   :  { %15077 = vst [vmem:[#allocation26_spill] sm:$0xff] %v12631_v19  ;;  %v12637_v17 = vsel %vm526_vm12, %v3901_v58, %v12620_v59  ;;  %v4035_v1 = vmul.f32 %v12631_v19, %v12505_v8  ;;  %v4037_v6 = vmul.f32 %v12451_v36, %v12513_v13  ;;  %v12651_v61 = vsel %vm486_vm10, %v12419_v51, %v12428_v46 }
 0x515   :  { %4268 = vrot.lane.b32.xlu0 %v12511_v57, %s11232_s27  ;;  %15078 = vst [vmem:[#allocation27_spill] sm:$0xff] %v12637_v17  ;;  %v3915_v12 = vmul.f32 %v12637_v17, %v12511_v57  ;;  %15079 = vst [vmem:[#allocation28_spill] sm:$0xff] %v12651_v61  ;;  %v12668_v51 = vsel %vm4065_vm1, %v12469_v26, %v12455_v49  ;;  %v3956_v46 = vmul.f32 %v12426_v40, %v12513_v13 }
 0x516   :  { %4270 = vrot.lane.b32.xlu1 %v12513_v13, %s11232_s27  ;;  %15081 = vst [vmem:[#allocation30_spill] sm:$0xff] %v12668_v51  ;;  %v12684_v49 = vsel %vm4147_vm3, %v12475_v53, %v12477_v47  ;;  %v12700_v47 = vsel %vm4147_vm3, %v12479_v30, %v12481_v44  ;;  %v12724_v44 = vsel %vm4188_vm2, %v12487_v54, %v12490_v41 }
 0x517   :  { %15083 = vst [vmem:[#allocation32_spill] sm:$0xff] %v12684_v49  ;;  %15085 = vst [vmem:[#allocation34_spill] sm:$0xff] %v12700_v47 }
 0x518   :  { %15088 = vst [vmem:[#allocation37_spill] sm:$0xff] %v12724_v44 }
 0x519   :  { %4228 = vrot.lane.b32.xlu0 %v3994_v2, %s11240_s2  ;;  %v12657_v2 = vsel %vm4065_vm1, %v12467_v39, %v12453_v21  ;;  %v4077_v21 = vmul.f32 %v12668_v51, %v12513_v13 }
 0x51a   :  { %4209 = vrot.lane.b32.xlu1 %v3953_v23, %s11228_s1  ;;  %15080 = vst [vmem:[#allocation29_spill] sm:$0xff] %v12657_v2  ;;  %v3954_v23 = vmul.f32 %v12651_v61, %v12505_v8 }
 0x51d   :  { %4232 = vrot.lane.b32.xlu0 %v3996_v62, %s11240_s2  ;;  %v4075_v62 = vmul.f32 %v12657_v2, %v12505_v8 }
 0x51e   :  { %4213 = vrot.lane.b32.xlu1 %v3955_v25, %s11228_s1  ;;  %v12678_v25 = vsel %vm4106_vm0, %v12471_v34, %v12459_v29  ;;  %v12694_v29 = vsel %vm4106_vm0, %v12473_v45, %v12461_v32  ;;  %v12713_v32 = vsel %vm4188_vm2, %v12483_v31, %v12485_v38  ;;  %v4200_v38 = vmul.f32 %v12724_v44, %v12513_v13 }
 0x51f   :  { %15082 = vst [vmem:[#allocation31_spill] sm:$0xff] %v12678_v25  ;;  %v4116_v26 = vmul.f32 %v12678_v25, %v12505_v8  ;;  %15084 = vst [vmem:[#allocation33_spill] sm:$0xff] %v12694_v29  ;;  %v4198_v45 = vmul.f32 %v12713_v32, %v12505_v8 }
 0x520   :  { %15087 = vst [vmem:[#allocation36_spill] sm:$0xff] %v12713_v32 }
 0x521   :  { %4248 = vrot.lane.b32.xlu0 %v4034_v20, %s11230_s3  ;;  %v4157_v20 = vmul.f32 %v12684_v49, %v12505_v8 }
 0x522   :  { %4300 = vrot.lane.b32.xlu1 %v4115_v28, %s11242_s0  ;;  %v4118_v28 = vmul.f32 %v12694_v29, %v12513_v13 }
 0x525   :  { %4252 = vrot.lane.b32.xlu0 %v4036_v0, %s11230_s3  ;;  %v4159_v0 = vmul.f32 %v12700_v47, %v12513_v13 }
 0x526   :  { %4304 = vrot.lane.b32.xlu1 %v4117_v22, %s11242_s0  ;;  %v12707_v22 = vsel %vm526_vm12, %v3899_v60, %v3901_v58 }
 0x527   :  { %15086 = vst [vmem:[#allocation35_spill] sm:$0xff] %v12707_v22  ;;  %v3914_v30 = vmul.f32 %v12707_v22, %v12505_v8 }
 0x529   :  { %4280 = vrot.lane.b32.xlu0 %v4074_v48, %s11241_s7  ;;  %v3916_v48 = vmul.f32 %v12620_v59, %v12513_v13 }
 0x52a   :  { %4339 = vrot.lane.b32.xlu1 %v4197_v24, %s11244_s23  ;;  %v12733_v24 = vpop.permute.xlu0 %4226 }
 0x52b   :  { %15089 = vst [vmem:[#allocation38_spill] sm:$0xff] %v12733_v24 }
 0x52d   :  { %4284 = vrot.lane.b32.xlu0 %v4076_v9, %s11241_s7  ;;  %v12735_v9 = vpop.permute.xlu1 %4207 }
 0x52e   :  { %4343 = vrot.lane.b32.xlu1 %v4199_v37, %s11244_s23  ;;  %15090 = vst [vmem:[#allocation39_spill] sm:$0xff] %v12735_v9  ;;  %v12737_v37 = vpop.permute.xlu0 %4288 }
 0x52f   :  { %15091 = vst [vmem:[#allocation40_spill] sm:$0xff] %v12737_v37 }
 0x531   :  { %4319 = vrot.lane.b32.xlu0 %v4156_v18, %s11243_s22  ;;  %v12739_v54 = vpop.permute.xlu1 %4246 }
 0x532   :  { %4230 = vrot.lane.b32.xlu1 %v3995_v42, %s11240_s2  ;;  %15092 = vst [vmem:[#allocation41_spill] sm:$0xff] %v12739_v54  ;;  %v12741_v41 = vpop.permute.xlu0 %4327 }
 0x533   :  { %15093 = vst [vmem:[#allocation42_spill] sm:$0xff] %v12741_v41 }
 0x535   :  { %4323 = vrot.lane.b32.xlu0 %v4158_v43, %s11243_s22  ;;  %v12743_v60 = vpop.permute.xlu1 %4308 }
 0x536   :  { %4234 = vrot.lane.b32.xlu1 %v3997_v7, %s11240_s2  ;;  %15094 = vst [vmem:[#allocation43_spill] sm:$0xff] %v12743_v60  ;;  %v12745_v18 = vpop.permute.xlu0 %4366 }
 0x537   :  { %15095 = vst [vmem:[#allocation44_spill] sm:$0xff] %v12745_v18 }
 0x539   :  { %4368 = vrot.lane.b32.xlu0 %v3913_v15, %s11239_s21  ;;  %v12747_v42 = vpop.permute.xlu1 %4347 }
 0x53a   :  { %4250 = vrot.lane.b32.xlu1 %v4035_v1, %s11230_s3  ;;  %15096 = vst [vmem:[#allocation45_spill] sm:$0xff] %v12747_v42 }
 0x53d   :  { %4372 = vrot.lane.b32.xlu0 %v3915_v12, %s11239_s21 }
 0x53e   :  { %4254 = vrot.lane.b32.xlu1 %v4037_v6, %s11230_s3 }
 0x541   :  { %4211 = vrot.lane.b32.xlu0 %v3954_v23, %s11228_s1 }
 0x542   :  { %4282 = vrot.lane.b32.xlu1 %v4075_v62, %s11241_s7 }
 0x545   :  { %4215 = vrot.lane.b32.xlu0 %v3956_v46, %s11228_s1 }
 0x546   :  { %4286 = vrot.lane.b32.xlu1 %v4077_v21, %s11241_s7 }
 0x549   :  { %4302 = vrot.lane.b32.xlu0 %v4116_v26, %s11242_s0 }
 0x54a   :  { %4321 = vrot.lane.b32.xlu1 %v4157_v20, %s11243_s22 }
 0x54d   :  { %4306 = vrot.lane.b32.xlu0 %v4118_v28, %s11242_s0 }
 0x54e   :  { %4325 = vrot.lane.b32.xlu1 %v4159_v0, %s11243_s22 }
 0x551   :  { %4341 = vrot.lane.b32.xlu0 %v4198_v45, %s11244_s23 }
 0x552   :  { %4370 = vrot.lane.b32.xlu1 %v3914_v30, %s11239_s21 }
 0x555   :  { %4345 = vrot.lane.b32.xlu0 %v4200_v38, %s11244_s23 }
 0x556   :  { %4374 = vrot.lane.b32.xlu1 %v3916_v48, %s11239_s21 }
 0x583   :  { %v4265_v43 = vpop.permute.xlu0 %4264 }
 0x584   :  { %4406 = vrot.lane.b32.xlu0 %v4265_v43, %s11239_s21  ;;  %v4267_v7 = vpop.permute.xlu1 %4266 }
 0x585   :  { %v4272_v15 = vsel %vm526_vm12, %v4265_v43, %v4267_v7 }
 0x587   :  { %v4269_v58 = vpop.permute.xlu0 %4268 }
 0x588   :  { %4408 = vrot.lane.b32.xlu0 %v4272_v15, %s11239_s21  ;;  %v4271_v1 = vpop.permute.xlu1 %4270  ;;  %v4273_v62 = vsel %vm526_vm12, %v4267_v7, %v4269_v58 }
 0x589   :  { %4414 = vrot.lane.b32.xlu1 %v4271_v1, %s11239_s21  ;;  %v4274_v6 = vsel %vm526_vm12, %v4269_v58, %v4271_v1 }
 0x58b   :  { %v4229_v12 = vpop.permute.xlu0 %4228 }
 0x58c   :  { %4412 = vrot.lane.b32.xlu0 %v4274_v6, %s11239_s21  ;;  %v4210_v23 = vpop.permute.xlu1 %4209  ;;  %v4237_v0 = vsel %vm4236_vm4, %v12733_v24, %v4229_v12 }
 0x58d   :  { %4410 = vrot.lane.b32.xlu1 %v4273_v62, %s11239_s21  ;;  %v4217_v56 = vsel %vm427_vm8, %v12735_v9, %v4210_v23 }
 0x58f   :  { %v4233_v46 = vpop.permute.xlu0 %4232 }
 0x590   :  { %v4214_v21 = vpop.permute.xlu1 %4213 }
 0x593   :  { %v4249_v26 = vpop.permute.xlu0 %4248 }
 0x594   :  { %v4301_v20 = vpop.permute.xlu1 %4300 }
 0x595   :  { %4426 = vrot.lane.b32.xlu0 %v4301_v20, %s11239_s21 }
 0x597   :  { %v4253_v28 = vpop.permute.xlu0 %4252 }
 0x598   :  { %v12762_v30 = vpop.permute.xlu1 %4304 }
 0x599   :  { %4386 = vrot.lane.b32.xlu0 %v4237_v0, %s11239_s21 }
 0x59b   :  { %v4281_v45 = vpop.permute.xlu0 %4280 }
 0x59c   :  { %4416 = vrot.lane.b32.xlu1 %v4281_v45, %s11239_s21  ;;  %v12764_v48 = vpop.permute.xlu1 %4339 }
 0x59f   :  { %v4285_v38 = vpop.permute.xlu0 %4284 }
 0x5a0   :  { %v12769_v58 = vpop.permute.xlu1 %4343 }
 0x5a3   :  { %v4320_v43 = vpop.permute.xlu0 %4319 }
 0x5a4   :  { %4436 = vrot.lane.b32.xlu1 %v4320_v43, %s11239_s21  ;;  %v4231_v1 = vpop.permute.xlu1 %4230 }
 0x5a5   :  { %v4238_v44 = vsel %vm4236_vm4, %v4229_v12, %v4231_v1 }
 0x5a7   :  { %v12767_v7 = vpop.permute.xlu0 %4323 }
 0x5a8   :  { %v4235_v24 = vpop.permute.xlu1 %4234 }
 0x5ab   :  { %v12771_v15 = vpop.permute.xlu0 %4368 }
 0x5ac   :  { %v4251_v22 = vpop.permute.xlu1 %4250 }
 0x5af   :  { %v12773_v6 = vpop.permute.xlu0 %4372 }
 0x5b0   :  { %v4255_v27 = vpop.permute.xlu1 %4254 }
 0x5b3   :  { %v4212_v62 = vpop.permute.xlu0 %4211 }
 0x5b4   :  { %v4218_v0 = vsel %vm427_vm8, %v4210_v23, %v4212_v62 }
 0x5b5   :  { %4378 = vrot.lane.b32.xlu0 %v4218_v0, %s11239_s21  ;;  %v4240_v0 = vsel %vm4236_vm4, %v4233_v46, %v4235_v24 }
 0x5b7   :  { %v4216_v59 = vpop.permute.xlu0 %4215 }
 0x5b8   :  { %4384 = vrot.lane.b32.xlu1 %v4216_v59, %s11239_s21  ;;  %v4220_v17 = vsel %vm427_vm8, %v4214_v21, %v4216_v59  ;;  %v4257_v59 = vsel %vm486_vm10, %v4249_v26, %v4251_v22 }
 0x5b9   :  { %4382 = vrot.lane.b32.xlu0 %v4220_v17, %s11239_s21  ;;  %v4283_v17 = vpop.permute.xlu1 %4282 }
 0x5ba   :  { %v4291_v12 = vsel %vm4290_vm5, %v4281_v45, %v4283_v17 }
 0x5bc   :  { %4376 = vrot.lane.b32.xlu1 %v4217_v56, %s11239_s21  ;;  %v4256_v56 = vsel %vm486_vm10, %v12739_v54, %v4249_v26 }
 0x5bd   :  { %4388 = vrot.lane.b32.xlu0 %v4238_v44, %s11239_s21  ;;  %v4259_v44 = vsel %vm486_vm10, %v4253_v28, %v4255_v27  ;;  %v4287_v23 = vpop.permute.xlu1 %4286 }
 0x5be   :  { %v4293_v26 = vsel %vm4290_vm5, %v4285_v38, %v4287_v23 }
 0x5c0   :  { %4394 = vrot.lane.b32.xlu1 %v4235_v24, %s11239_s21  ;;  %v4219_v24 = vsel %vm427_vm8, %v4212_v62, %v4214_v21 }
 0x5c1   :  { %4392 = vrot.lane.b32.xlu0 %v4240_v0, %s11239_s21  ;;  %v4303_v0 = vpop.permute.xlu0 %4302  ;;  %v4322_v45 = vpop.permute.xlu1 %4321 }
 0x5c2   :  { %v4310_v21 = vsel %vm687_vm13, %v4301_v20, %v4303_v0  ;;  %v4330_v20 = vsel %vm4329_vm6, %v4320_v43, %v4322_v45 }
 0x5c4   :  { %4404 = vrot.lane.b32.xlu1 %v4255_v27, %s11239_s21  ;;  %v4258_v27 = vsel %vm486_vm10, %v4251_v22, %v4253_v28  ;;  %v4294_v22 = vsel %vm4290_vm5, %v4287_v23, %v12737_v37 }
 0x5c5   :  { %4398 = vrot.lane.b32.xlu0 %v4257_v59, %s11239_s21  ;;  %v4239_v59 = vsel %vm4236_vm4, %v4231_v1, %v4233_v46  ;;  %v4307_v62 = vpop.permute.xlu0 %4306  ;;  %v4326_v28 = vpop.permute.xlu1 %4325 }
 0x5c6   :  { %v4312_v46 = vsel %vm687_vm13, %v12762_v30, %v4307_v62  ;;  %v4333_v23 = vsel %vm4329_vm6, %v4326_v28, %v12741_v41 }
 0x5c8   :  { %4396 = vrot.lane.b32.xlu1 %v4256_v56, %s11239_s21  ;;  %v4292_v56 = vsel %vm4290_vm5, %v4283_v17, %v4285_v38  ;;  %v4311_v38 = vsel %vm687_vm13, %v4303_v0, %v12762_v30  ;;  %v4332_v17 = vsel %vm4329_vm6, %v12767_v7, %v4326_v28  ;;  %v4331_v30 = vsel %vm4329_vm6, %v4322_v45, %v12767_v7  ;;  %v5883_v0 = vld [vmem:[%s14657_s12] sm:$0xff] }
 0x5c9   :  { %4402 = vrot.lane.b32.xlu0 %v4259_v44, %s11239_s21  ;;  %v4342_v1 = vpop.permute.xlu0 %4341  ;;  %v4313_v44 = vsel %vm687_vm13, %v4307_v62, %v12743_v60 }
 0x5ca   :  { %v4350_v43 = vsel %vm4349_vm7, %v12764_v48, %v4342_v1  ;;  %v4351_v7 = vsel %vm4349_vm7, %v4342_v1, %v12769_v58 }
 0x5cc   :  { %4380 = vrot.lane.b32.xlu1 %v4219_v24, %s11239_s21 }
 0x5cd   :  { %4418 = vrot.lane.b32.xlu0 %v4291_v12, %s11239_s21  ;;  %v4346_v24 = vpop.permute.xlu0 %4345 }
 0x5ce   :  { %v4352_v12 = vsel %vm4349_vm7, %v12769_v58, %v4346_v24 }
 0x5d0   :  { %4390 = vrot.lane.b32.xlu1 %v4239_v59, %s11239_s21  ;;  %v4353_v59 = vsel %vm4349_vm7, %v4346_v24, %v12747_v42  ;;  %v12869_v24 = vsel %vm4188_vm2, %v12745_v18, %v12771_v15 }
 0x5d1   :  { %4422 = vrot.lane.b32.xlu0 %v4293_v26, %s11239_s21  ;;  %v4355_v26 = vld [vmem:[%s14658_s10] sm:$0xff] }
 0x5d4   :  { %4400 = vrot.lane.b32.xlu1 %v4258_v27, %s11239_s21  ;;  %v4371_v27 = vpop.permute.xlu1 %4370 }
 0x5d5   :  { %4428 = vrot.lane.b32.xlu0 %v4310_v21, %s11239_s21 }
 0x5d8   :  { %4420 = vrot.lane.b32.xlu1 %v4292_v56, %s11239_s21  ;;  %v4375_v62 = vpop.permute.xlu1 %4374 }
 0x5d9   :  { %4432 = vrot.lane.b32.xlu0 %v4312_v46, %s11239_s21 }
 0x5dc   :  { %4424 = vrot.lane.b32.xlu1 %v4294_v22, %s11239_s21 }
 0x5dd   :  { %4438 = vrot.lane.b32.xlu0 %v4330_v20, %s11239_s21 }
 0x5e0   :  { %4430 = vrot.lane.b32.xlu1 %v4311_v38, %s11239_s21  ;;  %v4459_v38 = vsel %vm4188_vm2, %v12773_v6, %v4375_v62  ;;  %v14752_v62 = vand.u32 4294901760, %v12869_v24 }
 0x5e1   :  { %4442 = vrot.lane.b32.xlu0 %v4332_v17, %s11239_s21 }
 0x5e4   :  { %4434 = vrot.lane.b32.xlu1 %v4313_v44, %s11239_s21 }
 0x5e5   :  { %4448 = vrot.lane.b32.xlu0 %v4350_v43, %s11239_s21 }
 0x5e8   :  { %4440 = vrot.lane.b32.xlu1 %v4331_v30, %s11239_s21  ;;  %v5205_v30 = vand.u32 4294901760, %v4459_v38 }
 0x5e9   :  { %4452 = vrot.lane.b32.xlu0 %v4352_v12, %s11239_s21 }
 0x5ea   :  { %v12903_v37 = vsub.f32 %v4459_v38, %v5205_v30 }
 0x5ec   :  { %4444 = vrot.lane.b32.xlu1 %v4333_v23, %s11239_s21  ;;  %v12874_v23 = vsel %vm4188_vm2, %v12771_v15, %v4371_v27 }
 0x5ed   :  { %4446 = vrot.lane.b32.xlu0 %v12764_v48, %s11239_s21  ;;  %v4532_v15 = vand.u32 4294901760, %v12874_v23 }
 0x5ef   :  { %v12899_v41 = vsub.f32 %v12874_v23, %v4532_v15 }
 0x5f0   :  { %4450 = vrot.lane.b32.xlu1 %v4351_v7, %s11239_s21 }
 0x5f1   :  { %5886 = vperm.xlu0 %11219, %v5883_v0   ;;  %v4458_v0 = vsel %vm4188_vm2, %v4371_v27, %v12773_v6 }
 0x5f2   :  { %v5207_v18 = vand.u32 4294901760, %v4458_v0 }
 0x5f4   :  { %4454 = vrot.lane.b32.xlu1 %v4353_v59, %s11239_s21  ;;  %v12901_v60 = vsub.f32 %v4458_v0, %v5207_v18 }
 0x5f6   :  { %v4407_v48 = vpop.permute.xlu0 %4406 }
 0x5f8   :  { %4358 = vperm.xlu1 %11218, %v4355_v26  }
 0x5fa   :  { %v4409_v21 = vpop.permute.xlu0 %4408 }
 0x5fb   :  { %v4415_v45 = vpop.permute.xlu1 %4414  ;;  %v12906_v54 = vsel %vm4188_vm2, %v4407_v48, %v4409_v21 }
 0x5fe   :  { %v4413_v56 = vpop.permute.xlu0 %4412 }
 0x5ff   :  { %v4411_v46 = vpop.permute.xlu1 %4410  ;;  %v12921_v48 = vsel %vm4188_vm2, %v4413_v56, %v4415_v45  ;;  %v15100_v45 = vand.u32 4294901760, %v12901_v60 }
 0x600   :  { %v12934_v23 = vsel %vm4188_vm2, %v4411_v46, %v4413_v56  ;;  %v12957_v55 = vsel %vm4188_vm2, %v4409_v21, %v4411_v46  ;;  %v15104_v39 = vand.u32 4294901760, %v12921_v48 }
 0x601   :  { %v12942_v0 = vsub.f32 %v12901_v60, %v15100_v45  ;;  %v15107_v34 = vand.u32 4294901760, %v12934_v23 }
 0x607   :  { %v12853_v58 = vpop.permute.xlu0 %4426 }
 0x60b   :  { %v12857_v20 = vpop.permute.xlu0 %4386 }
 0x60e   :  { %v12855_v22 = vpop.permute.xlu1 %4416 }
 0x616   :  { %v12859_v28 = vpop.permute.xlu1 %4436 }
 0x627   :  { %v4379_v1 = vpop.permute.xlu0 %4378 }
 0x62a   :  { %v4385_v17 = vpop.permute.xlu1 %4384 }
 0x62b   :  { %v4383_v44 = vpop.permute.xlu0 %4382 }
 0x62c   :  { %v12864_v43 = vsel %vm4188_vm2, %v4383_v44, %v4385_v17  ;;  %v4354_v17 = vld [vmem:[%s14659_s9] sm:$0xff] }
 0x62d   :  { %v14744_v12 = vand.u32 4294901760, %v12864_v43  ;;  %v4530_v42 = vsel %vm4528_vm9, %v4354_v17, 0  ;;  %v15118_v10 = vand.u32 4294901760, %v12864_v43 }
 0x62e   :  { %v4377_v7 = vpop.permute.xlu1 %4376  ;;  %v12908_v32 = vand.u32 4294901760, %v4530_v42 }
 0x62f   :  { %v12878_v59 = vpop.permute.xlu0 %4388  ;;  %v12882_v26 = vpack.c.bf16 %v14744_v12, %v5205_v30  ;;  %v12896_v12 = vsub.f32 %v12869_v24, %v14752_v62  ;;  %v14759_v62 = vand.u32 4294901760, %v12906_v54  ;;  %v4460_v53 = vsel %vm4188_vm2, %v4377_v7, %v4379_v1 }
 0x630   :  { %v12918_v30 = vsub.f32 %v4530_v42, %v12908_v32  ;;  %v4538_v51 = vand.u32 4294901760, %v4460_v53 }
 0x631   :  { %15097 = vst [vmem:[#allocation46_spill] sm:$0xff] %v12882_v26  ;;  %10714 = vmatprep.subr.bf16.mxu1 %v12882_v26  ;;  %v14757_v17 = vand.u32 4294901760, %v12896_v12  ;;  %v12931_v47 = vsub.f32 %v12906_v54, %v14759_v62  ;;  %v15102_v62 = vand.u32 4294901760, %v12903_v37 }
 0x632   :  { %v4395_v6 = vpop.permute.xlu1 %4394  ;;  %15098 = vst [vmem:[#allocation47_spill] sm:$0xff] %v12918_v30  ;;  %v12964_v25 = vand.u32 4294901760, %v12918_v30 }
 0x633   :  { %v12890_v27 = vpop.permute.xlu0 %4392  ;;  %v12926_v49 = vsub.f32 %v12896_v12, %v14757_v17  ;;  %15099 = vst [vmem:[#allocation48_spill] sm:$0xff] %v12931_v47  ;;  %v15101_v17 = vand.u32 4294901760, %v12899_v41  ;;  %v12953_v56 = vsub.f32 %v12903_v37, %v15102_v62  ;;  %v15113_v19 = vand.u32 4294901760, %v12931_v47 }
 0x634   :  { %v12961_v45 = vsel %vm4188_vm2, %v12890_v27, %v4395_v6  ;;  %15103 = vst [vmem:[#allocation49_spill] sm:$0xff] %v12964_v25  ;;  %v4618_v6 = vsub.f32 %v12918_v30, %v12964_v25 }
 0x635   :  { %v12948_v29 = vsub.f32 %v12899_v41, %v15101_v17  ;;  %v5213_v17 = vand.u32 4294901760, %v12961_v45  ;;  %v13013_v14 = vsub.f32 %v12931_v47, %v15113_v19  ;;  %v13030_v19 = vsub.f32 %v12864_v43, %v15118_v10 }
 0x636   :  { %v4405_v9 = vpop.permute.xlu1 %4404 }
 0x637   :  { %v12910_v31 = vpop.permute.xlu0 %4398 }
 0x63a   :  { %v4397_v38 = vpop.permute.xlu1 %4396 }
 0x63b   :  { %v4403_v50 = vpop.permute.xlu0 %4402 }
 0x63c   :  { %v12937_v42 = vsel %vm4188_vm2, %v4403_v50, %v4405_v9 }
 0x63e   :  { %v4381_v7 = vpop.permute.xlu1 %4380 }
 0x63f   :  { %v12969_v62 = vsel %vm4188_vm2, %v4379_v1, %v4381_v7  ;;  %v12972_v9 = vsel %vm4188_vm2, %v4381_v7, %v4383_v44  ;;  %v4419_v21 = vpop.permute.xlu0 %4418  ;;  %v12984_v44 = vsub.f32 %v12921_v48, %v15104_v39  ;;  %v4464_v7 = vsel %vm4188_vm2, %v12857_v20, %v12878_v59 }
 0x640   :  { %v14769_v63 = vand.u32 4294901760, %v12972_v9  ;;  %v12998_v1 = vsub.f32 %v12934_v23, %v15107_v34  ;;  %v4468_v39 = vsel %vm4188_vm2, %v4397_v38, %v12910_v31  ;;  %v15109_v11 = vand.u32 4294901760, %v12969_v62 }
 0x641   :  { %15105 = vst [vmem:[#allocation50_spill] sm:$0xff] %v12984_v44  ;;  %v15114_v34 = vand.u32 4294901760, %v12869_v24  ;;  %v4542_v52 = vand.u32 4294901760, %v4464_v7  ;;  %v13041_v38 = vand.u32 4294901760, %v4618_v6  ;;  %v4476_v6 = vsel %vm4188_vm2, %v12855_v22, %v4419_v21 }
 0x642   :  { %v12991_v46 = vpack.c.bf16 %v14769_v63, %v5207_v18  ;;  %v4391_v2 = vpop.permute.xlu1 %4390  ;;  %15108 = vst [vmem:[#allocation52_spill] sm:$0xff] %v12998_v1  ;;  %v13004_v20 = vpack.c.bf16 %v15109_v11, %v4532_v15  ;;  %v15111_v18 = vand.u32 4294901760, %v12937_v42  ;;  %v15116_v15 = vand.u32 4294901760, %v12957_v55 }
 0x643   :  { %v4423_v36 = vpop.permute.xlu0 %4422  ;;  %v13017_v33 = vpack.c.bf16 %v4538_v51, %v15114_v34  ;;  %v13034_v24 = vsel %vm4188_vm2, %v4391_v2, %v12890_v27  ;;  %v13038_v34 = vsub.f32 %v4460_v53, %v4538_v51  ;;  %v4546_v11 = vand.u32 4294901760, %v4468_v39 }
 0x644   :  { %15106 = vst [vmem:[#allocation51_spill] sm:$0xff] %v12991_v46  ;;  %15110 = vst [vmem:[#allocation53_spill] sm:$0xff] %v13004_v20  ;;  %v13008_v63 = vpack.c.bf16 %v15111_v18, %v5213_v17  ;;  %10716 = vmatpush1.bf16.msra.mxu1 %v12991_v46  ;;  %v13025_v18 = vsub.f32 %v12957_v55, %v15116_v15  ;;  %10618 = vmatprep.subr.bf16.mxu0 %v13004_v20  ;;  %v5215_v40 = vand.u32 4294901760, %v13034_v24 }
 0x645   :  { %15115 = vst [vmem:[#allocation55_spill] sm:$0xff] %v13017_v33  ;;  %10620 = vmatpush1.bf16.msra.mxu0 %v13017_v33  ;;  %v4465_v27 = vsel %vm4188_vm2, %v12878_v59, %v4391_v2  ;;  %v13061_v35 = vsub.f32 %v4464_v7, %v4542_v52  ;;  %v15120_v13 = vand.u32 4294901760, %v12998_v1  ;;  %v4554_v7 = vand.u32 4294901760, %v4476_v6 }
 0x646   :  { %15112 = vst [vmem:[#allocation54_spill] sm:$0xff] %v13008_v63  ;;  %15117 = vst [vmem:[#allocation56_spill] sm:$0xff] %v13025_v18  ;;  %10718 = vmatprep.subr.bf16.mxu1 %v13008_v63  ;;  %v4401_v15 = vpop.permute.xlu1 %4400  ;;  %v4540_v61 = vand.u32 4294901760, %v4465_v27  ;;  %v13087_v59 = vsub.f32 %v12961_v45, %v5213_v17  ;;  %v13097_v25 = vpack.c.bf16 %v4546_v11, %v4542_v52  ;;  %v15125_v63 = vand.u32 4294901760, %v13030_v19 }
 0x647   :  { %v13049_v4 = vsel %vm4188_vm2, %v12910_v31, %v4401_v15  ;;  %v13052_v53 = vsel %vm4188_vm2, %v4401_v15, %v4403_v50  ;;  %v13054_v51 = vpop.permute.xlu0 %4428  ;;  %v13067_v15 = vsub.f32 %v4468_v39, %v4546_v11  ;;  %v13074_v57 = vsub.f32 %v12998_v1, %v15120_v13 }
 0x648   :  { %v4544_v10 = vand.u32 4294901760, %v13049_v4  ;;  %v5219_v43 = vand.u32 4294901760, %v13052_v53  ;;  %v15121_v50 = vand.u32 4294901760, %v12984_v44  ;;  %15122 = vst [vmem:[#allocation58_spill] sm:$0xff] %v13087_v59  ;;  %15124 = vst [vmem:[#allocation60_spill] sm:$0xff] %v13097_v25  ;;  %v15126_v45 = vand.u32 4294901760, %v13025_v18 }
 0x649   :  { %v15141_v33 = vand.u32 4294901760, %v12921_v48 }
 0x64a   :  { %v13069_v22 = vpack.c.bf16 %v5219_v43, %v5215_v40  ;;  %v4421_v16 = vpop.permute.xlu1 %4420  ;;  %v13084_v39 = vsub.f32 %v12984_v44, %v15121_v50  ;;  %v13093_v5 = vpack.c.bf16 %v4544_v10, %v4540_v61  ;;  %v5314_v50 = vsub.f32 %v13030_v19, %v15125_v63 }
 0x64b   :  { %v13077_v2 = vsel %vm4188_vm2, %v4419_v21, %v4421_v16  ;;  %v13079_v31 = vpop.permute.xlu0 %4432  ;;  %v13090_v8 = vsel %vm4188_vm2, %v4421_v16, %v4423_v36  ;;  %v13105_v17 = vsub.f32 %v13025_v18, %v15126_v45  ;;  %v15127_v16 = vand.u32 4294901760, %v13038_v34 }
 0x64c   :  { %15119 = vst [vmem:[#allocation57_spill] sm:$0xff] %v13069_v22  ;;  %15123 = vst [vmem:[#allocation59_spill] sm:$0xff] %v13093_v5  ;;  %10720 = vmatpush1.bf16.msra.mxu1 %v13069_v22  ;;  %v15128_v22 = vand.u32 4294901760, %v12969_v62  ;;  %v13119_v63 = vsel %vm4188_vm2, %v12853_v58, %v13054_v51  ;;  %10622 = vmatprep.subr.bf16.mxu0 %v13093_v5  ;;  %v13122_v45 = vsub.f32 %v4476_v6, %v4554_v7 }
 0x64d   :  { %v4647_v13 = vsub.f32 %v13038_v34, %v15127_v16  ;;  %10624 = vmatpush1.bf16.msra.mxu0 %v13097_v25  ;;  %v15133_v58 = vand.u32 4294901760, %v12937_v42  ;;  %v15135_v6 = vand.u32 4294901760, %v12972_v9  ;;  %v15159_v1 = vand.u32 4294901760, %v13090_v8 }
 0x64e   :  { %v13114_v52 = vsub.f32 %v12969_v62, %v15128_v22  ;;  %v4425_v11 = vpop.permute.xlu1 %4424  ;;  %15129 = vst [vmem:[#allocation61_spill] sm:$0xff] %v13122_v45  ;;  %v15130_v62 = vand.u32 4294901760, %v12957_v55  ;;  %v15131_v22 = vand.u32 4294901760, %v13077_v2  ;;  %v15136_v55 = vand.u32 4294901760, %v13061_v35 }
 0x64f   :  { %v13127_v16 = vsel %vm4188_vm2, %v4423_v36, %v4425_v11  ;;  %v4439_v46 = vpop.permute.xlu0 %4438  ;;  %v13138_v5 = vsub.f32 %v12937_v42, %v15133_v58  ;;  %v13143_v21 = vsub.f32 %v12972_v9, %v15135_v6  ;;  %v5315_v58 = vand.u32 4294901760, %v5314_v50 }
 0x650   :  { %v13133_v26 = vpack.c.bf16 %v15131_v22, %v15130_v62  ;;  %v4659_v25 = vsub.f32 %v13061_v35, %v15136_v55  ;;  %v15137_v62 = vand.u32 4294901760, %v12906_v54  ;;  %v15139_v9 = vand.u32 4294901760, %v13067_v15 }
 0x651   :  { %15134 = vst [vmem:[#allocation63_spill] sm:$0xff] %v13138_v5  ;;  %v13160_v36 = vsub.f32 %v13034_v24, %v5215_v40  ;;  %v15142_v55 = vand.u32 4294901760, %v13127_v16  ;;  %v13170_v50 = vsub.f32 %v4465_v27, %v4540_v61  ;;  %v13189_v27 = vsub.f32 %v13049_v4, %v4544_v10 }
 0x652   :  { %15132 = vst [vmem:[#allocation62_spill] sm:$0xff] %v13133_v26  ;;  %v13152_v22 = vpack.c.bf16 %v4554_v7, %v15137_v62  ;;  %10626 = vmatprep.subr.bf16.mxu0 %v13133_v26  ;;  %v4671_v6 = vsub.f32 %v13067_v15, %v15139_v9  ;;  %v4431_v11 = vpop.permute.xlu1 %4430  ;;  %v14806_v7 = vand.u32 4294901760, %v13114_v52  ;;  %v4648_v62 = vand.u32 4294901760, %v4647_v13 }
 0x653   :  { %15140 = vst [vmem:[#allocation65_spill] sm:$0xff] %v13160_v36  ;;  %v13166_v54 = vpack.c.bf16 %v15142_v55, %v15141_v33  ;;  %v15144_v26 = vand.u32 4294901760, %v12934_v23  ;;  %v15145_v9 = vand.u32 4294901760, %v13090_v8  ;;  %v4443_v48 = vpop.permute.xlu0 %4442  ;;  %v15147_v33 = vand.u32 4294901760, %v13087_v59 }
 0x654   :  { %15138 = vst [vmem:[#allocation64_spill] sm:$0xff] %v13152_v22  ;;  %10628 = vmatpush1.bf16.msra.mxu0 %v13152_v22  ;;  %v15149_v55 = vand.u32 4294901760, %v13119_v63  ;;  %v4672_v24 = vand.u32 4294901760, %v4671_v6  ;;  %v4641_v4 = vsub.f32 %v13114_v52, %v14806_v7  ;;  %v15151_v10 = vand.u32 4294901760, %v12953_v56 }
 0x655   :  { %15143 = vst [vmem:[#allocation66_spill] sm:$0xff] %v13166_v54  ;;  %v13176_v40 = vpack.c.bf16 %v15145_v9, %v15144_v26  ;;  %10722 = vmatprep.subr.bf16.mxu1 %v13166_v54  ;;  %v13184_v13 = vsub.f32 %v13087_v59, %v15147_v33  ;;  %v13192_v26 = vsub.f32 %v13052_v53, %v5219_v43  ;;  %v15152_v53 = vand.u32 4294901760, %v13122_v45 }
 0x656   :  { %v13197_v9 = vsub.f32 %v13119_v63, %v15149_v55  ;;  %v4435_v42 = vpop.permute.xlu1 %4434  ;;  %v13207_v43 = vpack.c.bf16 %v5315_v58, %v15151_v10  ;;  %v15153_v33 = vand.u32 4294901760, %v12926_v49  ;;  %v15154_v54 = vand.u32 4294901760, %v13143_v21 }
 0x657   :  { %15146 = vst [vmem:[#allocation67_spill] sm:$0xff] %v13176_v40  ;;  %15148 = vst [vmem:[#allocation68_spill] sm:$0xff] %v13192_v26  ;;  %10724 = vmatpush1.bf16.msra.mxu1 %v13176_v40  ;;  %v13212_v55 = vsub.f32 %v13122_v45, %v15152_v53  ;;  %v4449_v23 = vpop.permute.xlu0 %4448  ;;  %v4660_v40 = vand.u32 4294901760, %v4659_v25  ;;  %v4484_v56 = vsel %vm4188_vm2, %v12859_v28, %v4439_v46  ;;  %v15155_v10 = vand.u32 4294901760, %v13138_v5 }
 0x658   :  { %15150 = vst [vmem:[#allocation69_spill] sm:$0xff] %v13197_v9  ;;  %v13216_v6 = vpack.c.bf16 %v4648_v62, %v15153_v33  ;;  %v13222_v7 = vsub.f32 %v13143_v21, %v15154_v54  ;;  %v4481_v25 = vsel %vm4188_vm2, %v13054_v51, %v4431_v11  ;;  %v15156_v33 = vand.u32 4294901760, %v13160_v36 }
 0x659   :  { %v13230_v53 = vsub.f32 %v13138_v5, %v15155_v10  ;;  %v15157_v58 = vand.u32 4294901760, %v13077_v2  ;;  %v4642_v22 = vand.u32 4294901760, %v4641_v4  ;;  %v13247_v49 = vpack.c.bf16 %v4672_v24, %v4660_v40 }
 0x65a   :  { %v13240_v28 = vsub.f32 %v13160_v36, %v15156_v33  ;;  %v4441_v10 = vpop.permute.xlu1 %4440  ;;  %v4562_v30 = vand.u32 4294901760, %v4484_v56  ;;  %v15158_v20 = vand.u32 4294901760, %v13170_v50  ;;  %v13257_v44 = vsub.f32 %v13090_v8, %v15159_v1 }
 0x65b   :  { %v13245_v61 = vsub.f32 %v13077_v2, %v15157_v58  ;;  %v4485_v51 = vsel %vm4188_vm2, %v4439_v46, %v4441_v10  ;;  %v4453_v54 = vpop.permute.xlu0 %4452  ;;  %v4556_v2 = vand.u32 4294901760, %v4481_v25  ;;  %v4486_v4 = vsel %vm4188_vm2, %v4441_v10, %v4443_v48 }
 0x65c   :  { %v4653_v33 = vsub.f32 %v13170_v50, %v15158_v20  ;;  %15160 = vst [vmem:[#allocation70_spill] sm:$0xff] %v13257_v44  ;;  %v4560_v40 = vand.u32 4294901760, %v4485_v51  ;;  %v15161_v24 = vand.u32 4294901760, %v13192_v26  ;;  %v15162_v46 = vand.u32 4294901760, %v13197_v9 }
 0x65d   :  { %v4483_v20 = vsel %vm4188_vm2, %v13079_v31, %v4435_v42  ;;  %v15163_v8 = vand.u32 4294901760, %v13189_v27  ;;  %v4482_v45 = vsel %vm4188_vm2, %v4431_v11, %v13079_v31  ;;  %v15167_v42 = vand.u32 4294901760, %v13119_v63 }
 0x65e   :  { %v13263_v58 = vsub.f32 %v13192_v26, %v15161_v24  ;;  %v13268_v62 = vsub.f32 %v13197_v9, %v15162_v46  ;;  %v4445_v47 = vpop.permute.xlu1 %4444  ;;  %v13278_v24 = vpack.c.bf16 %v4560_v40, %v4556_v2  ;;  %v15165_v26 = vand.u32 4294901760, %v12948_v29 }
 0x65f   :  { %v4665_v1 = vsub.f32 %v13189_v27, %v15163_v8  ;;  %v15166_v46 = vand.u32 4294901760, %v13127_v16  ;;  %v13289_v18 = vpack.c.bf16 %v4562_v30, %v15167_v42  ;;  %v5235_v8 = vand.u32 4294901760, %v4486_v4  ;;  %v4447_v5 = vpop.permute.xlu0 %4446 }
 0x660   :  { %15164 = vst [vmem:[#allocation71_spill] sm:$0xff] %v13278_v24  ;;  %v10633_v36 = vpack.c.bf16 %v4642_v22, %v15165_v26  ;;  %v4487_v10 = vsel %vm4188_vm2, %v4443_v48, %v4445_v47  ;;  %v5229_v11 = vand.u32 4294901760, %v4483_v20  ;;  %v13293_v59 = vsub.f32 %v4485_v51, %v4560_v40  ;;  %10630 = vmatprep.subr.bf16.mxu0 %v13278_v24 }
 0x661   :  { %v13285_v9 = vsub.f32 %v13127_v16, %v15166_v46  ;;  %15168 = vst [vmem:[#allocation72_spill] sm:$0xff] %v13289_v18  ;;  %v5233_v29 = vand.u32 4294901760, %v4487_v10  ;;  %v13296_v22 = vsub.f32 %v4484_v56, %v4562_v30  ;;  %v5231_v16 = vand.u32 4294901760, %v4482_v45  ;;  %10632 = vmatpush1.bf16.msra.mxu0 %v13289_v18 }
 0x662   :  { %v4654_v63 = vand.u32 4294901760, %v4653_v33  ;;  %v4666_v26 = vand.u32 4294901760, %v4665_v1  ;;  %v13299_v46 = vsub.f32 %v4481_v25, %v4556_v2  ;;  %v4488_v47 = vsel %vm4188_vm2, %v4447_v5, %v4449_v23  ;;  %v4451_v48 = vpop.permute.xlu1 %4450 }
 0x663   :  { %v13302_v42 = vpack.c.bf16 %v5233_v29, %v5229_v11  ;;  %v5321_v51 = vand.u32 4294901760, %v13222_v7  ;;  %v13306_v31 = vpack.c.bf16 %v5235_v8, %v5231_v16  ;;  %v4489_v30 = vsel %vm4188_vm2, %v4449_v23, %v4451_v48 }
 0x664   :  { %v15171_v56 = vand.u32 4294901760, %v13245_v61  ;;  %v15172_v25 = vand.u32 4294901760, %v13257_v44  ;;  %v13318_v1 = vsub.f32 %v4487_v10, %v5233_v29  ;;  %v13320_v7 = vand.u32 4294901760, %v4489_v30 }
 0x665   :  { %15169 = vst [vmem:[#allocation73_spill] sm:$0xff] %v13302_v42  ;;  %15170 = vst [vmem:[#allocation74_spill] sm:$0xff] %v13306_v31  ;;  %10726 = vmatprep.subr.bf16.mxu1 %v13302_v42  ;;  %v13324_v23 = vand.u32 4294901760, %v4488_v47  ;;  %v5339_v18 = vand.u32 4294901760, %v13230_v53  ;;  %v13329_v24 = vsub.f32 %v4483_v20, %v5229_v11  ;;  %v4490_v10 = vsel %vm4188_vm2, %v4451_v48, %v4453_v54 }
 0x666   :  { %v4689_v33 = vsub.f32 %v13245_v61, %v15171_v56  ;;  %v13315_v2 = vsub.f32 %v13257_v44, %v15172_v25  ;;  %15173 = vst [vmem:[#allocation75_spill] sm:$0xff] %v13320_v7  ;;  %10728 = vmatpush1.bf16.msra.mxu1 %v13306_v31  ;;  %v10637_v56 = vpack.c.bf16 %v4666_v26, %v4654_v63  ;;  %v14849_v25 = vand.u32 4294901760, %v13299_v46  ;;  %v4455_v29 = vpop.permute.xlu1 %4454 }
 0x667   :  { %4565 = vmatprep.subr.mxu0 %v13320_v7  ;;  %v15174_v5 = vand.u32 4294901760, %v12942_v0  ;;  %v13335_v40 = vsub.f32 %v4486_v4, %v5235_v8  ;;  %v4491_v44 = vsel %vm4188_vm2, %v4453_v54, %v4455_v29  ;;  %v15175_v53 = vand.u32 4294901760, %v13285_v9 }
 0x668   :  { %4567 = vmatpush1.msra.mxu0 %v13324_v23  ;;  %v4690_v63 = vand.u32 4294901760, %v4689_v33  ;;  %v14847_v11 = vand.u32 4294901760, %v13318_v1  ;;  %v13344_v26 = vsub.f32 %v4489_v30, %v13320_v7  ;;  %v13346_v48 = vand.u32 4294901760, %v4491_v44 }
 0x669   :  { %v10731_v42 = vpack.c.bf16 %v5321_v51, %v15174_v5  ;;  %v5362_v20 = vsub.f32 %v13285_v9, %v15175_v53  ;;  %10634 = vmatprep.subr.bf16.mxu0 %v10633_v36  ;;  %4620 = vmatmul.mubr.f32.vlgmr.msra.gmra.mrb[6].mxu0 %v13041_v38  ;;  %v15176_v0 = vand.u32 4294901760, %v13293_v59  ;;  %v15177_v4 = vand.u32 4294901760, %v13296_v22 }
 0x66a   :  { %v13355_v51 = vsub.f32 %v4482_v45, %v5231_v16  ;;  %v13357_v33 = vand.u32 4294901760, %v4490_v10  ;;  %10636 = vmatpush1.bf16.msra.mxu0 %v13216_v6  ;;  %v15178_v30 = vand.u32 4294901760, %v13184_v13  ;;  %4780 = vmatprep.mubr.f32.mxu0 %v14989_v3  ;;  %v14848_v36 = vand.u32 4294901760, %v13329_v24 }
 0x66b   :  { %v4713_v54 = vsub.f32 %v13293_v59, %v15176_v0  ;;  %v4719_v8 = vsub.f32 %v13296_v22, %v15177_v4  ;;  %10638 = vmatprep.subr.bf16.mxu0 %v10637_v56  ;;  %5238 = vmatprep.subr.mxu1 %v13346_v48  ;;  %v5333_v29 = vand.u32 4294901760, %v13240_v28  ;;  %v5345_v53 = vand.u32 4294901760, %v13263_v58 }
 0x66c   :  { %v10733_v5 = vpack.c.bf16 %v5339_v18, %v15178_v30  ;;  %v4701_v45 = vsub.f32 %v13299_v46, %v14849_v25  ;;  %v14844_v6 = vand.u32 4294901760, %v13335_v40  ;;  %v13372_v13 = vsub.f32 %v4488_v47, %v13324_v23  ;;  %5240 = vmatpush1.msra.mxu1 %v13357_v33 }
 0x66d   :  { %v15179_v18 = vand.u32 4294901760, %v13105_v17  ;;  %v5363_v56 = vand.u32 4294901760, %v5362_v20  ;;  %v13378_v0 = vsub.f32 %v4491_v44, %v13346_v48  ;;  %10730 = vmatprep.subr.bf16.mxu1 %v13207_v43  ;;  %5293 = vmatmul.mubr.f32.vlgmr.msra.gmra.mrb[6].mxu1 %v13041_v38  ;;  %v4714_v28 = vand.u32 4294901760, %v4713_v54 }
 0x66e   :  { %v14846_v58 = vand.u32 4294901760, %v13344_v26  ;;  %v5386_v47 = vsub.f32 %v13318_v1, %v14847_v11  ;;  %v4708_v4 = vand.u32 4294901760, %v13268_v62  ;;  %v5369_v17 = vand.u32 4294901760, %v13315_v2  ;;  %10640 = vmatpush1.bf16.msra.mxu0 %v13247_v49  ;;  %10732 = vmatpush1.bf16.msra.mxu1 %v10731_v42 }
 0x66f   :  { %v10641_v16 = vpack.c.bf16 %v4690_v63, %v15179_v18  ;;  %v14845_v63 = vand.u32 4294901760, %v13355_v51  ;;  %v15180_v44 = vand.u32 4294901760, %v13013_v14  ;;  %v15181_v38 = vand.u32 4294901760, %v13212_v55  ;;  %10734 = vmatprep.subr.bf16.mxu1 %v10733_v5  ;;  %5453 = vmatprep.mubr.f32.mxu1 %v14989_v3 }
 0x670   :  { %v4720_v20 = vand.u32 4294901760, %v4719_v8  ;;  %v10735_v54 = vpack.c.bf16 %v5345_v53, %v5333_v29  ;;  %v4702_v30 = vand.u32 4294901760, %v4701_v45  ;;  %v5374_v62 = vsub.f32 %v13329_v24, %v14848_v36 }
 0x671   :  { %v10643_v43 = vpack.c.bf16 %v15181_v38, %v15180_v44  ;;  %10642 = vmatprep.subr.bf16.mxu0 %v10641_v16  ;;  %v5392_v2 = vsub.f32 %v13335_v40, %v14844_v6  ;;  %v14843_v49 = vand.u32 4294901760, %v13372_v13  ;;  %v13402_v14 = vsub.f32 %v4490_v10, %v13357_v33 }
 0x672   :  { %v15182_v55 = vand.u32 4294901760, %v13084_v39  ;;  %v10645_v8 = vpack.c.bf16 %v4714_v28, %v4702_v30  ;;  %v4725_v5 = vsub.f32 %v13344_v26, %v14846_v58  ;;  %v5387_v29 = vand.u32 4294901760, %v5386_v47  ;;  %10736 = vmatpush1.bf16.msra.mxu1 %v10735_v54 }
 0x673   :  { %v14842_v53 = vand.u32 4294901760, %v13378_v0  ;;  %v5380_v45 = vsub.f32 %v13355_v51, %v14845_v63  ;;  %10644 = vmatpush1.bf16.msra.mxu0 %v10643_v43  ;;  %v5357_v10 = vand.u32 4294901760, %v13074_v57  ;;  %v10647_v39 = vpack.c.bf16 %v4720_v20, %v4708_v4 }
 0x674   :  { %v10737_v42 = vpack.c.bf16 %v5363_v56, %v15182_v55  ;;  %10646 = vmatprep.subr.bf16.mxu0 %v10645_v8  ;;  %v5375_v18 = vand.u32 4294901760, %v5374_v62  ;;  %v5393_v16 = vand.u32 4294901760, %v5392_v2  ;;  %v4731_v56 = vsub.f32 %v13372_v13, %v14843_v49  ;;  %v15209_v49 = vld [vmem:[#allocation73_spill] sm:$0xff] }
 0x675   :  { %v14841_v28 = vand.u32 4294901760, %v13402_v14  ;;  %v10739_v47 = vpack.c.bf16 %v5369_v17, %v5357_v10  ;;  %v4726_v44 = vand.u32 4294901760, %v4725_v5  ;;  %v5398_v43 = vsub.f32 %v13378_v0, %v14842_v53  ;;  %v15207_v53 = vld [vmem:[#allocation67_spill] sm:$0xff] }
 0x676   :  { %10738 = vmatprep.subr.bf16.mxu1 %v10737_v42  ;;  %v10741_v38 = vpack.c.bf16 %v5387_v29, %v5375_v18  ;;  %v5381_v54 = vand.u32 4294901760, %v5380_v45  ;;  %v4732_v4 = vand.u32 4294901760, %v4731_v56  ;;  %v10649_v17 = vpack.c.bf16 %v13114_v52, %v12899_v41  ;;  %v15183_v29 = vld [vmem:[#allocation58_spill] sm:$0xff]  ;;  %v15184_v45 = vld [vmem:[#allocation63_spill] sm:$0xff]  ;;  %v15187_v56 = vld [vmem:[#allocation68_spill] sm:$0xff] }
 0x677   :  { %10648 = vmatpush1.bf16.msra.mxu0 %v10647_v39  ;;  %10740 = vmatpush1.bf16.msra.mxu1 %v10739_v47  ;;  %v5404_v57 = vsub.f32 %v13402_v14, %v14841_v28  ;;  %v5399_v30 = vand.u32 4294901760, %v5398_v43  ;;  %v10651_v62 = vpack.c.bf16 %v13038_v34, %v12896_v12  ;;  %v10653_v2 = vpack.c.bf16 %v13189_v27, %v13170_v50  ;;  %v15185_v39 = vld [vmem:[#allocation56_spill] sm:$0xff]  ;;  %v15206_v28 = vld [vmem:[#allocation71_spill] sm:$0xff] }
 0x678   :  { %4727 = vmatprep.subr.mxu0 %v4726_v44  ;;  %10742 = vmatprep.subr.bf16.mxu1 %v10741_v38  ;;  %v10743_v20 = vpack.c.bf16 %v5393_v16, %v5381_v54  ;;  %v10745_v42 = vpack.c.bf16 %v13030_v19, %v12903_v37  ;;  %v10747_v8 = vpack.c.bf16 %v13143_v21, %v12901_v60  ;;  %v15186_v16 = vld [vmem:[#allocation65_spill] sm:$0xff]  ;;  %v15188_v44 = vld [vmem:[#allocation48_spill] sm:$0xff]  ;;  %v15190_v54 = vld [vmem:[#allocation50_spill] sm:$0xff]  ;;  %v15210_v6 = vand.u32 4294901760, %v12899_v41 }
 0x679   :  { %v5405_v55 = vand.u32 4294901760, %v5404_v57  ;;  %v10655_v5 = vpack.c.bf16 %v13067_v15, %v13061_v35  ;;  %v10749_v10 = vpack.c.bf16 %v15184_v45, %v15183_v29  ;;  %v10657_v18 = vpack.c.bf16 %v13245_v61, %v15185_v39  ;;  %v15189_v38 = vld [vmem:[#allocation61_spill] sm:$0xff] }
 0x67a   :  { %v10751_v47 = vpack.c.bf16 %v15187_v56, %v15186_v16  ;;  %v10659_v43 = vpack.c.bf16 %v15189_v38, %v15188_v44  ;;  %v10753_v57 = vpack.c.bf16 %v13285_v9, %v15190_v54  ;;  %v15211_v63 = vand.u32 4294901760, %v13114_v52 }
 0x67b   :  { %4733 = vmatpush1.msra.mxu0 %v4732_v4  ;;  %10744 = vmatpush1.bf16.msra.mxu1 %v10743_v20  ;;  %v10661_v4 = vpack.c.bf16 %v13293_v59, %v13299_v46  ;;  %v15191_v20 = vld [vmem:[#allocation52_spill] sm:$0xff]  ;;  %v15212_v11 = vand.u32 4294901760, %v12896_v12  ;;  %v15213_v36 = vand.u32 4294901760, %v13038_v34  ;;  %v15217_v52 = vand.u32 4294901760, %v12903_v37 }
 0x67c   :  { %10650 = vmatprep.subr.bf16.mxu0 %v10649_v17  ;;  %5400 = vmatprep.subr.mxu1 %v5399_v30  ;;  %v15192_v17 = vld [vmem:[#allocation70_spill] sm:$0xff]  ;;  %v10681_v58 = vpack.c.bf16 %v15211_v63, %v15210_v6  ;;  %v15218_v6 = vand.u32 4294901760, %v13030_v19  ;;  %v15219_v12 = vand.u32 4294901760, %v12901_v60  ;;  %v15220_v34 = vand.u32 4294901760, %v13143_v21 }
 0x67d   :  { %4782 = vmatmul.mubr.f32.vlgmr.msra.gmra.mrb[6].mxu0 %v12908_v32  ;;  %v10755_v30 = vpack.c.bf16 %v15192_v17, %v15191_v20  ;;  %v10683_v25 = vpack.c.bf16 %v15213_v36, %v15212_v11  ;;  %v15223_v37 = vand.u32 4294901760, %v15183_v29  ;;  %v15224_v19 = vand.u32 4294901760, %v15184_v45 }
 0x67e   :  { %10652 = vmatpush1.bf16.msra.mxu0 %v10651_v62  ;;  %4888 = vmatprep.mubr.f32.mxu0 %v14989_v3  ;;  %v15193_v62 = vld [vmem:[#allocation69_spill] sm:$0xff]  ;;  %v10777_v63 = vpack.c.bf16 %v15218_v6, %v15217_v52  ;;  %v10779_v11 = vpack.c.bf16 %v15220_v34, %v15219_v12  ;;  %v15226_v60 = vand.u32 4294901760, %v13245_v61  ;;  %v15231_v45 = vand.u32 4294901760, %v15190_v54 }
 0x67f   :  { %10654 = vmatprep.subr.bf16.mxu0 %v10653_v2  ;;  %5406 = vmatpush1.msra.mxu1 %v5405_v55  ;;  %v10663_v2 = vpack.c.bf16 %v13296_v22, %v15193_v62  ;;  %v10757_v55 = vpack.c.bf16 %v13318_v1, %v13329_v24  ;;  %v15232_v61 = vand.u32 4294901760, %v13285_v9  ;;  %v15234_v52 = vand.u32 4294901760, %v13293_v59 }
 0x680   :  { %10746 = vmatprep.subr.bf16.mxu1 %v10745_v42  ;;  %5455 = vmatmul.mubr.f32.vlgmr.msra.gmra.mrb[6].mxu1 %v12908_v32  ;;  %v10759_v42 = vpack.c.bf16 %v13335_v40, %v13355_v51  ;;  %v15238_v54 = vand.u32 4294901760, %v13296_v22  ;;  %v15241_v59 = vand.u32 4294901760, %v13344_v26  ;;  %v15244_v22 = vand.u32 4294901760, %v13372_v13 }
 0x681   :  { %10748 = vmatpush1.bf16.msra.mxu1 %v10747_v8  ;;  %5561 = vmatprep.mubr.f32.mxu1 %v14989_v3  ;;  %v15194_v8 = vld [vmem:[#allocation53_spill] sm:$0xff] }
 0x682   :  { %10656 = vmatpush1.bf16.msra.mxu0 %v10655_v5  ;;  %10750 = vmatprep.subr.bf16.mxu1 %v10749_v10  ;;  %v15195_v5 = vld [vmem:[#allocation47_spill] sm:$0xff] }
 0x683   :  { %10658 = vmatprep.subr.bf16.mxu0 %v10657_v18  ;;  %v15196_v10 = vld [vmem:[#allocation55_spill] sm:$0xff] }
 0x684   :  { %v15197_v18 = vld [vmem:[#allocation59_spill] sm:$0xff] }
 0x685   :  { %10752 = vmatpush1.bf16.msra.mxu1 %v10751_v47  ;;  %v15198_v47 = vld [vmem:[#allocation46_spill] sm:$0xff] }
 0x686   :  { %10660 = vmatpush1.bf16.msra.mxu0 %v10659_v43  ;;  %10754 = vmatprep.subr.bf16.mxu1 %v10753_v57  ;;  %v15199_v43 = vld [vmem:[#allocation51_spill] sm:$0xff]  ;;  %v15200_v57 = vld [vmem:[#allocation60_spill] sm:$0xff] }
 0x687   :  { %10662 = vmatprep.subr.bf16.mxu0 %v10661_v4  ;;  %v15201_v4 = vld [vmem:[#allocation54_spill] sm:$0xff] }
 0x689   :  { %10756 = vmatpush1.bf16.msra.mxu1 %v10755_v30  ;;  %v15202_v30 = vld [vmem:[#allocation62_spill] sm:$0xff] }
 0x68a   :  { %10664 = vmatpush1.bf16.msra.mxu0 %v10663_v2  ;;  %10758 = vmatprep.subr.bf16.mxu1 %v10757_v55  ;;  %v15203_v2 = vld [vmem:[#allocation57_spill] sm:$0xff]  ;;  %v15204_v55 = vld [vmem:[#allocation64_spill] sm:$0xff] }
 0x68b   :  { %4838 = vmatprep.subr.mxu0 %v13344_v26  ;;  %v15248_v26 = vld [vmem:[#allocation75_spill] sm:$0xff] }
 0x68d   :  { %10760 = vmatpush1.bf16.msra.mxu1 %v10759_v42  ;;  %v15205_v42 = vld [vmem:[#allocation66_spill] sm:$0xff] }
 0x68e   :  { %4841 = vmatpush1.msra.mxu0 %v13372_v13  ;;  %5511 = vmatprep.subr.mxu1 %v13378_v0  ;;  %v5882_v13 = vld [vmem:[%s14660_s11] sm:$0xff] }
 0x68f   :  { %10666 = vmatprep.subr.bf16.mxu0 %v15194_v8  ;;  %4891 = vmatmul.mubr.f32.vlgmr.msra.gmra.mrb[6].mxu0 %v15195_v5 }
 0x690   :  { %10668 = vmatpush1.bf16.msra.mxu0 %v15196_v10  ;;  %4979 = vmatprep.mubr.f32.mxu0 %v14989_v3 }
 0x691   :  { %10670 = vmatprep.subr.bf16.mxu0 %v15197_v18  ;;  %5514 = vmatpush1.msra.mxu1 %v13402_v14 }
 0x692   :  { %10762 = vmatprep.subr.bf16.mxu1 %v15198_v47  ;;  %5564 = vmatmul.mubr.f32.vlgmr.msra.gmra.mrb[6].mxu1 %v15195_v5  ;;  %v15208_v5 = vld [vmem:[#allocation72_spill] sm:$0xff] }
 0x693   :  { %10764 = vmatpush1.bf16.msra.mxu1 %v15199_v43  ;;  %5652 = vmatprep.mubr.f32.mxu1 %v14989_v3 }
 0x694   :  { %10672 = vmatpush1.bf16.msra.mxu0 %v15200_v57  ;;  %10766 = vmatprep.subr.bf16.mxu1 %v15201_v4 }
 0x695   :  { %10674 = vmatprep.subr.bf16.mxu0 %v15202_v30 }
 0x697   :  { %10768 = vmatpush1.bf16.msra.mxu1 %v15203_v2 }
 0x698   :  { %10676 = vmatpush1.bf16.msra.mxu0 %v15204_v55  ;;  %10770 = vmatprep.subr.bf16.mxu1 %v15205_v42 }
 0x699   :  { %10678 = vmatprep.subr.bf16.mxu0 %v15206_v28 }
 0x69b   :  { %10772 = vmatpush1.bf16.msra.mxu1 %v15207_v53 }
 0x69c   :  { %10680 = vmatpush1.bf16.msra.mxu0 %v15208_v5  ;;  %10774 = vmatprep.subr.bf16.mxu1 %v15209_v49  ;;  %v15214_v49 = vld [vmem:[#allocation49_spill] sm:$0xff] }
 0x69d   :  { %4930 = vmatprep.subr.mxu0 %v13320_v7  ;;  %v15215_v7 = vand.u32 4294901760, %v13170_v50  ;;  %v15221_v50 = vand.u32 4294901760, %v13061_v35  ;;  %v15227_v35 = vand.u32 4294901760, %v15186_v16  ;;  %v15235_v16 = vand.u32 4294901760, %v15191_v20 }
 0x69e   :  { %v15242_v20 = vand.u32 4294901760, %v13355_v51  ;;  %v15249_v51 = vld [vmem:[#allocation74_spill] sm:$0xff] }
 0x69f   :  { %10776 = vmatpush1.bf16.msra.mxu1 %v13306_v31  ;;  %v15216_v31 = vand.u32 4294901760, %v13189_v27  ;;  %v15222_v27 = vand.u32 4294901760, %v13067_v15  ;;  %v15228_v15 = vand.u32 4294901760, %v15187_v56  ;;  %v15236_v56 = vand.u32 4294901760, %v15192_v17 }
 0x6a0   :  { %4932 = vmatpush1.msra.mxu0 %v13324_v23  ;;  %5603 = vmatprep.subr.mxu1 %v13346_v48  ;;  %v15243_v17 = vand.u32 4294901760, %v13335_v40  ;;  %v15246_v40 = vand.u32 4294901760, %v13402_v14 }
 0x6a1   :  { %10682 = vmatprep.subr.bf16.mxu0 %v10681_v58  ;;  %4983 = vmatmul.mubr.f32.vlgmr.msra.gmra.mrb[6].mxu0 %v15214_v49  ;;  %v10685_v41 = vpack.c.bf16 %v15216_v31, %v15215_v7  ;;  %v10687_v31 = vpack.c.bf16 %v15222_v27, %v15221_v50  ;;  %v10781_v7 = vpack.c.bf16 %v15224_v19, %v15223_v37  ;;  %v15229_v58 = vand.u32 4294901760, %v15188_v44 }
 0x6a2   :  { %10684 = vmatpush1.bf16.msra.mxu0 %v10683_v25  ;;  %5107 = vmatprep.mubr.f32.mxu0 %v14989_v3  ;;  %v15225_v25 = vand.u32 4294901760, %v15185_v39  ;;  %v10783_v36 = vpack.c.bf16 %v15228_v15, %v15227_v35  ;;  %v10785_v39 = vpack.c.bf16 %v15232_v61, %v15231_v45  ;;  %v10787_v44 = vpack.c.bf16 %v15236_v56, %v15235_v16  ;;  %v15250_v56 = vld [vmem:[#allocation12_spill] sm:$0xff] }
 0x6a3   :  { %10686 = vmatprep.subr.bf16.mxu0 %v10685_v41  ;;  %5605 = vmatpush1.msra.mxu1 %v13357_v33  ;;  %v15233_v41 = vand.u32 4294901760, %v13299_v46  ;;  %v15240_v46 = vand.u32 4294901760, %v13318_v1  ;;  %v10791_v34 = vpack.c.bf16 %v15243_v17, %v15242_v20  ;;  %v15247_v1 = vld [vmem:[#allocation73_spill] sm:$0xff]  ;;  %v15256_v17 = vld [vmem:[#allocation16_spill] sm:$0xff] }
 0x6a4   :  { %10778 = vmatprep.subr.bf16.mxu1 %v10777_v63  ;;  %5656 = vmatmul.mubr.f32.vlgmr.msra.gmra.mrb[6].mxu1 %v15214_v49  ;;  %v10689_v21 = vpack.c.bf16 %v15226_v60, %v15225_v25  ;;  %v15230_v49 = vand.u32 4294901760, %v15189_v38  ;;  %v15237_v38 = vand.u32 4294901760, %v15193_v62  ;;  %v15239_v63 = vand.u32 4294901760, %v13329_v24 }
 0x6a5   :  { %10780 = vmatpush1.bf16.msra.mxu1 %v10779_v11  ;;  %5780 = vmatprep.mubr.f32.mxu1 %v14989_v3  ;;  %v10693_v6 = vpack.c.bf16 %v15234_v52, %v15233_v41  ;;  %v15245_v24 = vand.u32 4294901760, %v13378_v0  ;;  %v5890_v0 = vsel %vm1996_vm14, %v5882_v13, 0  ;;  %v15261_v13 = vld [vmem:[#allocation7_spill] sm:$0xff] }
 0x6a6   :  { %10688 = vmatpush1.bf16.msra.mxu0 %v10687_v31  ;;  %10782 = vmatprep.subr.bf16.mxu1 %v10781_v7  ;;  %v10691_v29 = vpack.c.bf16 %v15230_v49, %v15229_v58  ;;  %v10695_v9 = vpack.c.bf16 %v15238_v54, %v15237_v38  ;;  %v10789_v12 = vpack.c.bf16 %v15240_v46, %v15239_v63  ;;  %v13597_v14 = vand.u32 4294901760, %v5890_v0  ;;  %v15252_v54 = vld [vmem:[#allocation18_spill] sm:$0xff] }
 0x6a7   :  { %10690 = vmatprep.subr.bf16.mxu0 %v10689_v21 }
 0x6a9   :  { %10784 = vmatpush1.bf16.msra.mxu1 %v10783_v36 }
 0x6aa   :  { %10692 = vmatpush1.bf16.msra.mxu0 %v10691_v29  ;;  %10786 = vmatprep.subr.bf16.mxu1 %v10785_v39  ;;  %v5887_v39 = vpop.permute.xlu0 %5886 }
 0x6ab   :  { %10694 = vmatprep.subr.bf16.mxu0 %v10693_v6 }
 0x6ad   :  { %10788 = vmatpush1.bf16.msra.mxu1 %v10787_v44 }
 0x6ae   :  { %10696 = vmatpush1.bf16.msra.mxu0 %v10695_v9  ;;  %10790 = vmatprep.subr.bf16.mxu1 %v10789_v12 }
 0x6af   :  { %5056 = vmatprep.subr.mxu0 %v15241_v59  ;;  %v15254_v59 = vld [vmem:[#allocation14_spill] sm:$0xff] }
 0x6b1   :  { %10792 = vmatpush1.bf16.msra.mxu1 %v10791_v34 }
 0x6b2   :  { %5060 = vmatpush1.msra.mxu0 %v15244_v22  ;;  %5729 = vmatprep.subr.mxu1 %v15245_v24  ;;  %v15258_v22 = vld [vmem:[#allocation21_spill] sm:$0xff] }
 0x6b3   :  { %10698 = vmatprep.subr.bf16.mxu0 %v15194_v8  ;;  %5109 = vmatmul.mubr.f32.vlgmr.msra.gmra.mrb[6].mxu0 %v12908_v32 }
 0x6b4   :  { %10700 = vmatpush1.bf16.msra.mxu0 %v15196_v10  ;;  %5197 = vmatprep.mubr.f32.mxu0 %v14989_v3 }
 0x6b5   :  { %10702 = vmatprep.subr.bf16.mxu0 %v15197_v18  ;;  %5733 = vmatpush1.msra.mxu1 %v15246_v40  ;;  %v15259_v40 = vld [vmem:[#allocation28_spill] sm:$0xff] }
 0x6b6   :  { %10794 = vmatprep.subr.bf16.mxu1 %v15198_v47  ;;  %5782 = vmatmul.mubr.f32.vlgmr.msra.gmra.mrb[6].mxu1 %v12908_v32 }
 0x6b7   :  { %10796 = vmatpush1.bf16.msra.mxu1 %v15199_v43  ;;  %5870 = vmatprep.mubr.f32.mxu1 %v14989_v3 }
 0x6b8   :  { %10704 = vmatpush1.bf16.msra.mxu0 %v15200_v57  ;;  %10798 = vmatprep.subr.bf16.mxu1 %v15201_v4 }
 0x6b9   :  { %10706 = vmatprep.subr.bf16.mxu0 %v15202_v30 }
 0x6bb   :  { %10800 = vmatpush1.bf16.msra.mxu1 %v15203_v2 }
 0x6bc   :  { %10708 = vmatpush1.bf16.msra.mxu0 %v15204_v55  ;;  %10802 = vmatprep.subr.bf16.mxu1 %v15205_v42 }
 0x6bd   :  { %10710 = vmatprep.subr.bf16.mxu0 %v15206_v28 }
 0x6bf   :  { %10804 = vmatpush1.bf16.msra.mxu1 %v15207_v53  ;;  %v4359_v53 = vpop.permute.xlu1 %4358 }
 0x6c0   :  { %10712 = vmatpush1.bf16.msra.mxu0 %v15208_v5  ;;  %10806 = vmatprep.subr.bf16.mxu1 %v15247_v1 }
 0x6c1   :  { %5148 = vmatprep.subr.mxu0 %v15248_v26  ;;  %v15260_v26 = vld [vmem:[#allocation20_spill] sm:$0xff] }
 0x6c3   :  { %10808 = vmatpush1.bf16.msra.mxu1 %v15249_v51 }
 0x6c4   :  { %5150 = vmatpush1.msra.mxu0 %v13324_v23  ;;  %5821 = vmatprep.subr.mxu1 %v13346_v48  ;;  %v5960_v23 = vsub.f32 %v5890_v0, %v13597_v14 }
 0x6c5   :  { %5199 = vmatmul.mubr.f32.vlgmr.msra.gmra.mrb[6].mxu0 %v12908_v32 }
 0x6c6   :  { %5958 = vmatprep.mubr.f32.mxu0 %v14989_v3  ;;  %v13600_v48 = vand.u32 4294901760, %v5960_v23 }
 0x6c7   :  { %5823 = vmatpush1.msra.mxu1 %v13357_v33 }
 0x6c8   :  { %5872 = vmatmul.mubr.f32.vlgmr.msra.gmra.mrb[6].mxu1 %v12908_v32  ;;  %v5962_v32 = vsub.f32 %v5960_v23, %v13600_v48 }
 0x6c9   :  { %6423 = vmatprep.mubr.f32.mxu1 %v14989_v3 }
 0x6ca   :  { %v5963_v42 = vand.u32 4294901760, %v5962_v32  ;;  %v15266_v32 = vld [vmem:[#allocation22_spill] sm:$0xff] }
 0x798   :  { %v5200_v28 = vpop.f32.mrb[6].mxu0 }
 0x799   :  { %v11013_v62 = vadd.f32 %v5200_v28, %v4359_v53  ;;  %v5202_v33 = vpop.f32.mrb[7].mxu0  ;;  %v15264_v28 = vld [vmem:[#allocation17_spill] sm:$0xff] }
 0x79a   :  { %v11014_v8 = vadd.f32 %v5202_v33, %v4359_v53  ;;  %v15265_v33 = vld [vmem:[#allocation13_spill] sm:$0xff] }
 0x79b   :  { %v5878_v10 = vmax.f32 %v11013_v62, 0.0  ;;  %v5873_v18 = vpop.f32.mrb[6].mxu1 }
 0x79c   :  { %v5879_v47 = vmax.f32 %v11014_v8, 0.0  ;;  %v11015_v43 = vadd.f32 %v5873_v18, %v4359_v53  ;;  %v5875_v57 = vpop.f32.mrb[7].mxu1  ;;  %v15267_v18 = vld [vmem:[#allocation26_spill] sm:$0xff] }
 0x79d   :  { %v5894_v4 = vand.u32 4294901760, %v5878_v10  ;;  %v11016_v30 = vadd.f32 %v5875_v57, %v4359_v53 }
 0x79e   :  { %v5892_v2 = vand.u32 4294901760, %v5879_v47  ;;  %v5880_v55 = vmax.f32 %v11015_v43, 0.0  ;;  %v15268_v43 = vld [vmem:[#allocation23_spill] sm:$0xff] }
 0x79f   :  { %v5977_v5 = vsub.f32 %v5878_v10, %v5894_v4  ;;  %v5881_v11 = vmax.f32 %v11016_v30, 0.0 }
 0x7a0   :  { %v5971_v50 = vsub.f32 %v5879_v47, %v5892_v2  ;;  %v6359_v27 = vand.u32 4294901760, %v5880_v55  ;;  %5893 = vmatprep.subr.mxu0 %v5892_v2 }
 0x7a1   :  { %v5978_v31 = vand.u32 4294901760, %v5977_v5  ;;  %v6357_v37 = vand.u32 4294901760, %v5881_v11  ;;  %5895 = vmatpush1.msra.mxu0 %v5894_v4 }
 0x7a2   :  { %v6442_v19 = vsub.f32 %v5880_v55, %v6359_v27  ;;  %5964 = vmatmul.mubr.f32.vlgmr.msra.gmra.mrb[8].mxu0 %v5963_v42  ;;  %v5972_v7 = vand.u32 4294901760, %v5971_v50 }
 0x7a3   :  { %v5979_v25 = vsub.f32 %v5977_v5, %v5978_v31  ;;  %v6436_v60 = vsub.f32 %v5881_v11, %v6357_v37  ;;  %6358 = vmatprep.subr.mxu1 %v6357_v37  ;;  %6044 = vmatprep.mubr.f32.mxu0 %v14989_v3  ;;  %v15272_v11 = vld [vmem:[#allocation5_spill] sm:$0xff] }
 0x7a4   :  { %v6443_v21 = vand.u32 4294901760, %v6442_v19  ;;  %6360 = vmatpush1.msra.mxu1 %v6359_v27  ;;  %v5973_v35 = vsub.f32 %v5971_v50, %v5972_v7 }
 0x7a5   :  { %6429 = vmatmul.mubr.f32.vlgmr.msra.gmra.mrb[8].mxu1 %v5963_v42  ;;  %v6437_v15 = vand.u32 4294901760, %v6436_v60  ;;  %v5980_v49 = vand.u32 4294901760, %v5979_v25  ;;  %v15271_v42 = vld [vmem:[#allocation29_spill] sm:$0xff] }
 0x7a6   :  { %v6444_v36 = vsub.f32 %v6442_v19, %v6443_v21  ;;  %v5974_v58 = vand.u32 4294901760, %v5973_v35  ;;  %6509 = vmatprep.mubr.f32.mxu1 %v14989_v3  ;;  %v15277_v35 = vld [vmem:[#allocation33_spill] sm:$0xff] }
 0x7a7   :  { %v6438_v29 = vsub.f32 %v6436_v60, %v6437_v15 }
 0x7a8   :  { %5975 = vmatprep.subr.mxu0 %v5974_v58  ;;  %v6445_v61 = vand.u32 4294901760, %v6444_v36  ;;  %v15278_v36 = vld [vmem:[#allocation9_spill] sm:$0xff] }
 0x7a9   :  { %5981 = vmatpush1.msra.mxu0 %v5980_v49  ;;  %v6439_v45 = vand.u32 4294901760, %v6438_v29  ;;  %v15279_v49 = vld [vmem:[#allocation32_spill] sm:$0xff] }
 0x7aa   :  { %6046 = vmatmul.mubr.f32.vlgmr.msra.gmra.mrb[8].mxu0 %v13597_v14  ;;  %6054 = vmatprep.subr.mxu0 %v5971_v50 }
 0x7ab   :  { %6057 = vmatpush1.msra.mxu0 %v5977_v5  ;;  %6440 = vmatprep.subr.mxu1 %v6439_v45  ;;  %v15280_v45 = vld [vmem:[#allocation2_spill] sm:$0xff] }
 0x7ac   :  { %6130 = vmatprep.subr.mxu0 %v5892_v2  ;;  %6446 = vmatpush1.msra.mxu1 %v6445_v61 }
 0x7ad   :  { %6511 = vmatmul.mubr.f32.vlgmr.msra.gmra.mrb[8].mxu1 %v13597_v14  ;;  %6519 = vmatprep.subr.mxu1 %v6436_v60  ;;  %v15276_v60 = vld [vmem:[#allocation15_spill] sm:$0xff] }
 0x7ae   :  { %6522 = vmatpush1.msra.mxu1 %v6442_v19  ;;  %6120 = vmatprep.mubr.f32.mxu0 %v14989_v3 }
 0x7af   :  { %6595 = vmatprep.subr.mxu1 %v6357_v37  ;;  %6585 = vmatprep.mubr.f32.mxu1 %v14989_v3 }
 0x7b2   :  { %6123 = vmatmul.mubr.f32.vlgmr.msra.gmra.mrb[8].mxu0 %v5960_v23 }
 0x7b3   :  { %6132 = vmatpush1.msra.mxu0 %v5894_v4  ;;  %6195 = vmatprep.mubr.f32.mxu0 %v14989_v3 }
 0x7b4   :  { %6208 = vmatprep.subr.mxu0 %v5972_v7  ;;  %v15275_v7 = vld [vmem:[#allocation31_spill] sm:$0xff] }
 0x7b5   :  { %6588 = vmatmul.mubr.f32.vlgmr.msra.gmra.mrb[8].mxu1 %v5960_v23 }
 0x7b6   :  { %6597 = vmatpush1.msra.mxu1 %v6359_v27  ;;  %6660 = vmatprep.mubr.f32.mxu1 %v14989_v3 }
 0x7b7   :  { %6673 = vmatprep.subr.mxu1 %v6437_v15 }
 0x7ba   :  { %6199 = vmatmul.mubr.f32.vlgmr.msra.gmra.mrb[8].mxu0 %v13600_v48 }
 0x7bb   :  { %6212 = vmatpush1.msra.mxu0 %v5978_v31  ;;  %6275 = vmatprep.mubr.f32.mxu0 %v14989_v3 }
 0x7bc   :  { %6284 = vmatprep.subr.mxu0 %v5892_v2  ;;  %v15270_v2 = vld [vmem:[#allocation8_spill] sm:$0xff] }
 0x7bd   :  { %6664 = vmatmul.mubr.f32.vlgmr.msra.gmra.mrb[8].mxu1 %v13600_v48  ;;  %v15263_v48 = vld [vmem:[#allocation4_spill] sm:$0xff] }
 0x7be   :  { %6677 = vmatpush1.msra.mxu1 %v6443_v21  ;;  %6740 = vmatprep.mubr.f32.mxu1 %v14989_v3 }
 0x7bf   :  { %6749 = vmatprep.subr.mxu1 %v6357_v37  ;;  %v15274_v37 = vld [vmem:[#allocation11_spill] sm:$0xff] }
 0x7c2   :  { %6277 = vmatmul.mubr.f32.vlgmr.msra.gmra.mrb[8].mxu0 %v13597_v14 }
 0x7c3   :  { %6286 = vmatpush1.msra.mxu0 %v5894_v4  ;;  %6349 = vmatprep.mubr.f32.mxu0 %v14989_v3  ;;  %v15269_v4 = vld [vmem:[#allocation6_spill] sm:$0xff] }
 0x7c5   :  { %6742 = vmatmul.mubr.f32.vlgmr.msra.gmra.mrb[8].mxu1 %v13597_v14 }
 0x7c6   :  { %6751 = vmatpush1.msra.mxu1 %v6359_v27  ;;  %6814 = vmatprep.mubr.f32.mxu1 %v14989_v3  ;;  %v15273_v27 = vld [vmem:[#allocation30_spill] sm:$0xff] }
 0x7ca   :  { %6351 = vmatmul.mubr.f32.vlgmr.msra.gmra.mrb[8].mxu0 %v13597_v14 }
 0x7cb   :  { %7241 = vmatprep.mubr.f32.mxu0 %v14989_v3 }
 0x7cd   :  { %6816 = vmatmul.mubr.f32.vlgmr.msra.gmra.mrb[8].mxu1 %v13597_v14  ;;  %v15262_v14 = vld [vmem:[#allocation19_spill] sm:$0xff] }
 0x7ce   :  { %7914 = vmatprep.mubr.f32.mxu1 %v14989_v3 }
 0x89d   :  { %v6352_v41 = vpop.f32.mrb[8].mxu0 }
 0x89e   :  { %v11017_v52 = vadd.f32 %v6352_v41, %v5887_v39  ;;  %v6354_v6 = vpop.f32.mrb[9].mxu0 }
 0x89f   :  { %v11018_v16 = vadd.f32 %v6354_v6, %v5887_v39 }
 0x8a0   :  { %v13624_v44 = vadd.f32 %v11017_v52, %v15250_v56  ;;  %v6817_v38 = vpop.f32.mrb[8].mxu1  ;;  %v15282_v52 = vld [vmem:[#allocation10_spill] sm:$0xff] }
 0x8a1   :  { %v13627_v9 = vadd.f32 %v11018_v16, %v15252_v54  ;;  %v11019_v63 = vadd.f32 %v6817_v38, %v5887_v39  ;;  %v6819_v46 = vpop.f32.mrb[9].mxu1  ;;  %v15283_v16 = vld [vmem:[#allocation36_spill] sm:$0xff]  ;;  %v15284_v38 = vld [vmem:[#allocation3_spill] sm:$0xff] }
 0x8a2   :  { %15251 = vst [vmem:[#allocation58_spill] sm:$0xff] %v13624_v44  ;;  %v11020_v12 = vadd.f32 %v6819_v46, %v5887_v39  ;;  %6910 = vrot.lane.b32.xlu1 %v13624_v44, %s11232_s27  ;;  %v6830_v24 = vmul.f32 %v13624_v44, %v15258_v22  ;;  %v6834_v23 = vmul.f32 %v13624_v44, %v15262_v14  ;;  %v15281_v39 = vld [vmem:[#allocation34_spill] sm:$0xff] }
 0x8a3   :  { %15253 = vst [vmem:[#allocation63_spill] sm:$0xff] %v13627_v9  ;;  %v13632_v20 = vadd.f32 %v11019_v63, %v15254_v59  ;;  %6912 = vrot.lane.b32.xlu0 %v13627_v9, %s11232_s27  ;;  %v6831_v1 = vmul.f32 %v13627_v9, %v15259_v40  ;;  %v6835_v53 = vmul.f32 %v13627_v9, %v15263_v48  ;;  %v15285_v63 = vld [vmem:[#allocation37_spill] sm:$0xff] }
 0x8a4   :  { %v13637_v34 = vadd.f32 %v11020_v12, %v15256_v17  ;;  %v6838_v10 = vmul.f32 %v13624_v44, %v15266_v32  ;;  %v6839_v47 = vmul.f32 %v13627_v9, %v15267_v18  ;;  %v6842_v55 = vmul.f32 %v13624_v44, %v15270_v2  ;;  %v15286_v12 = vld [vmem:[#allocation25_spill] sm:$0xff]  ;;  %v15287_v17 = vld [vmem:[#allocation35_spill] sm:$0xff] }
 0x8a5   :  { %15255 = vst [vmem:[#allocation56_spill] sm:$0xff] %v13632_v20  ;;  %v6832_v51 = vmul.f32 %v13632_v20, %v15260_v26  ;;  %v6836_v62 = vmul.f32 %v13632_v20, %v15264_v28  ;;  %v6840_v57 = vmul.f32 %v13632_v20, %v15268_v43  ;;  %v6843_v5 = vmul.f32 %v13627_v9, %v15271_v42 }
 0x8a6   :  { %15257 = vst [vmem:[#allocation65_spill] sm:$0xff] %v13637_v34  ;;  %6914 = vrot.lane.b32.xlu1 %v13632_v20, %s11232_s27  ;;  %v6833_v0 = vmul.f32 %v13637_v34, %v15261_v13  ;;  %v6837_v8 = vmul.f32 %v13637_v34, %v15265_v33  ;;  %v6841_v30 = vmul.f32 %v13637_v34, %v15269_v4 }
 0x8a7   :  { %6916 = vrot.lane.b32.xlu0 %v13637_v34, %s11232_s27  ;;  %v6844_v50 = vmul.f32 %v13632_v20, %v15272_v11  ;;  %v6845_v31 = vmul.f32 %v13637_v34, %v15273_v27  ;;  %v6846_v19 = vmul.f32 %v13624_v44, %v15274_v37  ;;  %v6847_v25 = vmul.f32 %v13627_v9, %v15275_v7 }
 0x8a8   :  { %v6848_v21 = vmul.f32 %v13632_v20, %v15276_v60  ;;  %v6849_v15 = vmul.f32 %v13637_v34, %v15277_v35  ;;  %v6850_v58 = vmul.f32 %v13624_v44, %v15278_v36  ;;  %v6851_v29 = vmul.f32 %v13627_v9, %v15279_v49  ;;  %v15292_v35 = vld [vmem:[#allocation41_spill] sm:$0xff] }
 0x8a9   :  { %v6852_v61 = vmul.f32 %v13632_v20, %v15280_v45  ;;  %v6853_v41 = vmul.f32 %v13637_v34, %v15281_v39  ;;  %v6854_v6 = vmul.f32 %v13624_v44, %v15282_v52  ;;  %v6855_v56 = vmul.f32 %v13627_v9, %v15283_v16 }
 0x8aa   :  { %6862 = vrot.lane.b32.xlu1 %v6830_v24, %s11228_s1  ;;  %v6856_v54 = vmul.f32 %v13632_v20, %v15284_v38  ;;  %v6857_v46 = vmul.f32 %v13637_v34, %v15285_v63  ;;  %v6826_v59 = vmul.f32 %v13624_v44, %v15286_v12  ;;  %v6827_v22 = vmul.f32 %v13627_v9, %v15287_v17  ;;  %v15288_v24 = vld [vmem:[#allocation27_spill] sm:$0xff]  ;;  %v15293_v12 = vld [vmem:[#allocation40_spill] sm:$0xff] }
 0x8ab   :  { %6864 = vrot.lane.b32.xlu0 %v6831_v1, %s11228_s1  ;;  %v6828_v40 = vmul.f32 %v13632_v20, %v15288_v24  ;;  %v15289_v1 = vld [vmem:[#allocation24_spill] sm:$0xff] }
 0x8ac   :  { %v6829_v26 = vmul.f32 %v13637_v34, %v15289_v1 }
 0x8ae   :  { %6866 = vrot.lane.b32.xlu1 %v6832_v51, %s11228_s1 }
 0x8af   :  { %6868 = vrot.lane.b32.xlu0 %v6833_v0, %s11228_s1 }
 0x8b2   :  { %6878 = vrot.lane.b32.xlu1 %v6834_v23, %s11240_s2 }
 0x8b3   :  { %6880 = vrot.lane.b32.xlu0 %v6835_v53, %s11240_s2 }
 0x8b6   :  { %6882 = vrot.lane.b32.xlu1 %v6836_v62, %s11240_s2 }
 0x8b7   :  { %6884 = vrot.lane.b32.xlu0 %v6837_v8, %s11240_s2 }
 0x8ba   :  { %6894 = vrot.lane.b32.xlu1 %v6838_v10, %s11230_s3 }
 0x8bb   :  { %6896 = vrot.lane.b32.xlu0 %v6839_v47, %s11230_s3 }
 0x8be   :  { %6898 = vrot.lane.b32.xlu1 %v6840_v57, %s11230_s3 }
 0x8bf   :  { %6900 = vrot.lane.b32.xlu0 %v6841_v30, %s11230_s3 }
 0x8c2   :  { %6925 = vrot.lane.b32.xlu1 %v6842_v55, %s11241_s7 }
 0x8c3   :  { %6927 = vrot.lane.b32.xlu0 %v6843_v5, %s11241_s7  ;;  %v15290_v5 = vld [vmem:[#allocation38_spill] sm:$0xff] }
 0x8c6   :  { %6929 = vrot.lane.b32.xlu1 %v6844_v50, %s11241_s7 }
 0x8c7   :  { %6931 = vrot.lane.b32.xlu0 %v6845_v31, %s11241_s7  ;;  %v15291_v31 = vld [vmem:[#allocation39_spill] sm:$0xff] }
 0x8ca   :  { %6941 = vrot.lane.b32.xlu1 %v6846_v19, %s11242_s0 }
 0x8cb   :  { %6943 = vrot.lane.b32.xlu0 %v6847_v25, %s11242_s0 }
 0x8ce   :  { %6945 = vrot.lane.b32.xlu1 %v6848_v21, %s11242_s0 }
 0x8cf   :  { %6947 = vrot.lane.b32.xlu0 %v6849_v15, %s11242_s0 }
 0x8d2   :  { %6957 = vrot.lane.b32.xlu1 %v6850_v58, %s11243_s22 }
 0x8d3   :  { %6959 = vrot.lane.b32.xlu0 %v6851_v29, %s11243_s22 }
 0x8d6   :  { %6961 = vrot.lane.b32.xlu1 %v6852_v61, %s11243_s22 }
 0x8d7   :  { %6963 = vrot.lane.b32.xlu0 %v6853_v41, %s11243_s22 }
 0x8da   :  { %6973 = vrot.lane.b32.xlu1 %v6854_v6, %s11244_s23 }
 0x8db   :  { %6975 = vrot.lane.b32.xlu0 %v6855_v56, %s11244_s23 }
 0x8de   :  { %6977 = vrot.lane.b32.xlu1 %v6856_v54, %s11244_s23 }
 0x8df   :  { %6979 = vrot.lane.b32.xlu0 %v6857_v46, %s11244_s23 }
 0x8e2   :  { %6996 = vrot.lane.b32.xlu1 %v6826_v59, %s11239_s21 }
 0x8e3   :  { %6998 = vrot.lane.b32.xlu0 %v6827_v22, %s11239_s21 }
 0x8e6   :  { %7000 = vrot.lane.b32.xlu1 %v6828_v40, %s11239_s21 }
 0x8e7   :  { %7002 = vrot.lane.b32.xlu0 %v6829_v26, %s11239_s21  ;;  %v15294_v26 = vld [vmem:[#allocation43_spill] sm:$0xff] }
 0x914   :  { %v6911_v51 = vpop.permute.xlu1 %6910 }
 0x915   :  { %v6913_v13 = vpop.permute.xlu0 %6912  ;;  %7034 = vrot.lane.b32.xlu0 %v6911_v51, %s11239_s21 }
 0x916   :  { %v6918_v0 = vsel %vm526_vm12, %v6911_v51, %v6913_v13 }
 0x918   :  { %v6915_v14 = vpop.permute.xlu1 %6914 }
 0x919   :  { %v6917_v23 = vpop.permute.xlu0 %6916  ;;  %7036 = vrot.lane.b32.xlu0 %v6918_v0, %s11239_s21  ;;  %v6919_v28 = vsel %vm526_vm12, %v6913_v13, %v6915_v14 }
 0x91a   :  { %7042 = vrot.lane.b32.xlu1 %v6917_v23, %s11239_s21  ;;  %v6920_v48 = vsel %vm526_vm12, %v6915_v14, %v6917_v23 }
 0x91c   :  { %v6863_v53 = vpop.permute.xlu1 %6862 }
 0x91d   :  { %7040 = vrot.lane.b32.xlu0 %v6920_v48, %s11239_s21  ;;  %v6865_v8 = vpop.permute.xlu0 %6864  ;;  %v6870_v37 = vsel %vm427_vm8, %v15291_v31, %v6863_v53 }
 0x91e   :  { %7038 = vrot.lane.b32.xlu1 %v6919_v28, %s11239_s21  ;;  %v6871_v49 = vsel %vm427_vm8, %v6863_v53, %v6865_v8  ;;  %v15295_v53 = vld [vmem:[#allocation42_spill] sm:$0xff] }
 0x920   :  { %v6867_v62 = vpop.permute.xlu1 %6866 }
 0x921   :  { %v6869_v18 = vpop.permute.xlu0 %6868  ;;  %v6872_v19 = vsel %vm427_vm8, %v6865_v8, %v6867_v62  ;;  %v15296_v8 = vld [vmem:[#allocation45_spill] sm:$0xff] }
 0x922   :  { %v6873_v45 = vsel %vm427_vm8, %v6867_v62, %v6869_v18  ;;  %v8510_v62 = vld [vmem:[%s14661_s16] sm:$0xff] }
 0x924   :  { %v6879_v33 = vpop.permute.xlu1 %6878 }
 0x925   :  { %v6881_v43 = vpop.permute.xlu0 %6880  ;;  %v6886_v11 = vsel %vm4236_vm4, %v15290_v5, %v6879_v33 }
 0x926   :  { %v6887_v25 = vsel %vm4236_vm4, %v6879_v33, %v6881_v43 }
 0x928   :  { %v6883_v32 = vpop.permute.xlu1 %6882 }
 0x929   :  { %v6885_v30 = vpop.permute.xlu0 %6884  ;;  %v6888_v41 = vsel %vm4236_vm4, %v6881_v43, %v6883_v32 }
 0x92a   :  { %v6889_v60 = vsel %vm4236_vm4, %v6883_v32, %v6885_v30 }
 0x92c   :  { %v6895_v10 = vpop.permute.xlu1 %6894 }
 0x92d   :  { %v6897_v55 = vpop.permute.xlu0 %6896  ;;  %v6902_v15 = vsel %vm486_vm10, %v15292_v35, %v6895_v10 }
 0x92e   :  { %v6903_v36 = vsel %vm486_vm10, %v6895_v10, %v6897_v55  ;;  %v6986_v10 = vld [vmem:[%s14662_s14] sm:$0xff] }
 0x930   :  { %v6899_v47 = vpop.permute.xlu1 %6898 }
 0x931   :  { %v6901_v27 = vpop.permute.xlu0 %6900  ;;  %v6904_v16 = vsel %vm486_vm10, %v6897_v55, %v6899_v47 }
 0x932   :  { %v6905_v29 = vsel %vm486_vm10, %v6899_v47, %v6901_v27 }
 0x934   :  { %v6926_v57 = vpop.permute.xlu1 %6925 }
 0x935   :  { %7044 = vrot.lane.b32.xlu1 %v6926_v57, %s11239_s21  ;;  %v6928_v7 = vpop.permute.xlu0 %6927 }
 0x936   :  { %v6933_v61 = vsel %vm4290_vm5, %v6926_v57, %v6928_v7 }
 0x938   :  { %v6930_v4 = vpop.permute.xlu1 %6929 }
 0x939   :  { %v6932_v21 = vpop.permute.xlu0 %6931  ;;  %v6934_v38 = vsel %vm4290_vm5, %v6928_v7, %v6930_v4 }
 0x93a   :  { %v6935_v52 = vsel %vm4290_vm5, %v6930_v4, %v6932_v21  ;;  %v6936_v59 = vsel %vm4290_vm5, %v6932_v21, %v15293_v12 }
 0x93c   :  { %v6942_v2 = vpop.permute.xlu1 %6941 }
 0x93d   :  { %7054 = vrot.lane.b32.xlu0 %v6942_v2, %s11239_s21  ;;  %v6944_v58 = vpop.permute.xlu0 %6943 }
 0x93e   :  { %v6949_v56 = vsel %vm687_vm13, %v6942_v2, %v6944_v58 }
 0x940   :  { %v6946_v42 = vpop.permute.xlu1 %6945 }
 0x941   :  { %7012 = vrot.lane.b32.xlu0 %v6869_v18, %s11239_s21  ;;  %v6948_v39 = vpop.permute.xlu0 %6947  ;;  %v6950_v40 = vsel %vm687_vm13, %v6944_v58, %v6946_v42  ;;  %v9454_v18 = vld [vmem:[%s14663_s18] sm:$0xff] }
 0x942   :  { %v6951_v54 = vsel %vm687_vm13, %v6946_v42, %v6948_v39  ;;  %v6952_v51 = vsel %vm687_vm13, %v6948_v39, %v15294_v26 }
 0x944   :  { %v6958_v50 = vpop.permute.xlu1 %6957 }
 0x945   :  { %7014 = vrot.lane.b32.xlu0 %v6886_v11, %s11239_s21  ;;  %7064 = vrot.lane.b32.xlu1 %v6958_v50, %s11239_s21  ;;  %v6960_v6 = vpop.permute.xlu0 %6959 }
 0x946   :  { %v6965_v17 = vsel %vm4329_vm6, %v6958_v50, %v6960_v6 }
 0x948   :  { %v6962_v63 = vpop.permute.xlu1 %6961 }
 0x949   :  { %7008 = vrot.lane.b32.xlu0 %v6872_v19, %s11239_s21  ;;  %7004 = vrot.lane.b32.xlu1 %v6870_v37, %s11239_s21  ;;  %v6964_v46 = vpop.permute.xlu0 %6963  ;;  %v6966_v23 = vsel %vm4329_vm6, %v6960_v6, %v6962_v63 }
 0x94a   :  { %v6967_v1 = vsel %vm4329_vm6, %v6962_v63, %v6964_v46  ;;  %v6968_v28 = vsel %vm4329_vm6, %v6964_v46, %v15295_v53 }
 0x94c   :  { %v6974_v22 = vpop.permute.xlu1 %6973 }
 0x94d   :  { %7016 = vrot.lane.b32.xlu0 %v6887_v25, %s11239_s21  ;;  %7022 = vrot.lane.b32.xlu1 %v6885_v30, %s11239_s21  ;;  %v6976_v24 = vpop.permute.xlu0 %6975  ;;  %v15297_v25 = vld [vmem:[#allocation44_spill] sm:$0xff] }
 0x94e   :  { %v6981_v13 = vsel %vm4349_vm7, %v6974_v22, %v6976_v24 }
 0x950   :  { %v6978_v0 = vpop.permute.xlu1 %6977 }
 0x951   :  { %7020 = vrot.lane.b32.xlu0 %v6889_v60, %s11239_s21  ;;  %7032 = vrot.lane.b32.xlu1 %v6901_v27, %s11239_s21  ;;  %v6980_v14 = vpop.permute.xlu0 %6979  ;;  %v6982_v33 = vsel %vm4349_vm7, %v6976_v24, %v6978_v0 }
 0x952   :  { %v6983_v48 = vsel %vm4349_vm7, %v6978_v0, %v6980_v14  ;;  %v6984_v32 = vsel %vm4349_vm7, %v6980_v14, %v15296_v8 }
 0x954   :  { %v6997_v57 = vpop.permute.xlu1 %6996 }
 0x955   :  { %7026 = vrot.lane.b32.xlu0 %v6903_v36, %s11239_s21  ;;  %7024 = vrot.lane.b32.xlu1 %v6902_v15, %s11239_s21  ;;  %v6999_v47 = vpop.permute.xlu0 %6998  ;;  %v7084_v60 = vsel %vm4188_vm2, %v15297_v25, %v6997_v57 }
 0x956   :  { %v7085_v21 = vsel %vm4188_vm2, %v6997_v57, %v6999_v47  ;;  %v7161_v58 = vand.u32 4294901760, %v7084_v60 }
 0x958   :  { %v7001_v30 = vpop.permute.xlu1 %7000 }
 0x959   :  { %7030 = vrot.lane.b32.xlu0 %v6905_v29, %s11239_s21  ;;  %7006 = vrot.lane.b32.xlu1 %v6871_v49, %s11239_s21  ;;  %v7003_v43 = vpop.permute.xlu0 %7002  ;;  %v13838_v35 = vsel %vm4188_vm2, %v6999_v47, %v7001_v30  ;;  %v7159_v49 = vand.u32 4294901760, %v7085_v21 }
 0x95a   :  { %v7834_v29 = vand.u32 4294901760, %v13838_v35 }
 0x95d   :  { %7046 = vrot.lane.b32.xlu0 %v6933_v61, %s11239_s21  ;;  %7010 = vrot.lane.b32.xlu1 %v6873_v45, %s11239_s21  ;;  %v13844_v45 = vsel %vm4188_vm2, %v7001_v30, %v7003_v43 }
 0x95e   :  { %v7832_v6 = vand.u32 4294901760, %v13844_v45 }
 0x961   :  { %7050 = vrot.lane.b32.xlu0 %v6935_v52, %s11239_s21  ;;  %7018 = vrot.lane.b32.xlu1 %v6888_v41, %s11239_s21  ;;  %v6985_v41 = vld [vmem:[%s14664_s13] sm:$0xff]  ;;  %v13851_v52 = vsub.f32 %v7084_v60, %v7161_v58 }
 0x965   :  { %7056 = vrot.lane.b32.xlu0 %v6949_v56, %s11239_s21  ;;  %7028 = vrot.lane.b32.xlu1 %v6904_v16, %s11239_s21  ;;  %v13854_v16 = vsub.f32 %v7085_v21, %v7159_v49  ;;  %v13859_v56 = vsub.f32 %v13838_v35, %v7834_v29 }
 0x969   :  { %7060 = vrot.lane.b32.xlu0 %v6951_v54, %s11239_s21  ;;  %7048 = vrot.lane.b32.xlu1 %v6934_v38, %s11239_s21  ;;  %v7157_v38 = vsel %vm4528_vm9, %v6985_v41, 0 }
 0x96a   :  { %v13879_v24 = vand.u32 4294901760, %v7157_v38 }
 0x96c   :  { %v13905_v8 = vsub.f32 %v7157_v38, %v13879_v24 }
 0x96d   :  { %7066 = vrot.lane.b32.xlu0 %v6965_v17, %s11239_s21  ;;  %7052 = vrot.lane.b32.xlu1 %v6936_v59, %s11239_s21  ;;  %v14854_v59 = vand.u32 4294901760, %v13851_v52  ;;  %v13874_v17 = vsub.f32 %v13844_v45, %v7832_v6 }
 0x96e   :  { %15298 = vst [vmem:[#allocation68_spill] sm:$0xff] %v13905_v8  ;;  %v13954_v60 = vand.u32 4294901760, %v13905_v8 }
 0x970   :  { %15304 = vst [vmem:[#allocation69_spill] sm:$0xff] %v13954_v60 }
 0x971   :  { %7070 = vrot.lane.b32.xlu0 %v6967_v1, %s11239_s21  ;;  %7058 = vrot.lane.b32.xlu1 %v6950_v40, %s11239_s21  ;;  %v14855_v40 = vand.u32 4294901760, %v13854_v16  ;;  %v14852_v1 = vand.u32 4294901760, %v13859_v56 }
 0x973   :  { %v13920_v47 = vsub.f32 %v13854_v16, %v14855_v40 }
 0x975   :  { %7076 = vrot.lane.b32.xlu0 %v6981_v13, %s11239_s21  ;;  %7062 = vrot.lane.b32.xlu1 %v6952_v51, %s11239_s21 }
 0x979   :  { %7080 = vrot.lane.b32.xlu0 %v6983_v48, %s11239_s21  ;;  %7068 = vrot.lane.b32.xlu1 %v6966_v23, %s11239_s21 }
 0x97d   :  { %7074 = vrot.lane.b32.xlu0 %v6974_v22, %s11239_s21  ;;  %7072 = vrot.lane.b32.xlu1 %v6968_v28, %s11239_s21  ;;  %v13900_v28 = vsub.f32 %v13851_v52, %v14854_v59 }
 0x981   :  { %8513 = vperm.xlu0 %11219, %v8510_v62   ;;  %7078 = vrot.lane.b32.xlu1 %v6982_v33, %s11239_s21  ;;  %v14853_v62 = vand.u32 4294901760, %v13874_v17 }
 0x983   :  { %v13959_v21 = vsub.f32 %v13874_v17, %v14853_v62 }
 0x985   :  { %7082 = vrot.lane.b32.xlu1 %v6984_v32, %s11239_s21  ;;  %v13910_v32 = vsub.f32 %v13859_v56, %v14852_v1 }
 0x987   :  { %v7035_v4 = vpop.permute.xlu0 %7034 }
 0x989   :  { %6989 = vperm.xlu1 %11218, %v6986_v10  }
 0x98b   :  { %v7037_v2 = vpop.permute.xlu0 %7036 }
 0x98c   :  { %v7043_v55 = vpop.permute.xlu1 %7042  ;;  %v13865_v46 = vsel %vm4188_vm2, %v7035_v4, %v7037_v2 }
 0x98d   :  { %9457 = vperm.xlu1 %11218, %v9454_v18   ;;  %v14858_v26 = vand.u32 4294901760, %v13865_v46 }
 0x98f   :  { %v7041_v42 = vpop.permute.xlu0 %7040  ;;  %v13925_v43 = vsub.f32 %v13865_v46, %v14858_v26 }
 0x990   :  { %v7039_v5 = vpop.permute.xlu1 %7038  ;;  %v13868_v12 = vsel %vm4188_vm2, %v7041_v42, %v7043_v55 }
 0x991   :  { %v13877_v22 = vsel %vm4188_vm2, %v7037_v2, %v7039_v5  ;;  %v14857_v51 = vand.u32 4294901760, %v13868_v12  ;;  %v13888_v14 = vsel %vm4188_vm2, %v7039_v5, %v7041_v42  ;;  %15299 = vst [vmem:[#allocation48_spill] sm:$0xff] %v13925_v43  ;;  %v14862_v38 = vand.u32 4294901760, %v13925_v43 }
 0x992   :  { %v14859_v23 = vand.u32 4294901760, %v13877_v22  ;;  %v14856_v57 = vand.u32 4294901760, %v13888_v14 }
 0x993   :  { %v13939_v42 = vsub.f32 %v13868_v12, %v14857_v51 }
 0x994   :  { %v13944_v5 = vsub.f32 %v13877_v22, %v14859_v23 }
 0x995   :  { %15301 = vst [vmem:[#allocation50_spill] sm:$0xff] %v13939_v42 }
 0x996   :  { %15302 = vst [vmem:[#allocation52_spill] sm:$0xff] %v13944_v5  ;;  %v14864_v59 = vand.u32 4294901760, %v13944_v5 }
 0x9a7   :  { %v13828_v50 = vpop.permute.xlu1 %7044 }
 0x9af   :  { %v13826_v11 = vpop.permute.xlu0 %7054 }
 0x9b3   :  { %v13830_v27 = vpop.permute.xlu0 %7012 }
 0x9b7   :  { %v7015_v31 = vpop.permute.xlu0 %7014  ;;  %v13832_v37 = vpop.permute.xlu1 %7064 }
 0x9bb   :  { %v7009_v19 = vpop.permute.xlu0 %7008  ;;  %v7005_v7 = vpop.permute.xlu1 %7004 }
 0x9bf   :  { %v13840_v15 = vpop.permute.xlu0 %7016  ;;  %v7023_v36 = vpop.permute.xlu1 %7022 }
 0x9c0   :  { %v13914_v10 = vsel %vm4188_vm2, %v7015_v31, %v13840_v15 }
 0x9c1   :  { %v14861_v25 = vand.u32 4294901760, %v13914_v10 }
 0x9c3   :  { %v13846_v61 = vpop.permute.xlu0 %7020  ;;  %v7033_v39 = vpop.permute.xlu1 %7032  ;;  %v13988_v41 = vsub.f32 %v13914_v10, %v14861_v25 }
 0x9c4   :  { %v7095_v4 = vsel %vm4188_vm2, %v13846_v61, %v7023_v36 }
 0x9c5   :  { %v7840_v36 = vand.u32 4294901760, %v7095_v4  ;;  %15306 = vst [vmem:[#allocation47_spill] sm:$0xff] %v13988_v41 }
 0x9c7   :  { %v13862_v54 = vpop.permute.xlu0 %7026  ;;  %v7025_v63 = vpop.permute.xlu1 %7024  ;;  %v13994_v23 = vsub.f32 %v7095_v4, %v7840_v36 }
 0x9c9   :  { %15307 = vst [vmem:[#allocation55_spill] sm:$0xff] %v13994_v23 }
 0x9cb   :  { %v13885_v13 = vpop.permute.xlu0 %7030  ;;  %v7007_v0 = vpop.permute.xlu1 %7006 }
 0x9cc   :  { %v13892_v48 = vsel %vm4188_vm2, %v7005_v7, %v7007_v0  ;;  %v13895_v53 = vsel %vm4188_vm2, %v7007_v0, %v7009_v19  ;;  %v13976_v0 = vsub.f32 %v13888_v14, %v14856_v57  ;;  %v7096_v57 = vsel %vm4188_vm2, %v7025_v63, %v13862_v54 }
 0x9cd   :  { %v14860_v33 = vand.u32 4294901760, %v13895_v53  ;;  %v7165_v18 = vand.u32 4294901760, %v13892_v48  ;;  %v14010_v63 = vsub.f32 %v13925_v43, %v14862_v38  ;;  %v7173_v25 = vand.u32 4294901760, %v7096_v57 }
 0x9ce   :  { %15305 = vst [vmem:[#allocation53_spill] sm:$0xff] %v13976_v0  ;;  %v14030_v38 = vsub.f32 %v13944_v5, %v14864_v59 }
 0x9cf   :  { %v13930_v30 = vpop.permute.xlu0 %7046  ;;  %v7011_v2 = vpop.permute.xlu1 %7010  ;;  %v13934_v55 = vpack.c.bf16 %v14860_v33, %v7159_v49  ;;  %v13946_v31 = vpack.c.bf16 %v7165_v18, %v7161_v58  ;;  %v13963_v58 = vsel %vm4188_vm2, %v13885_v13, %v7033_v39  ;;  %v7245_v33 = vsub.f32 %v13905_v8, %v13954_v60 }
 0x9d0   :  { %v13949_v7 = vsel %vm4188_vm2, %v7009_v19, %v7011_v2  ;;  %v13967_v19 = vsel %vm4188_vm2, %v7011_v2, %v13830_v27  ;;  %v14866_v2 = vand.u32 4294901760, %v13939_v42  ;;  %v13999_v27 = vsel %vm4188_vm2, %v13828_v50, %v13930_v30 }
 0x9d1   :  { %15300 = vst [vmem:[#allocation61_spill] sm:$0xff] %v13934_v55  ;;  %15303 = vst [vmem:[#allocation70_spill] sm:$0xff] %v13946_v31  ;;  %10810 = vmatprep.subr.bf16.mxu0 %v13934_v55  ;;  %v7838_v49 = vand.u32 4294901760, %v13949_v7  ;;  %v14863_v39 = vand.u32 4294901760, %v13967_v19  ;;  %v14052_v9 = vsub.f32 %v13892_v48, %v7165_v18  ;;  %v14065_v59 = vsub.f32 %v7096_v57, %v7173_v25 }
 0x9d2   :  { %10812 = vmatpush1.bf16.msra.mxu0 %v13946_v31  ;;  %v14035_v45 = vsub.f32 %v13939_v42, %v14866_v2  ;;  %v15315_v18 = vand.u32 4294901760, %v13988_v41  ;;  %v15334_v42 = vand.u32 4294901760, %v13967_v19 }
 0x9d3   :  { %v13979_v1 = vpop.permute.xlu0 %7050  ;;  %v7019_v62 = vpop.permute.xlu1 %7018  ;;  %v14003_v40 = vpack.c.bf16 %v7838_v49, %v7834_v29  ;;  %v14019_v50 = vpack.c.bf16 %v14863_v39, %v7832_v6  ;;  %v7181_v6 = vand.u32 4294901760, %v13999_v27  ;;  %v15310_v39 = vand.u32 4294901760, %v13963_v58  ;;  %15313 = vst [vmem:[#allocation60_spill] sm:$0xff] %v14065_v59 }
 0x9d4   :  { %v7094_v26 = vsel %vm4188_vm2, %v7019_v62, %v13846_v61  ;;  %v7093_v34 = vsel %vm4188_vm2, %v13840_v15, %v7019_v62  ;;  %v15312_v15 = vand.u32 4294901760, %v13976_v0  ;;  %v14076_v44 = vsub.f32 %v13988_v41, %v15315_v18 }
 0x9d5   :  { %15308 = vst [vmem:[#allocation59_spill] sm:$0xff] %v14003_v40  ;;  %15309 = vst [vmem:[#allocation46_spill] sm:$0xff] %v14019_v50  ;;  %10906 = vmatprep.subr.bf16.mxu1 %v14019_v50  ;;  %v7842_v2 = vand.u32 4294901760, %v7094_v26  ;;  %v7167_v60 = vand.u32 4294901760, %v7093_v34  ;;  %v15324_v8 = vand.u32 4294901760, %v14052_v9 }
 0x9d6   :  { %10908 = vmatpush1.bf16.msra.mxu1 %v14003_v40  ;;  %v14063_v62 = vsub.f32 %v13976_v0, %v15312_v15  ;;  %v14087_v15 = vsub.f32 %v13949_v7, %v7838_v49 }
 0x9d7   :  { %v14021_v35 = vpop.permute.xlu0 %7056  ;;  %v7029_v29 = vpop.permute.xlu1 %7028  ;;  %v14098_v50 = vsub.f32 %v7094_v26, %v7842_v2  ;;  %v15328_v26 = vand.u32 4294901760, %v13963_v58 }
 0x9d8   :  { %v14025_v51 = vsel %vm4188_vm2, %v13862_v54, %v7029_v29  ;;  %v14042_v54 = vpack.c.bf16 %v15310_v39, %v7840_v36  ;;  %v7098_v4 = vsel %vm4188_vm2, %v7029_v29, %v13885_v13  ;;  %v14058_v29 = vand.u32 4294901760, %v7245_v33 }
 0x9d9   :  { %v7846_v61 = vand.u32 4294901760, %v7098_v4  ;;  %v7171_v36 = vand.u32 4294901760, %v14025_v51  ;;  %v14079_v33 = vsub.f32 %v13999_v27, %v7181_v6  ;;  %v14084_v57 = vsel %vm4188_vm2, %v13826_v11, %v14021_v35  ;;  %15318 = vst [vmem:[#allocation57_spill] sm:$0xff] %v14098_v50 }
 0x9da   :  { %15311 = vst [vmem:[#allocation51_spill] sm:$0xff] %v14042_v54  ;;  %10910 = vmatprep.subr.bf16.mxu1 %v14042_v54  ;;  %v15317_v54 = vand.u32 4294901760, %v13994_v23 }
 0x9db   :  { %v14056_v39 = vpop.permute.xlu0 %7060  ;;  %v7049_v13 = vpop.permute.xlu1 %7048  ;;  %v14067_v20 = vpack.c.bf16 %v7846_v61, %v7842_v2  ;;  %15316 = vst [vmem:[#allocation62_spill] sm:$0xff] %v14079_v33  ;;  %v14101_v31 = vpack.c.bf16 %v7171_v36, %v7167_v60  ;;  %v15322_v2 = vand.u32 4294901760, %v13895_v53  ;;  %v15333_v0 = vand.u32 4294901760, %v14079_v33 }
 0x9dc   :  { %v14071_v48 = vsel %vm4188_vm2, %v13930_v30, %v7049_v13  ;;  %v14094_v18 = vsub.f32 %v13994_v23, %v15317_v54  ;;  %v15320_v30 = vand.u32 4294901760, %v13914_v10  ;;  %v7106_v27 = vsel %vm4188_vm2, %v7049_v13, %v13979_v1 }
 0x9dd   :  { %15314 = vst [vmem:[#allocation54_spill] sm:$0xff] %v14067_v20  ;;  %10912 = vmatpush1.bf16.msra.mxu1 %v14067_v20  ;;  %v7179_v11 = vand.u32 4294901760, %v14071_v48  ;;  %15319 = vst [vmem:[#allocation64_spill] sm:$0xff] %v14101_v31  ;;  %v14117_v40 = vsub.f32 %v13895_v53, %v15322_v2  ;;  %10814 = vmatprep.subr.bf16.mxu0 %v14101_v31  ;;  %v7274_v53 = vsub.f32 %v14052_v9, %v15324_v8 }
 0x9de   :  { %v14107_v20 = vpack.c.bf16 %v7173_v25, %v15320_v30  ;;  %v14124_v30 = vsub.f32 %v7098_v4, %v7846_v61  ;;  %v7854_v55 = vand.u32 4294901760, %v7106_v27  ;;  %v15325_v54 = vand.u32 4294901760, %v13877_v22 }
 0x9df   :  { %v14103_v7 = vpop.permute.xlu0 %7066  ;;  %v7053_v49 = vpop.permute.xlu1 %7052  ;;  %v15327_v61 = vand.u32 4294901760, %v14065_v59  ;;  %v14146_v25 = vsub.f32 %v13963_v58, %v15328_v26  ;;  %v15329_v8 = vand.u32 4294901760, %v13865_v46  ;;  %v15331_v22 = vand.u32 4294901760, %v14084_v57 }
 0x9e0   :  { %15321 = vst [vmem:[#allocation66_spill] sm:$0xff] %v14107_v20  ;;  %v7107_v10 = vsel %vm4188_vm2, %v13979_v1, %v7053_v49  ;;  %15323 = vst [vmem:[#allocation71_spill] sm:$0xff] %v14124_v30  ;;  %10816 = vmatpush1.bf16.msra.mxu0 %v14107_v20  ;;  %v14134_v31 = vpack.c.bf16 %v7179_v11, %v15325_v54  ;;  %v14166_v58 = vsub.f32 %v13967_v19, %v15334_v42 }
 0x9e1   :  { %v7852_v13 = vand.u32 4294901760, %v7107_v10  ;;  %v14141_v49 = vsub.f32 %v14065_v59, %v15327_v61  ;;  %v14150_v2 = vpack.c.bf16 %v7181_v6, %v15329_v8  ;;  %v14155_v54 = vsub.f32 %v14084_v57, %v15331_v22 }
 0x9e2   :  { %15326 = vst [vmem:[#allocation67_spill] sm:$0xff] %v14134_v31  ;;  %v14161_v61 = vsub.f32 %v14079_v33, %v15333_v0  ;;  %v7112_v46 = vsel %vm4188_vm2, %v13832_v37, %v14103_v7  ;;  %10818 = vmatprep.subr.bf16.mxu0 %v14134_v31  ;;  %v15335_v6 = vand.u32 4294901760, %v14087_v15  ;;  %v14177_v8 = vsub.f32 %v7093_v34, %v7167_v60 }
 0x9e3   :  { %v14136_v1 = vpop.permute.xlu0 %7070  ;;  %v7059_v4 = vpop.permute.xlu1 %7058  ;;  %15330 = vst [vmem:[#allocation72_spill] sm:$0xff] %v14150_v2  ;;  %15332 = vst [vmem:[#allocation49_spill] sm:$0xff] %v14155_v54  ;;  %v15336_v42 = vand.u32 4294901760, %v13868_v12  ;;  %v7275_v22 = vand.u32 4294901760, %v7274_v53  ;;  %v15338_v37 = vand.u32 4294901760, %v14098_v50  ;;  %v14191_v31 = vsub.f32 %v14025_v51, %v7171_v36 }
 0x9e4   :  { %v14175_v26 = vsub.f32 %v14087_v15, %v15335_v6  ;;  %10820 = vmatpush1.bf16.msra.mxu0 %v14150_v2  ;;  %v15339_v34 = vand.u32 4294901760, %v13888_v14  ;;  %v7189_v53 = vand.u32 4294901760, %v7112_v46  ;;  %v14206_v14 = vsub.f32 %v14071_v48, %v7179_v11 }
 0x9e5   :  { %v14183_v19 = vpack.c.bf16 %v7852_v13, %v15336_v42  ;;  %v14188_v20 = vsub.f32 %v14098_v50, %v15338_v37  ;;  %v14199_v42 = vsub.f32 %v7106_v27, %v7854_v55  ;;  %v7109_v37 = vsel %vm4188_vm2, %v14021_v35, %v7059_v4 }
 0x9e6   :  { %v14195_v60 = vpack.c.bf16 %v7854_v55, %v15339_v34  ;;  %v15342_v55 = vand.u32 4294901760, %v14124_v30  ;;  %v15343_v12 = vand.u32 4294901760, %v14117_v40  ;;  %v15344_v2 = vand.u32 4294901760, %v13900_v28 }
 0x9e7   :  { %15337 = vst [vmem:[#allocation73_spill] sm:$0xff] %v14183_v19  ;;  %v7077_v6 = vpop.permute.xlu0 %7076  ;;  %v7063_v0 = vpop.permute.xlu1 %7062  ;;  %15341 = vst [vmem:[#allocation74_spill] sm:$0xff] %v14199_v42  ;;  %10914 = vmatprep.subr.bf16.mxu1 %v14183_v19  ;;  %v14235_v51 = vsub.f32 %v7112_v46, %v7189_v53  ;;  %v14240_v43 = vsub.f32 %v7107_v10, %v7852_v13  ;;  %v15350_v35 = vand.u32 4294901760, %v14191_v31  ;;  %v15355_v23 = vand.u32 4294901760, %v14206_v14 }
 0x9e8   :  { %15340 = vst [vmem:[#allocation75_spill] sm:$0xff] %v14195_v60  ;;  %10916 = vmatpush1.bf16.msra.mxu1 %v14195_v60  ;;  %v14214_v27 = vsub.f32 %v14124_v30, %v15342_v55  ;;  %v7268_v34 = vsub.f32 %v14117_v40, %v15343_v12  ;;  %v14227_v60 = vpack.c.bf16 %v7275_v22, %v15344_v2  ;;  %v15345_v55 = vand.u32 4294901760, %v14155_v54 }
 0x9e9   :  { %15346 = vst [vmem:[#allocation12_spill] sm:$0xff] %v14235_v51  ;;  %v7183_v12 = vand.u32 4294901760, %v7109_v37  ;;  %v15347_v22 = vand.u32 4294901760, %v14084_v57  ;;  %v7292_v2 = vsub.f32 %v14191_v31, %v15350_v35  ;;  %v15351_v57 = vand.u32 4294901760, %v14199_v42 }
 0x9ea   :  { %v14232_v19 = vsub.f32 %v14155_v54, %v15345_v55  ;;  %v7110_v55 = vsel %vm4188_vm2, %v7059_v4, %v14056_v39  ;;  %v7269_v13 = vand.u32 4294901760, %v7268_v34  ;;  %v15352_v35 = vand.u32 4294901760, %v14177_v8 }
 0x9eb   :  { %v14220_v48 = vpop.permute.xlu0 %7080  ;;  %v7069_v11 = vpop.permute.xlu1 %7068  ;;  %v14245_v30 = vpack.c.bf16 %v7189_v53, %v15347_v22  ;;  %v14261_v53 = vsub.f32 %v14199_v42, %v15351_v57  ;;  %v7858_v34 = vand.u32 4294901760, %v7110_v55  ;;  %v14273_v57 = vsub.f32 %v7109_v37, %v7183_v12 }
 0x9ec   :  { %v7113_v36 = vsel %vm4188_vm2, %v14103_v7, %v7069_v11  ;;  %v7114_v46 = vsel %vm4188_vm2, %v7069_v11, %v14136_v1  ;;  %v7111_v7 = vsel %vm4188_vm2, %v14056_v39, %v7063_v0  ;;  %v7280_v50 = vsub.f32 %v14177_v8, %v15352_v35 }
 0x9ed   :  { %v7187_v28 = vand.u32 4294901760, %v7113_v36  ;;  %15348 = vst [vmem:[#allocation18_spill] sm:$0xff] %v14245_v30  ;;  %v7862_v54 = vand.u32 4294901760, %v7114_v46  ;;  %v7856_v42 = vand.u32 4294901760, %v7111_v7  ;;  %v15354_v0 = vand.u32 4294901760, %v13920_v47 }
 0x9ee   :  { %v7293_v5 = vand.u32 4294901760, %v7292_v2  ;;  %v7316_v37 = vsub.f32 %v14206_v14, %v15355_v23  ;;  %v15357_v59 = vand.u32 4294901760, %v14146_v25  ;;  %v7281_v2 = vand.u32 4294901760, %v7280_v50 }
 0x9ef   :  { %v7073_v33 = vpop.permute.xlu1 %7072  ;;  %v14253_v10 = vpack.c.bf16 %v7187_v28, %v7183_v12  ;;  %v14264_v22 = vsub.f32 %v7113_v36, %v7187_v28  ;;  %v7075_v11 = vpop.permute.xlu0 %7074  ;;  %v15353_v36 = vand.u32 4294901760, %v14166_v58 }
 0x9f0   :  { %v7115_v39 = vsel %vm4188_vm2, %v14136_v1, %v7073_v33  ;;  %v7116_v1 = vsel %vm4188_vm2, %v7075_v11, %v7077_v6  ;;  %v14292_v11 = vpack.c.bf16 %v7862_v54, %v7858_v34 }
 0x9f1   :  { %15349 = vst [vmem:[#allocation14_spill] sm:$0xff] %v14253_v10  ;;  %10822 = vmatprep.subr.bf16.mxu0 %v14253_v10  ;;  %v7860_v4 = vand.u32 4294901760, %v7115_v39  ;;  %v7941_v33 = vsub.f32 %v14166_v58, %v15353_v36  ;;  %v10825_v10 = vpack.c.bf16 %v7269_v13, %v15354_v0  ;;  %v7965_v36 = vsub.f32 %v14146_v25, %v15357_v59 }
 0x9f2   :  { %10824 = vmatpush1.bf16.msra.mxu0 %v14245_v30  ;;  %15358 = vst [vmem:[#allocation21_spill] sm:$0xff] %v14292_v11  ;;  %v15360_v13 = vand.u32 4294901760, %v14235_v51  ;;  %v14304_v0 = vand.u32 4294901760, %v7116_v1  ;;  %v14307_v59 = vsub.f32 %v7111_v7, %v7856_v42 }
 0x9f3   :  { %v7079_v28 = vpop.permute.xlu1 %7078  ;;  %v14287_v30 = vpack.c.bf16 %v7860_v4, %v7856_v42  ;;  %v14294_v41 = vsub.f32 %v7115_v39, %v7860_v4  ;;  %v7942_v12 = vand.u32 4294901760, %v7941_v33  ;;  %v10829_v39 = vpack.c.bf16 %v7293_v5, %v7281_v2 }
 0x9f4   :  { %v7117_v35 = vsel %vm4188_vm2, %v7077_v6, %v7079_v28  ;;  %v14301_v23 = vsub.f32 %v14235_v51, %v15360_v13  ;;  %v7118_v4 = vsel %vm4188_vm2, %v7079_v28, %v14220_v48  ;;  %v7317_v13 = vand.u32 4294901760, %v7316_v37 }
 0x9f5   :  { %15356 = vst [vmem:[#allocation16_spill] sm:$0xff] %v14287_v30  ;;  %v14296_v47 = vand.u32 4294901760, %v7117_v35  ;;  %10918 = vmatprep.subr.bf16.mxu1 %v14287_v30  ;;  %v14313_v51 = vsub.f32 %v7114_v46, %v7862_v54  ;;  %v7966_v33 = vand.u32 4294901760, %v7965_v36  ;;  %v15361_v42 = vand.u32 4294901760, %v14264_v22 }
 0x9f6   :  { %10920 = vmatpush1.bf16.msra.mxu1 %v14292_v11  ;;  %v14938_v28 = vand.u32 4294901760, %v14294_v41  ;;  %v15362_v5 = vand.u32 4294901760, %v14240_v43  ;;  %v14333_v46 = vand.u32 4294901760, %v7118_v4  ;;  %v15363_v37 = vand.u32 4294901760, %v14076_v44 }
 0x9f7   :  { %15359 = vst [vmem:[#allocation28_spill] sm:$0xff] %v14296_v47  ;;  %7192 = vmatprep.subr.mxu0 %v14296_v47  ;;  %v7083_v50 = vpop.permute.xlu1 %7082  ;;  %v7340_v7 = vsub.f32 %v14264_v22, %v15361_v42  ;;  %v14323_v11 = vsub.f32 %v7117_v35, %v14296_v47  ;;  %v15364_v35 = vand.u32 4294901760, %v14141_v49  ;;  %v15365_v2 = vand.u32 4294901760, %v14273_v57 }
 0x9f8   :  { %v7119_v6 = vsel %vm4188_vm2, %v14220_v48, %v7083_v50  ;;  %7194 = vmatpush1.msra.mxu0 %v14304_v0  ;;  %v7989_v54 = vsub.f32 %v14240_v43, %v15362_v5  ;;  %v14331_v48 = vsub.f32 %v7110_v55, %v7858_v34  ;;  %v14939_v50 = vand.u32 4294901760, %v14307_v59 }
 0x9f9   :  { %v14325_v30 = vand.u32 4294901760, %v7119_v6  ;;  %10826 = vmatprep.subr.bf16.mxu0 %v10825_v10  ;;  %7247 = vmatmul.mubr.f32.vlgmr.msra.gmra.mrb[10].mxu0 %v14058_v29  ;;  %v10831_v36 = vpack.c.bf16 %v15364_v35, %v15363_v37  ;;  %v7328_v10 = vsub.f32 %v14273_v57, %v15365_v2  ;;  %v15366_v55 = vand.u32 4294901760, %v13959_v21 }
 0x9fa   :  { %10828 = vmatpush1.bf16.msra.mxu0 %v14227_v60  ;;  %7407 = vmatprep.mubr.f32.mxu0 %v14989_v3  ;;  %v15367_v60 = vand.u32 4294901760, %v13910_v32  ;;  %v15368_v44 = vand.u32 4294901760, %v14175_v26  ;;  %v15369_v42 = vand.u32 4294901760, %v14030_v38  ;;  %v14935_v37 = vand.u32 4294901760, %v14313_v51 }
 0x9fb   :  { %10830 = vmatprep.subr.bf16.mxu0 %v10829_v39  ;;  %7865 = vmatprep.subr.mxu1 %v14325_v30  ;;  %v10921_v34 = vpack.c.bf16 %v7942_v12, %v15366_v55  ;;  %v14356_v35 = vsub.f32 %v7116_v1, %v14304_v0  ;;  %v15370_v39 = vand.u32 4294901760, %v14094_v18  ;;  %v7341_v21 = vand.u32 4294901760, %v7340_v7 }
 0x9fc   :  { %v10923_v49 = vpack.c.bf16 %v15368_v44, %v15367_v60  ;;  %v10833_v5 = vpack.c.bf16 %v7317_v13, %v15369_v42  ;;  %7867 = vmatpush1.msra.mxu1 %v14333_v46  ;;  %v14362_v12 = vsub.f32 %v7119_v6, %v14325_v30  ;;  %v7990_v32 = vand.u32 4294901760, %v7989_v54 }
 0x9fd   :  { %v10925_v2 = vpack.c.bf16 %v7966_v33, %v15370_v39  ;;  %10922 = vmatprep.subr.bf16.mxu1 %v10921_v34  ;;  %7920 = vmatmul.mubr.f32.vlgmr.msra.gmra.mrb[10].mxu1 %v14058_v29  ;;  %v14937_v38 = vand.u32 4294901760, %v14323_v11  ;;  %v8013_v26 = vsub.f32 %v14294_v41, %v14938_v28  ;;  %v7335_v1 = vand.u32 4294901760, %v14232_v19 }
 0x9fe   :  { %v7996_v13 = vand.u32 4294901760, %v14261_v53  ;;  %v14936_v18 = vand.u32 4294901760, %v14331_v48  ;;  %10832 = vmatpush1.bf16.msra.mxu0 %v10831_v36  ;;  %10924 = vmatpush1.bf16.msra.mxu1 %v10923_v49  ;;  %v7329_v6 = vand.u32 4294901760, %v7328_v10  ;;  %v7347_v33 = vand.u32 4294901760, %v14301_v23 }
 0x9ff   :  { %10834 = vmatprep.subr.bf16.mxu0 %v10833_v5  ;;  %10926 = vmatprep.subr.bf16.mxu1 %v10925_v2  ;;  %v15371_v29 = vand.u32 4294901760, %v14010_v63  ;;  %v15372_v7 = vand.u32 4294901760, %v14161_v61  ;;  %v15373_v55 = vand.u32 4294901760, %v14188_v20  ;;  %v15374_v19 = vand.u32 4294901760, %v14214_v27 }
 0xa00   :  { %v8001_v53 = vsub.f32 %v14307_v59, %v14939_v50  ;;  %v8019_v23 = vsub.f32 %v14313_v51, %v14935_v37  ;;  %v14934_v36 = vand.u32 4294901760, %v14356_v35  ;;  %v14389_v63 = vsub.f32 %v7118_v4, %v14333_v46  ;;  %8080 = vmatprep.mubr.f32.mxu1 %v14989_v3 }
 0xa01   :  { %v10835_v54 = vpack.c.bf16 %v15372_v7, %v15371_v29  ;;  %v10927_v34 = vpack.c.bf16 %v15374_v19, %v15373_v55  ;;  %v10837_v61 = vpack.c.bf16 %v7341_v21, %v7329_v6  ;;  %v15375_v20 = vand.u32 4294901760, %v14035_v45 }
 0xa02   :  { %v7352_v10 = vsub.f32 %v14323_v11, %v14937_v38  ;;  %v8014_v60 = vand.u32 4294901760, %v8013_v26  ;;  %v14933_v44 = vand.u32 4294901760, %v14362_v12  ;;  %v7984_v49 = vand.u32 4294901760, %v14063_v62 }
 0xa03   :  { %v10929_v27 = vpack.c.bf16 %v7990_v32, %v15375_v20  ;;  %v8007_v4 = vsub.f32 %v14331_v48, %v14936_v18  ;;  %10836 = vmatpush1.bf16.msra.mxu0 %v10835_v54  ;;  %10928 = vmatpush1.bf16.msra.mxu1 %v10927_v34  ;;  %v10839_v42 = vpack.c.bf16 %v7347_v33, %v7335_v1  ;;  %v8002_v45 = vand.u32 4294901760, %v8001_v53 }
 0xa04   :  { %10838 = vmatprep.subr.bf16.mxu0 %v10837_v61  ;;  %v8020_v5 = vand.u32 4294901760, %v8019_v23  ;;  %v7358_v39 = vsub.f32 %v14356_v35, %v14934_v36  ;;  %v14932_v2 = vand.u32 4294901760, %v14389_v63  ;;  %v10931_v21 = vpack.c.bf16 %v7996_v13, %v7984_v49  ;;  %v15376_v23 = vld [vmem:[#allocation47_spill] sm:$0xff]  ;;  %v15377_v61 = vld [vmem:[#allocation60_spill] sm:$0xff] }
 0xa05   :  { %10930 = vmatprep.subr.bf16.mxu1 %v10929_v27  ;;  %v7353_v32 = vand.u32 4294901760, %v7352_v10  ;;  %v10933_v62 = vpack.c.bf16 %v8014_v60, %v8002_v45  ;;  %v8025_v26 = vsub.f32 %v14362_v12, %v14933_v44  ;;  %v8008_v6 = vand.u32 4294901760, %v8007_v4  ;;  %v15378_v27 = vld [vmem:[#allocation55_spill] sm:$0xff]  ;;  %v15379_v60 = vld [vmem:[#allocation52_spill] sm:$0xff]  ;;  %v15380_v4 = vld [vmem:[#allocation57_spill] sm:$0xff] }
 0xa06   :  { %v8031_v1 = vsub.f32 %v14389_v63, %v14932_v2  ;;  %v7359_v33 = vand.u32 4294901760, %v7358_v39  ;;  %v10841_v13 = vpack.c.bf16 %v14117_v40, %v13854_v16  ;;  %v10843_v54 = vpack.c.bf16 %v14052_v9, %v13851_v52  ;;  %v15383_v39 = vld [vmem:[#allocation62_spill] sm:$0xff]  ;;  %v15404_v2 = vld [vmem:[#allocation16_spill] sm:$0xff]  ;;  %v15405_v44 = vld [vmem:[#allocation21_spill] sm:$0xff] }
 0xa07   :  { %10840 = vmatpush1.bf16.msra.mxu0 %v10839_v42  ;;  %10932 = vmatpush1.bf16.msra.mxu1 %v10931_v21  ;;  %v10935_v29 = vpack.c.bf16 %v8020_v5, %v8008_v6  ;;  %v8026_v7 = vand.u32 4294901760, %v8025_v26  ;;  %v10845_v55 = vpack.c.bf16 %v14191_v31, %v14177_v8  ;;  %v10937_v34 = vpack.c.bf16 %v14166_v58, %v13874_v17  ;;  %v15381_v42 = vld [vmem:[#allocation71_spill] sm:$0xff]  ;;  %v15382_v5 = vld [vmem:[#allocation48_spill] sm:$0xff]  ;;  %v15385_v6 = vld [vmem:[#allocation53_spill] sm:$0xff] }
 0xa08   :  { %7354 = vmatprep.subr.mxu0 %v7353_v32  ;;  %10934 = vmatprep.subr.bf16.mxu1 %v10933_v62  ;;  %v8032_v19 = vand.u32 4294901760, %v8031_v1  ;;  %v10939_v53 = vpack.c.bf16 %v14087_v15, %v13859_v56  ;;  %v10847_v20 = vpack.c.bf16 %v15377_v61, %v15376_v23  ;;  %v10941_v10 = vpack.c.bf16 %v14146_v25, %v15378_v27  ;;  %v15384_v32 = vld [vmem:[#allocation50_spill] sm:$0xff] }
 0xa09   :  { %v10849_v49 = vpack.c.bf16 %v14206_v14, %v15379_v60  ;;  %v10943_v45 = vpack.c.bf16 %v15381_v42, %v15380_v4  ;;  %v10851_v21 = vpack.c.bf16 %v15383_v39, %v15382_v5  ;;  %v10945_v62 = vpack.c.bf16 %v14240_v43, %v15384_v32  ;;  %v15386_v1 = vld [vmem:[#allocation74_spill] sm:$0xff] }
 0xa0a   :  { %v10853_v26 = vpack.c.bf16 %v14264_v22, %v14273_v57  ;;  %v15406_v36 = vand.u32 4294901760, %v13854_v16  ;;  %v15407_v37 = vand.u32 4294901760, %v14117_v40  ;;  %v15408_v38 = vand.u32 4294901760, %v13851_v52 }
 0xa0b   :  { %7360 = vmatpush1.msra.mxu0 %v7359_v33  ;;  %10936 = vmatpush1.bf16.msra.mxu1 %v10935_v29  ;;  %v10947_v33 = vpack.c.bf16 %v15386_v1, %v15385_v6  ;;  %v15387_v29 = vld [vmem:[#allocation49_spill] sm:$0xff]  ;;  %v15409_v28 = vand.u32 4294901760, %v14052_v9  ;;  %v15413_v40 = vand.u32 4294901760, %v13874_v17  ;;  %v15415_v9 = vand.u32 4294901760, %v13859_v56 }
 0xa0c   :  { %10842 = vmatprep.subr.bf16.mxu0 %v10841_v13  ;;  %8027 = vmatprep.subr.mxu1 %v8026_v7  ;;  %v15388_v13 = vld [vmem:[#allocation12_spill] sm:$0xff]  ;;  %v10873_v18 = vpack.c.bf16 %v15407_v37, %v15406_v36  ;;  %v15414_v37 = vand.u32 4294901760, %v14166_v58  ;;  %v15416_v52 = vand.u32 4294901760, %v14087_v15  ;;  %v15419_v17 = vand.u32 4294901760, %v15378_v27 }
 0xa0d   :  { %7409 = vmatmul.mubr.f32.vlgmr.msra.gmra.mrb[10].mxu0 %v13879_v24  ;;  %v10855_v7 = vpack.c.bf16 %v15388_v13, %v15387_v29  ;;  %v10875_v50 = vpack.c.bf16 %v15409_v28, %v15408_v38  ;;  %v15420_v58 = vand.u32 4294901760, %v14146_v25  ;;  %v15421_v38 = vand.u32 4294901760, %v15379_v60 }
 0xa0e   :  { %10844 = vmatpush1.bf16.msra.mxu0 %v10843_v54  ;;  %7515 = vmatprep.mubr.f32.mxu0 %v14989_v3  ;;  %v10949_v54 = vpack.c.bf16 %v14294_v41, %v14307_v59  ;;  %v10969_v36 = vpack.c.bf16 %v15414_v37, %v15413_v40  ;;  %v10971_v28 = vpack.c.bf16 %v15416_v52, %v15415_v9  ;;  %v15422_v56 = vand.u32 4294901760, %v14206_v14 }
 0xa0f   :  { %10846 = vmatprep.subr.bf16.mxu0 %v10845_v55  ;;  %8033 = vmatpush1.msra.mxu1 %v8032_v19  ;;  %v10951_v55 = vpack.c.bf16 %v14313_v51, %v14331_v48  ;;  %v15389_v19 = vld [vmem:[#allocation61_spill] sm:$0xff]  ;;  %v15426_v25 = vand.u32 4294901760, %v15383_v39  ;;  %v15427_v27 = vand.u32 4294901760, %v15384_v32  ;;  %v15428_v14 = vand.u32 4294901760, %v14240_v43 }
 0xa10   :  { %10938 = vmatprep.subr.bf16.mxu1 %v10937_v34  ;;  %8082 = vmatmul.mubr.f32.vlgmr.msra.gmra.mrb[10].mxu1 %v13879_v24  ;;  %v15390_v34 = vld [vmem:[#allocation68_spill] sm:$0xff]  ;;  %v10881_v15 = vpack.c.bf16 %v15422_v56, %v15421_v38  ;;  %v15430_v40 = vand.u32 4294901760, %v14264_v22  ;;  %v15433_v39 = vand.u32 4294901760, %v15387_v29  ;;  %v15434_v32 = vand.u32 4294901760, %v15388_v13  ;;  %v6990_v13 = vpop.permute.xlu1 %6989 }
 0xa11   :  { %10940 = vmatpush1.bf16.msra.mxu1 %v10939_v53  ;;  %8188 = vmatprep.mubr.f32.mxu1 %v14989_v3  ;;  %v15391_v53 = vld [vmem:[#allocation70_spill] sm:$0xff]  ;;  %v10977_v60 = vpack.c.bf16 %v15428_v14, %v15427_v27  ;;  %v15437_v22 = vand.u32 4294901760, %v14323_v11  ;;  %v15440_v29 = vand.u32 4294901760, %v14356_v35 }
 0xa12   :  { %10848 = vmatpush1.bf16.msra.mxu0 %v10847_v20  ;;  %10942 = vmatprep.subr.bf16.mxu1 %v10941_v10  ;;  %v15392_v20 = vld [vmem:[#allocation64_spill] sm:$0xff]  ;;  %v15393_v10 = vld [vmem:[#allocation46_spill] sm:$0xff]  ;;  %v10887_v43 = vpack.c.bf16 %v15434_v32, %v15433_v39 }
 0xa13   :  { %10850 = vmatprep.subr.bf16.mxu0 %v10849_v49  ;;  %v15394_v49 = vld [vmem:[#allocation59_spill] sm:$0xff] }
 0xa15   :  { %10944 = vmatpush1.bf16.msra.mxu1 %v10943_v45  ;;  %v15395_v45 = vld [vmem:[#allocation66_spill] sm:$0xff] }
 0xa16   :  { %10852 = vmatpush1.bf16.msra.mxu0 %v10851_v21  ;;  %10946 = vmatprep.subr.bf16.mxu1 %v10945_v62  ;;  %v15396_v21 = vld [vmem:[#allocation51_spill] sm:$0xff] }
 0xa17   :  { %10854 = vmatprep.subr.bf16.mxu0 %v10853_v26  ;;  %v15397_v62 = vld [vmem:[#allocation67_spill] sm:$0xff]  ;;  %v15398_v26 = vld [vmem:[#allocation54_spill] sm:$0xff] }
 0xa19   :  { %10948 = vmatpush1.bf16.msra.mxu1 %v10947_v33  ;;  %v15399_v33 = vld [vmem:[#allocation72_spill] sm:$0xff] }
 0xa1a   :  { %10856 = vmatpush1.bf16.msra.mxu0 %v10855_v7  ;;  %10950 = vmatprep.subr.bf16.mxu1 %v10949_v54  ;;  %v15400_v7 = vld [vmem:[#allocation73_spill] sm:$0xff]  ;;  %v15401_v54 = vld [vmem:[#allocation14_spill] sm:$0xff] }
 0xa1b   :  { %7465 = vmatprep.subr.mxu0 %v14323_v11  ;;  %v15444_v11 = vld [vmem:[#allocation28_spill] sm:$0xff] }
 0xa1d   :  { %10952 = vmatpush1.bf16.msra.mxu1 %v10951_v55  ;;  %v15402_v55 = vld [vmem:[#allocation75_spill] sm:$0xff] }
 0xa1e   :  { %7468 = vmatpush1.msra.mxu0 %v14356_v35  ;;  %8138 = vmatprep.subr.mxu1 %v14362_v12  ;;  %v8509_v35 = vld [vmem:[%s14665_s15] sm:$0xff] }
 0xa1f   :  { %10858 = vmatprep.subr.bf16.mxu0 %v15389_v19  ;;  %7518 = vmatmul.mubr.f32.vlgmr.msra.gmra.mrb[10].mxu0 %v15390_v34 }
 0xa20   :  { %10860 = vmatpush1.bf16.msra.mxu0 %v15391_v53  ;;  %7606 = vmatprep.mubr.f32.mxu0 %v14989_v3 }
 0xa21   :  { %10862 = vmatprep.subr.bf16.mxu0 %v15392_v20  ;;  %8141 = vmatpush1.msra.mxu1 %v14389_v63 }
 0xa22   :  { %10954 = vmatprep.subr.bf16.mxu1 %v15393_v10  ;;  %8191 = vmatmul.mubr.f32.vlgmr.msra.gmra.mrb[10].mxu1 %v15390_v34  ;;  %v15403_v34 = vld [vmem:[#allocation18_spill] sm:$0xff] }
 0xa23   :  { %10956 = vmatpush1.bf16.msra.mxu1 %v15394_v49  ;;  %8279 = vmatprep.mubr.f32.mxu1 %v14989_v3 }
 0xa24   :  { %10864 = vmatpush1.bf16.msra.mxu0 %v15395_v45  ;;  %10958 = vmatprep.subr.bf16.mxu1 %v15396_v21 }
 0xa25   :  { %10866 = vmatprep.subr.bf16.mxu0 %v15397_v62 }
 0xa27   :  { %10960 = vmatpush1.bf16.msra.mxu1 %v15398_v26 }
 0xa28   :  { %10868 = vmatpush1.bf16.msra.mxu0 %v15399_v33  ;;  %10962 = vmatprep.subr.bf16.mxu1 %v15400_v7 }
 0xa29   :  { %10870 = vmatprep.subr.bf16.mxu0 %v15401_v54 }
 0xa2b   :  { %10964 = vmatpush1.bf16.msra.mxu1 %v15402_v55 }
 0xa2c   :  { %10872 = vmatpush1.bf16.msra.mxu0 %v15403_v34  ;;  %10966 = vmatprep.subr.bf16.mxu1 %v15404_v2  ;;  %v15410_v2 = vld [vmem:[#allocation69_spill] sm:$0xff] }
 0xa2d   :  { %7557 = vmatprep.subr.mxu0 %v14296_v47  ;;  %v15411_v47 = vand.u32 4294901760, %v14177_v8  ;;  %v15418_v8 = vand.u32 4294901760, %v15377_v61 }
 0xa2f   :  { %10968 = vmatpush1.bf16.msra.mxu1 %v15405_v44  ;;  %v15412_v44 = vand.u32 4294901760, %v14191_v31  ;;  %v15417_v31 = vand.u32 4294901760, %v15376_v23  ;;  %v15425_v23 = vand.u32 4294901760, %v15382_v5 }
 0xa30   :  { %7559 = vmatpush1.msra.mxu0 %v14304_v0  ;;  %8230 = vmatprep.subr.mxu1 %v14325_v30 }
 0xa31   :  { %10874 = vmatprep.subr.bf16.mxu0 %v10873_v18  ;;  %7610 = vmatmul.mubr.f32.vlgmr.msra.gmra.mrb[10].mxu0 %v15410_v2  ;;  %v10877_v16 = vpack.c.bf16 %v15412_v44, %v15411_v47  ;;  %v10879_v47 = vpack.c.bf16 %v15418_v8, %v15417_v31  ;;  %v15423_v18 = vand.u32 4294901760, %v15380_v4  ;;  %v15424_v44 = vand.u32 4294901760, %v15381_v42 }
 0xa32   :  { %10876 = vmatpush1.bf16.msra.mxu0 %v10875_v50  ;;  %7734 = vmatprep.mubr.f32.mxu0 %v14989_v3  ;;  %v10973_v50 = vpack.c.bf16 %v15420_v58, %v15419_v17  ;;  %v10883_v61 = vpack.c.bf16 %v15426_v25, %v15425_v23  ;;  %v15431_v4 = vand.u32 4294901760, %v15385_v6  ;;  %v15432_v42 = vand.u32 4294901760, %v15386_v1 }
 0xa33   :  { %10878 = vmatprep.subr.bf16.mxu0 %v10877_v16  ;;  %8232 = vmatpush1.msra.mxu1 %v14333_v46  ;;  %v15429_v16 = vand.u32 4294901760, %v14273_v57  ;;  %v15436_v57 = vand.u32 4294901760, %v14294_v41  ;;  %v15438_v6 = vand.u32 4294901760, %v14331_v48  ;;  %v15439_v1 = vand.u32 4294901760, %v14313_v51  ;;  %v15443_v51 = vld [vmem:[#allocation16_spill] sm:$0xff]  ;;  %v15445_v48 = vld [vmem:[#allocation21_spill] sm:$0xff] }
 0xa34   :  { %10970 = vmatprep.subr.bf16.mxu1 %v10969_v36  ;;  %8283 = vmatmul.mubr.f32.vlgmr.msra.gmra.mrb[10].mxu1 %v15410_v2  ;;  %v10975_v2 = vpack.c.bf16 %v15424_v44, %v15423_v18  ;;  %v10979_v5 = vpack.c.bf16 %v15432_v42, %v15431_v4  ;;  %v15435_v36 = vand.u32 4294901760, %v14307_v59  ;;  %v15441_v59 = vand.u32 4294901760, %v14362_v12  ;;  %v8514_v42 = vpop.permute.xlu0 %8513 }
 0xa35   :  { %10972 = vmatpush1.bf16.msra.mxu1 %v10971_v28  ;;  %8407 = vmatprep.mubr.f32.mxu1 %v14989_v3  ;;  %v10885_v37 = vpack.c.bf16 %v15430_v40, %v15429_v16  ;;  %v10983_v52 = vpack.c.bf16 %v15439_v1, %v15438_v6  ;;  %v15442_v41 = vand.u32 4294901760, %v14389_v63  ;;  %v8517_v12 = vsel %vm1996_vm14, %v8509_v35, 0  ;;  %v15447_v6 = vld [vmem:[#allocation63_spill] sm:$0xff] }
 0xa36   :  { %10880 = vmatpush1.bf16.msra.mxu0 %v10879_v47  ;;  %10974 = vmatprep.subr.bf16.mxu1 %v10973_v50  ;;  %v10981_v9 = vpack.c.bf16 %v15436_v57, %v15435_v36  ;;  %v14584_v63 = vand.u32 4294901760, %v8517_v12  ;;  %v15446_v57 = vld [vmem:[#allocation58_spill] sm:$0xff] }
 0xa37   :  { %10882 = vmatprep.subr.bf16.mxu0 %v10881_v15 }
 0xa39   :  { %10976 = vmatpush1.bf16.msra.mxu1 %v10975_v2 }
 0xa3a   :  { %10884 = vmatpush1.bf16.msra.mxu0 %v10883_v61  ;;  %10978 = vmatprep.subr.bf16.mxu1 %v10977_v60  ;;  %v9453_v60 = vld [vmem:[%s14666_s17] sm:$0xff] }
 0xa3b   :  { %10886 = vmatprep.subr.bf16.mxu0 %v10885_v37  ;;  %v9461_v16 = vsel %vm1996_vm14, %v9453_v60, 0 }
 0xa3c   :  { %v14614_v40 = vand.u32 4294901760, %v9461_v16 }
 0xa3d   :  { %10980 = vmatpush1.bf16.msra.mxu1 %v10979_v5 }
 0xa3e   :  { %10888 = vmatpush1.bf16.msra.mxu0 %v10887_v43  ;;  %10982 = vmatprep.subr.bf16.mxu1 %v10981_v9  ;;  %v9531_v37 = vsub.f32 %v9461_v16, %v14614_v40 }
 0xa3f   :  { %7683 = vmatprep.subr.mxu0 %v15437_v22 }
 0xa40   :  { %v14617_v4 = vand.u32 4294901760, %v9531_v37 }
 0xa41   :  { %10984 = vmatpush1.bf16.msra.mxu1 %v10983_v52 }
 0xa42   :  { %7687 = vmatpush1.msra.mxu0 %v15440_v29  ;;  %8356 = vmatprep.subr.mxu1 %v15441_v59  ;;  %v9533_v36 = vsub.f32 %v9531_v37, %v14617_v4 }
 0xa43   :  { %10890 = vmatprep.subr.bf16.mxu0 %v15389_v19  ;;  %7736 = vmatmul.mubr.f32.vlgmr.msra.gmra.mrb[10].mxu0 %v13879_v24 }
 0xa44   :  { %10892 = vmatpush1.bf16.msra.mxu0 %v15391_v53  ;;  %7824 = vmatprep.mubr.f32.mxu0 %v14989_v3  ;;  %v9534_v35 = vand.u32 4294901760, %v9533_v36 }
 0xa45   :  { %10894 = vmatprep.subr.bf16.mxu0 %v15392_v20  ;;  %8360 = vmatpush1.msra.mxu1 %v15442_v41 }
 0xa46   :  { %10986 = vmatprep.subr.bf16.mxu1 %v15393_v10  ;;  %8409 = vmatmul.mubr.f32.vlgmr.msra.gmra.mrb[10].mxu1 %v13879_v24 }
 0xa47   :  { %10988 = vmatpush1.bf16.msra.mxu1 %v15394_v49  ;;  %8497 = vmatprep.mubr.f32.mxu1 %v14989_v3 }
 0xa48   :  { %10896 = vmatpush1.bf16.msra.mxu0 %v15395_v45  ;;  %10990 = vmatprep.subr.bf16.mxu1 %v15396_v21 }
 0xa49   :  { %10898 = vmatprep.subr.bf16.mxu0 %v15397_v62 }
 0xa4b   :  { %10992 = vmatpush1.bf16.msra.mxu1 %v15398_v26 }
 0xa4c   :  { %10900 = vmatpush1.bf16.msra.mxu0 %v15399_v33  ;;  %10994 = vmatprep.subr.bf16.mxu1 %v15400_v7 }
 0xa4d   :  { %10902 = vmatprep.subr.bf16.mxu0 %v15401_v54 }
 0xa4f   :  { %10996 = vmatpush1.bf16.msra.mxu1 %v15402_v55 }
 0xa50   :  { %10904 = vmatpush1.bf16.msra.mxu0 %v15403_v34  ;;  %10998 = vmatprep.subr.bf16.mxu1 %v15443_v51 }
 0xa51   :  { %7775 = vmatprep.subr.mxu0 %v15444_v11  ;;  %v15448_v11 = vld [vmem:[#allocation56_spill] sm:$0xff] }
 0xa53   :  { %11000 = vmatpush1.bf16.msra.mxu1 %v15445_v48 }
 0xa54   :  { %7777 = vmatpush1.msra.mxu0 %v14304_v0  ;;  %8448 = vmatprep.subr.mxu1 %v14325_v30  ;;  %v8587_v30 = vsub.f32 %v8517_v12, %v14584_v63 }
 0xa55   :  { %7826 = vmatmul.mubr.f32.vlgmr.msra.gmra.mrb[10].mxu0 %v13879_v24 }
 0xa56   :  { %8585 = vmatprep.mubr.f32.mxu0 %v14989_v3  ;;  %v14587_v0 = vand.u32 4294901760, %v8587_v30 }
 0xa57   :  { %8450 = vmatpush1.msra.mxu1 %v14333_v46 }
 0xa58   :  { %8499 = vmatmul.mubr.f32.vlgmr.msra.gmra.mrb[10].mxu1 %v13879_v24  ;;  %v8589_v24 = vsub.f32 %v8587_v30, %v14587_v0 }
 0xa59   :  { %9050 = vmatprep.mubr.f32.mxu1 %v14989_v3 }
 0xa5a   :  { %v8590_v55 = vand.u32 4294901760, %v8589_v24 }
 0xb28   :  { %v7827_v19 = vpop.f32.mrb[10].mxu0 }
 0xb29   :  { %v11021_v53 = vadd.f32 %v7827_v19, %v6990_v13  ;;  %v7829_v46 = vpop.f32.mrb[11].mxu0 }
 0xb2a   :  { %v11022_v20 = vadd.f32 %v7829_v46, %v6990_v13 }
 0xb2b   :  { %v8505_v10 = vmax.f32 %v11021_v53, 0.0  ;;  %v8500_v49 = vpop.f32.mrb[10].mxu1 }
 0xb2c   :  { %v8506_v45 = vmax.f32 %v11022_v20, 0.0  ;;  %v11023_v21 = vadd.f32 %v8500_v49, %v6990_v13  ;;  %v8502_v62 = vpop.f32.mrb[11].mxu1 }
 0xb2d   :  { %v8521_v26 = vand.u32 4294901760, %v8505_v10  ;;  %v11024_v33 = vadd.f32 %v8502_v62, %v6990_v13 }
 0xb2e   :  { %v8519_v7 = vand.u32 4294901760, %v8506_v45  ;;  %v8507_v54 = vmax.f32 %v11023_v21, 0.0 }
 0xb2f   :  { %v8604_v34 = vsub.f32 %v8505_v10, %v8521_v26  ;;  %v8508_v28 = vmax.f32 %v11024_v33, 0.0 }
 0xb30   :  { %v8598_v31 = vsub.f32 %v8506_v45, %v8519_v7  ;;  %v8986_v8 = vand.u32 4294901760, %v8507_v54  ;;  %8520 = vmatprep.subr.mxu0 %v8519_v7 }
 0xb31   :  { %v8605_v47 = vand.u32 4294901760, %v8604_v34  ;;  %v8984_v17 = vand.u32 4294901760, %v8508_v28  ;;  %8522 = vmatpush1.msra.mxu0 %v8521_v26 }
 0xb32   :  { %v9069_v58 = vsub.f32 %v8507_v54, %v8986_v8  ;;  %8591 = vmatmul.mubr.f32.vlgmr.msra.gmra.mrb[12].mxu0 %v8590_v55  ;;  %v8599_v50 = vand.u32 4294901760, %v8598_v31 }
 0xb33   :  { %v8606_v38 = vsub.f32 %v8604_v34, %v8605_v47  ;;  %v9063_v56 = vsub.f32 %v8508_v28, %v8984_v17  ;;  %8985 = vmatprep.subr.mxu1 %v8984_v17  ;;  %8671 = vmatprep.mubr.f32.mxu0 %v14989_v3 }
 0xb34   :  { %v9070_v15 = vand.u32 4294901760, %v9069_v58  ;;  %8987 = vmatpush1.msra.mxu1 %v8986_v8  ;;  %v8600_v18 = vsub.f32 %v8598_v31, %v8599_v50 }
 0xb35   :  { %9056 = vmatmul.mubr.f32.vlgmr.msra.gmra.mrb[12].mxu1 %v8590_v55  ;;  %v9064_v44 = vand.u32 4294901760, %v9063_v56  ;;  %v8607_v25 = vand.u32 4294901760, %v8606_v38 }
 0xb36   :  { %v9071_v2 = vsub.f32 %v9069_v58, %v9070_v15  ;;  %v8601_v23 = vand.u32 4294901760, %v8600_v18  ;;  %9136 = vmatprep.mubr.f32.mxu1 %v14989_v3 }
 0xb37   :  { %v9065_v61 = vsub.f32 %v9063_v56, %v9064_v44 }
 0xb38   :  { %8602 = vmatprep.subr.mxu0 %v8601_v23  ;;  %v9072_v14 = vand.u32 4294901760, %v9071_v2 }
 0xb39   :  { %8608 = vmatpush1.msra.mxu0 %v8607_v25  ;;  %v9066_v27 = vand.u32 4294901760, %v9065_v61 }
 0xb3a   :  { %8673 = vmatmul.mubr.f32.vlgmr.msra.gmra.mrb[12].mxu0 %v14584_v63  ;;  %8681 = vmatprep.subr.mxu0 %v8598_v31 }
 0xb3b   :  { %8684 = vmatpush1.msra.mxu0 %v8604_v34  ;;  %9067 = vmatprep.subr.mxu1 %v9066_v27  ;;  %v9458_v34 = vpop.permute.xlu1 %9457 }
 0xb3c   :  { %8757 = vmatprep.subr.mxu0 %v8519_v7  ;;  %9073 = vmatpush1.msra.mxu1 %v9072_v14 }
 0xb3d   :  { %9138 = vmatmul.mubr.f32.vlgmr.msra.gmra.mrb[12].mxu1 %v14584_v63  ;;  %9146 = vmatprep.subr.mxu1 %v9063_v56 }
 0xb3e   :  { %9149 = vmatpush1.msra.mxu1 %v9069_v58  ;;  %8747 = vmatprep.mubr.f32.mxu0 %v14989_v3 }
 0xb3f   :  { %9222 = vmatprep.subr.mxu1 %v8984_v17  ;;  %9212 = vmatprep.mubr.f32.mxu1 %v14989_v3 }
 0xb42   :  { %8750 = vmatmul.mubr.f32.vlgmr.msra.gmra.mrb[12].mxu0 %v8587_v30 }
 0xb43   :  { %8759 = vmatpush1.msra.mxu0 %v8521_v26  ;;  %8822 = vmatprep.mubr.f32.mxu0 %v14989_v3 }
 0xb44   :  { %8835 = vmatprep.subr.mxu0 %v8599_v50 }
 0xb45   :  { %9215 = vmatmul.mubr.f32.vlgmr.msra.gmra.mrb[12].mxu1 %v8587_v30 }
 0xb46   :  { %9224 = vmatpush1.msra.mxu1 %v8986_v8  ;;  %9287 = vmatprep.mubr.f32.mxu1 %v14989_v3 }
 0xb47   :  { %9300 = vmatprep.subr.mxu1 %v9064_v44 }
 0xb4a   :  { %8826 = vmatmul.mubr.f32.vlgmr.msra.gmra.mrb[12].mxu0 %v14587_v0 }
 0xb4b   :  { %8839 = vmatpush1.msra.mxu0 %v8605_v47  ;;  %8902 = vmatprep.mubr.f32.mxu0 %v14989_v3 }
 0xb4c   :  { %8911 = vmatprep.subr.mxu0 %v8519_v7 }
 0xb4d   :  { %9291 = vmatmul.mubr.f32.vlgmr.msra.gmra.mrb[12].mxu1 %v14587_v0 }
 0xb4e   :  { %9304 = vmatpush1.msra.mxu1 %v9070_v15  ;;  %9367 = vmatprep.mubr.f32.mxu1 %v14989_v3 }
 0xb4f   :  { %9376 = vmatprep.subr.mxu1 %v8984_v17 }
 0xb52   :  { %8904 = vmatmul.mubr.f32.vlgmr.msra.gmra.mrb[12].mxu0 %v14584_v63 }
 0xb53   :  { %8913 = vmatpush1.msra.mxu0 %v8521_v26  ;;  %8976 = vmatprep.mubr.f32.mxu0 %v14989_v3 }
 0xb55   :  { %9369 = vmatmul.mubr.f32.vlgmr.msra.gmra.mrb[12].mxu1 %v14584_v63 }
 0xb56   :  { %9378 = vmatpush1.msra.mxu1 %v8986_v8  ;;  %9441 = vmatprep.mubr.f32.mxu1 %v14989_v3 }
 0xb5a   :  { %8978 = vmatmul.mubr.f32.vlgmr.msra.gmra.mrb[12].mxu0 %v14584_v63 }
 0xb5b   :  { %9529 = vmatprep.mubr.f32.mxu0 %v14989_v3 }
 0xb5d   :  { %9443 = vmatmul.mubr.f32.vlgmr.msra.gmra.mrb[12].mxu1 %v14584_v63  ;;  %v15449_v63 = vld [vmem:[#allocation65_spill] sm:$0xff] }
 0xb5e   :  { %9994 = vmatprep.mubr.f32.mxu1 %v14989_v3 }
 0xc2d   :  { %v8979_v5 = vpop.f32.mrb[12].mxu0 }
 0xc2e   :  { %v11025_v39 = vadd.f32 %v8979_v5, %v8514_v42  ;;  %v8981_v32 = vpop.f32.mrb[13].mxu0 }
 0xc2f   :  { %v11026_v43 = vadd.f32 %v8981_v32, %v8514_v42 }
 0xc30   :  { %v9449_v9 = vadd.f32 %v11025_v39, %v15446_v57  ;;  %v9444_v22 = vpop.f32.mrb[12].mxu1 }
 0xc31   :  { %v9450_v1 = vadd.f32 %v11026_v43, %v15447_v6  ;;  %v11027_v52 = vadd.f32 %v9444_v22, %v8514_v42  ;;  %v9446_v29 = vpop.f32.mrb[13].mxu1 }
 0xc32   :  { %v9465_v59 = vand.u32 4294901760, %v9449_v9  ;;  %v11028_v41 = vadd.f32 %v9446_v29, %v8514_v42 }
 0xc33   :  { %v9463_v51 = vand.u32 4294901760, %v9450_v1  ;;  %v9451_v48 = vadd.f32 %v11027_v52, %v15448_v11 }
 0xc34   :  { %v9548_v12 = vsub.f32 %v9449_v9, %v9465_v59  ;;  %v9452_v30 = vadd.f32 %v11028_v41, %v15449_v63 }
 0xc35   :  { %v9542_v0 = vsub.f32 %v9450_v1, %v9463_v51  ;;  %v9930_v13 = vand.u32 4294901760, %v9451_v48  ;;  %9464 = vmatprep.subr.mxu0 %v9463_v51 }
 0xc36   :  { %v9549_v19 = vand.u32 4294901760, %v9548_v12  ;;  %v9928_v53 = vand.u32 4294901760, %v9452_v30  ;;  %9466 = vmatpush1.msra.mxu0 %v9465_v59 }
 0xc37   :  { %v10013_v46 = vsub.f32 %v9451_v48, %v9930_v13  ;;  %9535 = vmatmul.mubr.f32.vlgmr.msra.gmra.mrb[14].mxu0 %v9534_v35  ;;  %v9543_v20 = vand.u32 4294901760, %v9542_v0 }
 0xc38   :  { %v10007_v24 = vsub.f32 %v9452_v30, %v9928_v53  ;;  %9929 = vmatprep.subr.mxu1 %v9928_v53  ;;  %v9550_v10 = vsub.f32 %v9548_v12, %v9549_v19  ;;  %9615 = vmatprep.mubr.f32.mxu0 %v14989_v3 }
 0xc39   :  { %v10014_v49 = vand.u32 4294901760, %v10013_v46  ;;  %9931 = vmatpush1.msra.mxu1 %v9930_v13  ;;  %v9544_v45 = vsub.f32 %v9542_v0, %v9543_v20 }
 0xc3a   :  { %10000 = vmatmul.mubr.f32.vlgmr.msra.gmra.mrb[14].mxu1 %v9534_v35  ;;  %v10008_v21 = vand.u32 4294901760, %v10007_v24  ;;  %v9551_v33 = vand.u32 4294901760, %v9550_v10 }
 0xc3b   :  { %v9545_v62 = vand.u32 4294901760, %v9544_v45  ;;  %v10015_v26 = vsub.f32 %v10013_v46, %v10014_v49  ;;  %10080 = vmatprep.mubr.f32.mxu1 %v14989_v3 }
 0xc3c   :  { %v10009_v7 = vsub.f32 %v10007_v24, %v10008_v21 }
 0xc3d   :  { %9546 = vmatprep.subr.mxu0 %v9545_v62  ;;  %v10016_v55 = vand.u32 4294901760, %v10015_v26 }
 0xc3e   :  { %9552 = vmatpush1.msra.mxu0 %v9551_v33  ;;  %v10010_v54 = vand.u32 4294901760, %v10009_v7 }
 0xc3f   :  { %9617 = vmatmul.mubr.f32.vlgmr.msra.gmra.mrb[14].mxu0 %v14614_v40  ;;  %9625 = vmatprep.subr.mxu0 %v9542_v0 }
 0xc40   :  { %9628 = vmatpush1.msra.mxu0 %v9548_v12  ;;  %10011 = vmatprep.subr.mxu1 %v10010_v54 }
 0xc41   :  { %9701 = vmatprep.subr.mxu0 %v9463_v51  ;;  %10017 = vmatpush1.msra.mxu1 %v10016_v55 }
 0xc42   :  { %10082 = vmatmul.mubr.f32.vlgmr.msra.gmra.mrb[14].mxu1 %v14614_v40  ;;  %10090 = vmatprep.subr.mxu1 %v10007_v24 }
 0xc43   :  { %10093 = vmatpush1.msra.mxu1 %v10013_v46  ;;  %9691 = vmatprep.mubr.f32.mxu0 %v14989_v3 }
 0xc44   :  { %10166 = vmatprep.subr.mxu1 %v9928_v53  ;;  %10156 = vmatprep.mubr.f32.mxu1 %v14989_v3 }
 0xc47   :  { %9694 = vmatmul.mubr.f32.vlgmr.msra.gmra.mrb[14].mxu0 %v9531_v37 }
 0xc48   :  { %9703 = vmatpush1.msra.mxu0 %v9465_v59  ;;  %9766 = vmatprep.mubr.f32.mxu0 %v14989_v3 }
 0xc49   :  { %9779 = vmatprep.subr.mxu0 %v9543_v20 }
 0xc4a   :  { %10159 = vmatmul.mubr.f32.vlgmr.msra.gmra.mrb[14].mxu1 %v9531_v37 }
 0xc4b   :  { %10168 = vmatpush1.msra.mxu1 %v9930_v13  ;;  %10231 = vmatprep.mubr.f32.mxu1 %v14989_v3 }
 0xc4c   :  { %10244 = vmatprep.subr.mxu1 %v10008_v21 }
 0xc4f   :  { %9770 = vmatmul.mubr.f32.vlgmr.msra.gmra.mrb[14].mxu0 %v14617_v4 }
 0xc50   :  { %9783 = vmatpush1.msra.mxu0 %v9549_v19  ;;  %9846 = vmatprep.mubr.f32.mxu0 %v14989_v3 }
 0xc51   :  { %9855 = vmatprep.subr.mxu0 %v9463_v51 }
 0xc52   :  { %10235 = vmatmul.mubr.f32.vlgmr.msra.gmra.mrb[14].mxu1 %v14617_v4 }
 0xc53   :  { %10248 = vmatpush1.msra.mxu1 %v10014_v49  ;;  %10311 = vmatprep.mubr.f32.mxu1 %v14989_v3 }
 0xc54   :  { %10320 = vmatprep.subr.mxu1 %v9928_v53 }
 0xc57   :  { %9848 = vmatmul.mubr.f32.vlgmr.msra.gmra.mrb[14].mxu0 %v14614_v40 }
 0xc58   :  { %9857 = vmatpush1.msra.mxu0 %v9465_v59  ;;  %9920 = vmatprep.mubr.f32.mxu0 %v14989_v3 }
 0xc5a   :  { %10313 = vmatmul.mubr.f32.vlgmr.msra.gmra.mrb[14].mxu1 %v14614_v40 }
 0xc5b   :  { %10322 = vmatpush1.msra.mxu1 %v9930_v13  ;;  %10385 = vmatprep.mubr.f32.mxu1 %v14989_v3 }
 0xc5f   :  { %9922 = vmatmul.mubr.f32.vlgmr.msra.gmra.mrb[14].mxu0 %v14614_v40 }
 0xc62   :  { %10387 = vmatmul.mubr.f32.vlgmr.msra.gmra.mrb[14].mxu1 %v14614_v40 }
 0xd32   :  { %v9923_v28 = vpop.f32.mrb[14].mxu0 }
 0xd33   :  { %v11029_v31 = vadd.f32 %v9923_v28, %v9458_v34  ;;  %v9925_v8 = vpop.f32.mrb[15].mxu0 }
 0xd34   :  { %v11030_v47 = vadd.f32 %v9925_v8, %v9458_v34 }
 0xd35   :  { %v10393_v17 = vmax.f32 %v11029_v31, 0.0  ;;  %v10388_v58 = vpop.f32.mrb[14].mxu1 }
 0xd36   :  { %v10394_v50 = vmax.f32 %v11030_v47, 0.0  ;;  %v11031_v38 = vadd.f32 %v10388_v58, %v9458_v34  ;;  %v10390_v56 = vpop.f32.mrb[15].mxu1 }
 0xd37   :  { %v11032_v15 = vadd.f32 %v10390_v56, %v9458_v34 }
 0xd38   :  { %v10401_v18 = vcombine.low %v10393_v17, %v10394_v50  ;;  %v10395_v44 = vmax.f32 %v11031_v38, 0.0 }
 0xd39   :  { %v10396_v2 = vmax.f32 %v11032_v15, 0.0 }
 0xd3a   :  { %10405 = vst [vmem:[%s14667_s19] sm:$0xff] %v10401_v18 }
 0xd3b   :  { %v10402_v3 = vcombine.low %v10395_v44, %v10396_v2 }
 0xd3d   :  { %10406 = vst [vmem:[%s14667_s19 + $0x8] sm:$0xff] %v10402_v3 }

</bundles_post_ra>
